<compile_context>
chip_gen: v7x
topology: tpu7x:2x2x1
jax: 0.10.0
libtpu: 0.0.40
codegen_flags: <defaults>
</compile_context>

<pallas_src>
import math
import numpy as np

import jax
import jax.numpy as jnp
from jax.experimental import pallas as pl
from jax.experimental.pallas import tpu as pltpu

_LN_EPS = 1e-5


# ----------------------------------------------------------------------------
# generation-aware tiling / compiler params
# ----------------------------------------------------------------------------
def _vmem_capacity_bytes():
    try:
        return int(pltpu.get_tpu_info().vmem_capacity_bytes)
    except Exception:
        return 64 * 1024 * 1024          # conservative (v7x-sized) fallback


_VMEM_CAP = _vmem_capacity_bytes()
# v5e/v6e (128 MiB VMEM): 1024-row tiles get close to the HBM roofline.
# v7x (64 MiB VMEM): stay at 384 rows so double-buffered tiles + resident weights fit.
_ROW_CAP = 1024 if _VMEM_CAP >= (100 << 20) else 384
_WIN_ROW_CAP = min(512, _ROW_CAP)                    # rows per attention window tile
_VMEM_LIMIT = int(min(_VMEM_CAP * 3 // 4, 96 << 20))


def _cparams():
    return pltpu.CompilerParams(dimension_semantics=("parallel",),
                                vmem_limit_bytes=_VMEM_LIMIT)


def _row_tile(m, cap):
    """Largest exact divisor of m that is <= cap (prefers multiples of 8)."""
    if m <= cap:
        return m
    best = 1
    for t in range(8, cap + 1, 8):
        if m % t == 0:
            best = t
    if best == 1:
        for t in range(cap, 0, -1):
            if m % t == 0:
                best = t
                break
    return best


def _window_tile(n_windows, tokens_per_window, cap_rows):
    """Largest divisor of n_windows with wt * tokens_per_window <= cap_rows."""
    best = 1
    for wt in range(1, n_windows + 1):
        if n_windows % wt == 0 and wt * tokens_per_window <= cap_rows:
            best = wt
    return best


# ----------------------------------------------------------------------------
# small helpers used inside kernels
# ----------------------------------------------------------------------------
def _layernorm(x, g, b):
    mu = jnp.mean(x, axis=-1, keepdims=True)
    var = jnp.mean(jnp.square(x - mu), axis=-1, keepdims=True)
    return (x - mu) * jax.lax.rsqrt(var + _LN_EPS) * g + b


def _gelu_erf(x):
    """Exact (erf-based) GELU as in torch.nn.GELU(); erf via Abramowitz-Stegun
    7.1.26 (|err| < 1.5e-7), built only from exp/abs/select (VPU/EUP friendly)."""
    z = x * 0.7071067811865476
    az = jnp.abs(z)
    t = 1.0 / (1.0 + 0.3275911 * az)
    poly = ((((1.061405429 * t - 1.453152027) * t + 1.421413741) * t
             - 0.284496736) * t + 0.254829592) * t
    erf_abs = 1.0 - poly * jnp.exp(-az * az)
    erf_z = jnp.where(z >= 0, erf_abs, -erf_abs)
    return 0.5 * x * (1.0 + erf_z)


# ----------------------------------------------------------------------------
# Pallas kernels (fused)
# ----------------------------------------------------------------------------
def pallas_patch_embed(xp, p):
    """(M, Cin*patch*patch) @ W + b then LayerNorm  (== Conv2d(k=4, s=4) + LN)."""
    M, K = xp.shape
    C = p["w"].shape[1]
    tm = _row_tile(M, _ROW_CAP)
    assert M % tm == 0

    def kernel(x_ref, w_ref, b_ref, g_ref, bb_ref, o_ref):
        y = jnp.dot(x_ref[...].astype(jnp.bfloat16), w_ref[...].astype(jnp.bfloat16),
                    preferred_element_type=jnp.float32) + b_ref[...]
        o_ref[...] = _layernorm(y, g_ref[...], bb_ref[...]).astype(o_ref.dtype)

    return pl.pallas_call(
        kernel,
        grid=(M // tm,),
        out_shape=jax.ShapeDtypeStruct((M, C), xp.dtype),
        in_specs=[
            pl.BlockSpec((tm, K), lambda i: (i, 0)),
            pl.BlockSpec((K, C), lambda i: (0, 0)),
            pl.BlockSpec((1, C), lambda i: (0, 0)),
            pl.BlockSpec((1, C), lambda i: (0, 0)),
            pl.BlockSpec((1, C), lambda i: (0, 0)),
        ],
        out_specs=pl.BlockSpec((tm, C), lambda i: (i, 0)),
        compiler_params=_cparams(),
    )(xp, p["w"], p["b"].reshape(1, C),
      p["norm_g"].reshape(1, C), p["norm_b"].reshape(1, C))


def pallas_swin_block(xw, blk, nH, N, nW):
    """One fused Pallas launch per Swin block:
         LN1 -> flat QKV matmul -> batched multi-head window attention
         -> flat output projection -> +residual -> LN2 -> MLP -> +residual.

    xw   : (B*nW*N, C)  tokens in rolled + windowed order (lane-dense 2-D slab)
    bias : (nH, nW, N, N) bf16, batch-invariant rel-pos bias (+ shift mask)
    out  : (B*nW*N, C)  block output in the same windowed layout
    """
    M, C = xw.shape
    assert M % N == 0
    BnW = M // N
    hd = C // nH
    scale = float(hd) ** -0.5
    C3 = 3 * C
    Hd = blk["mlp1_w"].shape[1]
    bias = blk["attn_bias"]
    assert bias.shape == (nH, nW, N, N), bias.shape

    wt = _window_tile(nW, N, _WIN_ROW_CAP)      # windows per grid step (divides nW)
    nwb = nW // wt
    assert BnW % wt == 0
    grid = (BnW // wt,)
    rows = wt * N

    bias_map = (lambda i: (0, 0, 0, 0)) if nwb == 1 else (lambda i: (0, i % nwb, 0, 0))

    def kernel(x_ref, g1_ref, b1_ref, qw_ref, qb_ref, pw_ref, pb_ref, bias_ref,
               g2_ref, b2_ref, w1_ref, bm1_ref, w2_ref, bm2_ref, o_ref):
        x = x_ref[...].astype(jnp.float32)                                 # (rows, C)
        xn = _layernorm(x, g1_ref[...], b1_ref[...]).astype(jnp.bfloat16)
        # --- one flat QKV matmul: (rows, C) @ (C, 3C)  (MXU-row friendly) ---
        qkv = jnp.dot(xn, qw_ref[...].astype(jnp.bfloat16),
                      preferred_element_type=jnp.float32) + qb_ref[...]
        qkv = qkv.reshape(wt, N, C3)
        # --- split heads into the batch dim (head-major, matches bias layout) ---
        q = jnp.concatenate([qkv[:, :, h * hd:(h + 1) * hd]
                             for h in range(nH)], axis=0) * scale          # (nH*wt,N,hd)
        k = jnp.concatenate([qkv[:, :, C + h * hd:C + (h + 1) * hd]
                             for h in range(nH)], axis=0)
        v = jnp.concatenate([qkv[:, :, 2 * C + h * hd:2 * C + (h + 1) * hd]
                             for h in range(nH)], axis=0)
        # --- batched attention over all (head, window) pairs in one einsum each ---
        s = jnp.einsum("bqd,bkd->bqk", q.astype(jnp.bfloat16), k.astype(jnp.bfloat16),
                       preferred_element_type=jnp.float32)                  # (nH*wt,N,N)
        s = s + bias_ref[...].astype(jnp.float32).reshape(nH * wt, N, N)
        s = s - jnp.max(s, axis=-1, keepdims=True)
        p = jnp.exp(s)
        denom = jnp.sum(p, axis=-1, keepdims=True)
        o = jnp.einsum("bqk,bkd->bqd", p.astype(jnp.bfloat16), v.astype(jnp.bfloat16),
                       preferred_element_type=jnp.float32)                  # (nH*wt,N,hd)
        o = o * pl.reciprocal(denom, approx=True)       # deferred softmax norm (EUP)
        # --- re-interleave heads into channels; one flat output projection ---
        oc = jnp.concatenate([o[h * wt:(h + 1) * wt] for h in range(nH)], axis=-1)
        attn = jnp.dot(oc.reshape(rows, C).astype(jnp.bfloat16),
                       pw_ref[...].astype(jnp.bfloat16),
                       preferred_element_type=jnp.float32) + pb_ref[...]
        # --- residual + LN2 + MLP (exact-erf GELU) + residual, all in VMEM ---
        y = x + attn
        h1 = _layernorm(y, g2_ref[...], b2_ref[...])
        h1 = jnp.dot(h1.astype(jnp.bfloat16), w1_ref[...].astype(jnp.bfloat16),
                     preferred_element_type=jnp.float32) + bm1_ref[...]
        h1 = _gelu_erf(h1)
        h1 = jnp.dot(h1.astype(jnp.bfloat16), w2_ref[...].astype(jnp.bfloat16),
                     preferred_element_type=jnp.float32) + bm2_ref[...]
        o_ref[...] = (y + h1).astype(o_ref.dtype)

    return pl.pallas_call(
        kernel,
        grid=grid,
        out_shape=jax.ShapeDtypeStruct((M, C), xw.dtype),
        in_specs=[
            pl.BlockSpec((rows, C), lambda i: (i, 0)),        # tokens
            pl.BlockSpec((1, C), lambda i: (0, 0)),           # norm1 gamma
            pl.BlockSpec((1, C), lambda i: (0, 0)),           # norm1 beta
            pl.BlockSpec((C, C3), lambda i: (0, 0)),          # qkv weight
            pl.BlockSpec((1, C3), lambda i: (0, 0)),          # qkv bias
            pl.BlockSpec((C, C), lambda i: (0, 0)),           # proj weight
            pl.BlockSpec((1, C), lambda i: (0, 0)),           # proj bias
            pl.BlockSpec((nH, wt, N, N), bias_map),           # rel-pos + shift bias (bf16)
            pl.BlockSpec((1, C), lambda i: (0, 0)),           # norm2 gamma
            pl.BlockSpec((1, C), lambda i: (0, 0)),           # norm2 beta
            pl.BlockSpec((C, Hd), lambda i: (0, 0)),          # mlp1 weight
            pl.BlockSpec((1, Hd), lambda i: (0, 0)),          # mlp1 bias
            pl.BlockSpec((Hd, C), lambda i: (0, 0)),          # mlp2 weight
            pl.BlockSpec((1, C), lambda i: (0, 0)),           # mlp2 bias
        ],
        out_specs=pl.BlockSpec((rows, C), lambda i: (i, 0)),
        compiler_params=_cparams(),
    )(xw,
      blk["norm1_g"].reshape(1, C), blk["norm1_b"].reshape(1, C),
      blk["qkv_w"], blk["qkv_b"].reshape(1, C3),
      blk["proj_w"], blk["proj_b"].reshape(1, C),
      bias,
      blk["norm2_g"].reshape(1, C), blk["norm2_b"].reshape(1, C),
      blk["mlp1_w"], blk["mlp1_b"].reshape(1, Hd),
      blk["mlp2_w"], blk["mlp2_b"].reshape(1, C))


def pallas_patch_merge(xc, p):
    """LayerNorm(4C) + reduction Linear(4C -> 2C, no bias), fused."""
    M, C4 = xc.shape
    C2 = p["w"].shape[1]
    tm = _row_tile(M, _ROW_CAP)
    assert M % tm == 0

    def kernel(x_ref, g_ref, b_ref, w_ref, o_ref):
        xn = _layernorm(x_ref[...].astype(jnp.float32), g_ref[...], b_ref[...])
        o_ref[...] = jnp.dot(xn.astype(jnp.bfloat16), w_ref[...].astype(jnp.bfloat16),
                             preferred_element_type=jnp.float32).astype(o_ref.dtype)

    return pl.pallas_call(
        kernel,
        grid=(M // tm,),
        out_shape=jax.ShapeDtypeStruct((M, C2), xc.dtype),
        in_specs=[
            pl.BlockSpec((tm, C4), lambda i: (i, 0)),
            pl.BlockSpec((1, C4), lambda i: (0, 0)),
            pl.BlockSpec((1, C4), lambda i: (0, 0)),
            pl.BlockSpec((C4, C2), lambda i: (0, 0)),
        ],
        out_specs=pl.BlockSpec((tm, C2), lambda i: (i, 0)),
        compiler_params=_cparams(),
    )(xc, p["norm_g"].reshape(1, C4), p["norm_b"].reshape(1, C4), p["w"])


def pallas_tail_head(x3d, fn, head, skip1, skip2):
    """Fused tail (gridded over batch): final LayerNorm + in-kernel mean pool +
    main head (Dropout->Linear, eval) + skip head (Linear->ReLU->Linear), summed."""
    B, L, C = x3d.shape
    ncls = head["w"].shape[1]
    hid = skip1["w"].shape[1]

    def kernel(x_ref, g_ref, b_ref, hw_ref, hb_ref,
               w1_ref, b1_ref, w2_ref, b2_ref, o_ref):
        x = x_ref[...].astype(jnp.float32)                      # (1, L, C)
        xn = _layernorm(x, g_ref[...], b_ref[...])
        feat = jnp.mean(xn, axis=1)                             # (1, C) global mean pool
        fb = feat.astype(jnp.bfloat16)
        main = jnp.dot(fb, hw_ref[...].astype(jnp.bfloat16),
                       preferred_element_type=jnp.float32) + hb_ref[...]
        h = jnp.dot(fb, w1_ref[...].astype(jnp.bfloat16),
                    preferred_element_type=jnp.float32) + b1_ref[...]
        h = jnp.maximum(h, 0.0)
        skip = jnp.dot(h.astype(jnp.bfloat16), w2_ref[...].astype(jnp.bfloat16),
                       preferred_element_type=jnp.float32) + b2_ref[...]
        o_ref[...] = (main + skip).reshape(1, 1, ncls).astype(o_ref.dtype)

    out = pl.pallas_call(
        kernel,
        grid=(B,),
        out_shape=jax.ShapeDtypeStruct((B, 1, ncls), x3d.dtype),
        in_specs=[
            pl.BlockSpec((1, L, C), lambda i: (i, 0, 0)),
            pl.BlockSpec((1, C), lambda i: (0, 0)),
            pl.BlockSpec((1, C), lambda i: (0, 0)),
            pl.BlockSpec((C, ncls), lambda i: (0, 0)),
            pl.BlockSpec((1, ncls), lambda i: (0, 0)),
            pl.BlockSpec((C, hid), lambda i: (0, 0)),
            pl.BlockSpec((1, hid), lambda i: (0, 0)),
            pl.BlockSpec((hid, ncls), lambda i: (0, 0)),
            pl.BlockSpec((1, ncls), lambda i: (0, 0)),
        ],
        out_specs=pl.BlockSpec((1, 1, ncls), lambda i: (i, 0, 0)),
        compiler_params=_cparams(),
    )(x3d, fn["g"].reshape(1, C), fn["b"].reshape(1, C),
      head["w"], head["b"].reshape(1, ncls),
      skip1["w"], skip1["b"].reshape(1, hid),
      skip2["w"], skip2["b"].reshape(1, ncls))
    return out.reshape(B, ncls)


# ----------------------------------------------------------------------------
# plain-JAX glue (window partition / roll / strided patch gather = pure layout)
# ----------------------------------------------------------------------------
def window_partition(x, ws):
    B, H, W, C = x.shape
    x = x.reshape(B, H // ws, ws, W // ws, ws, C).transpose(0, 1, 3, 2, 4, 5)
    return x.reshape(B * (H // ws) * (W // ws), ws * ws, C)


def window_reverse(xw, ws, B, H, W, C):
    x = xw.reshape(B, H // ws, W // ws, ws, ws, C).transpose(0, 1, 3, 2, 4, 5)
    return x.reshape(B, H, W, C)


def run_stage(x, stage):
    """Run all Swin blocks of one stage, keeping activations in the
    rolled + windowed token layout between blocks; only re-partition / re-roll
    when the window shift actually changes (minimal XLA layout round trips)."""
    B, H, W, C = x.shape
    ws, nH = stage["ws"], stage["heads"]
    N = ws * ws
    nW = (H // ws) * (W // ws)
    if not stage["blocks"]:
        return x
    cur_shift = None
    xw = None
    for blk in stage["blocks"]:
        shift = blk["shift"]
        if xw is None:
            xr = jnp.roll(x, (-shift, -shift), (1, 2)) if shift else x
            xw = window_partition(xr, ws).reshape(B * nW * N, C)
        elif shift != cur_shift:
            xr = window_reverse(xw.reshape(B * nW, N, C), ws, B, H, W, C)
            d = shift - cur_shift
            xr = jnp.roll(xr, (-d, -d), (1, 2))
            xw = window_partition(xr, ws).reshape(B * nW * N, C)
        cur_shift = shift
        xw = pallas_swin_block(xw, blk, nH, N, nW)
    x = window_reverse(xw.reshape(B * nW, N, C), ws, B, H, W, C)
    if cur_shift:
        x = jnp.roll(x, (cur_shift, cur_shift), (1, 2))
    return x


def patch_merging(x, p):
    B, H, W, C = x.shape
    x0 = x[:, 0::2, 0::2, :]
    x1 = x[:, 1::2, 0::2, :]
    x2 = x[:, 0::2, 1::2, :]
    x3 = x[:, 1::2, 1::2, :]
    xc = jnp.concatenate([x0, x1, x2, x3], axis=-1).reshape(-1, 4 * C)
    return pallas_patch_merge(xc, p).reshape(B, H // 2, W // 2, 2 * C)


def patch_embed(x_nchw, p, patch=4):
    B, Cin, H, W = x_nchw.shape
    Hp, Wp = H // patch, W // patch
    x = x_nchw.reshape(B, Cin, Hp, patch, Wp, patch)
    x = x.transpose(0, 2, 4, 1, 3, 5).reshape(B * Hp * Wp, Cin * patch * patch)
    return pallas_patch_embed(x, p).reshape(B, Hp, Wp, -1)


# ----------------------------------------------------------------------------
# full forward pass (backbone + head + skip-connection, eval mode)
# ----------------------------------------------------------------------------
def swin_forward(x_nchw, params):
    # TODO(synk): VisualPromptTemplate path (bilinear interpolate + mask blend) not
    # implemented; module default use_visual_prompting=False, classification mode only.
    x = patch_embed(x_nchw, params["patch_embed"])
    for si, stage in enumerate(params["stages"]):
        x = run_stage(x, stage)
        if si < len(params["merges"]):
            x = patch_merging(x, params["merges"][si])
    B, H, W, C = x.shape
    return pallas_tail_head(x.reshape(B, H * W, C), params["final_norm"],
                            params["head"], params["skip1"], params["skip2"])


# ----------------------------------------------------------------------------
# deterministic synthetic parameter initialisation (+ precomputed attn biases)
# ----------------------------------------------------------------------------
class KeyGen:
    def __init__(self, key):
        self.key = key

    def __call__(self):
        self.key, k = jax.random.split(self.key)
        return k


def _linear_p(kg, fan_in, fan_out):
    std = math.sqrt(2.0 / (1.0 + 0.01 ** 2) / fan_out)    # kaiming_normal(fan_out, leaky_relu)
    w = jax.random.normal(kg(), (fan_in, fan_out), jnp.float32) * std
    b = jnp.zeros((fan_out,), jnp.float32)
    return w, b


def _attn_bias(rel_table, ws, nH, H, W, shift):
    """Precompute rel-pos bias (+ shifted-window mask) once at init.
    Batch-invariant, head-major, bf16:  shape (nH, nW, N, N)."""
    coords = np.stack(np.meshgrid(np.arange(ws), np.arange(ws), indexing="ij"))
    cf = coords.reshape(2, -1)
    rel = (cf[:, :, None] - cf[:, None, :]).transpose(1, 2, 0) + (ws - 1)
    idx = rel[..., 0] * (2 * ws - 1) + rel[..., 1]
    N = ws * ws
    tbl = np.asarray(rel_table)
    bias = tbl[idx.reshape(-1)].reshape(N, N, nH).transpose(2, 0, 1)        # (nH,N,N)
    nW = (H // ws) * (W // ws)
    full = np.broadcast_to(bias[:, None], (nH, nW, N, N)).astype(np.float32).copy()
    if shift > 0:
        img = np.zeros((H, W), np.float32)
        cnt = 0
        for hs in (slice(0, -ws), slice(-ws, -shift), slice(-shift, None)):
            for wsl in (slice(0, -ws), slice(-ws, -shift), slice(-shift, None)):
                img[hs, wsl] = cnt
                cnt += 1
        mw = img.reshape(H // ws, ws, W // ws, ws).transpose(0, 2, 1, 3).reshape(nW, N)
        diff = mw[:, None, :] - mw[:, :, None]
        full = full + np.where(diff != 0, -100.0, 0.0).astype(np.float32)[None]
    return jnp.asarray(np.ascontiguousarray(full)).astype(jnp.bfloat16)


def init_model_params(key, *, in_channels=3, image_hw=(32, 32), embed_dim=32,
                      depths=(2, 2), heads=(2, 4), window_size=4, num_classes=5,
                      mlp_ratio=4, patch=4):
    kg = KeyGen(key)
    params = {}

    pe_w, pe_b = _linear_p(kg, in_channels * patch * patch, embed_dim)
    params["patch_embed"] = dict(
        w=pe_w, b=pe_b,
        norm_g=jnp.ones((embed_dim,), jnp.float32),
        norm_b=jnp.zeros((embed_dim,), jnp.float32))

    H, W = image_hw[0] // patch, image_hw[1] // patch
    C = embed_dim
    stages, merges = [], []
    for si, (depth, nH) in enumerate(zip(depths, heads)):
        blocks = []
        for bi in range(depth):
            qkv_w, qkv_b = _linear_p(kg, C, 3 * C)
            proj_w, proj_b = _linear_p(kg, C, C)
            m1_w, m1_b = _linear_p(kg, C, mlp_ratio * C)
            m2_w, m2_b = _linear_p(kg, mlp_ratio * C, C)
            rel_table = np.asarray(jax.random.normal(
                kg(), ((2 * window_size - 1) ** 2, nH), jnp.float32)) * 0.02
            raw_shift = 0 if bi % 2 == 0 else window_size // 2
            shift = 0 if window_size >= min(H, W) else raw_shift      # torchvision clamp
            bias = _attn_bias(rel_table, window_size, nH, H, W, shift)
            blocks.append(dict(
                shift=shift,
                norm1_g=jnp.ones((C,), jnp.float32), norm1_b=jnp.zeros((C,), jnp.float32),
                qkv_w=qkv_w, qkv_b=qkv_b, proj_w=proj_w, proj_b=proj_b,
                attn_bias=bias,
                norm2_g=jnp.ones((C,), jnp.float32), norm2_b=jnp.zeros((C,), jnp.float32),
                mlp1_w=m1_w, mlp1_b=m1_b, mlp2_w=m2_w, mlp2_b=m2_b))
        stages.append(dict(blocks=blocks, heads=nH, ws=window_size))
        if si < len(depths) - 1:
            mr_w, _ = _linear_p(kg, 4 * C, 2 * C)
            merges.append(dict(
                norm_g=jnp.ones((4 * C,), jnp.float32),
                norm_b=jnp.zeros((4 * C,), jnp.float32),
                w=mr_w))
            C, H, W = 2 * C, H // 2, W // 2

    params["stages"] = stages
    params["merges"] = merges
    params["final_norm"] = dict(g=jnp.ones((C,), jnp.float32),
                                b=jnp.zeros((C,), jnp.float32))

    hw_, hb_ = _linear_p(kg, C, num_classes)
    s1w, s1b = _linear_p(kg, C, 128)
    s2w, s2b = _linear_p(kg, 128, num_classes)
    params["head"] = dict(w=hw_, b=hb_)
    params["skip1"] = dict(w=s1w, b=s1b)
    params["skip2"] = dict(w=s2w, b=s2b)
    return params


# ----------------------------------------------------------------------------
if __name__ == "__main__":
    key = jax.random.PRNGKey(0)
    kx, kp = jax.random.split(key)

    # Small-scale configuration consistent with the module: batch=2, 3-channel
    # NCHW image, 32x32 spatial (miniature Swin backbone, num_classes=5,
    # classification mode, no visual prompting).
    x = jax.random.normal(kx, (2, 3, 32, 32), jnp.float32)
    params = init_model_params(kp, in_channels=3, image_hw=(32, 32))

    fwd = jax.jit(lambda inp: swin_forward(inp, params))
    out = jax.block_until_ready(fwd(x))

    assert out.shape == (2, 5), out.shape
    assert bool(jnp.all(jnp.isfinite(out)))
    print("KERNEL_OK")
</pallas_src>

<mosaic_0001>
module attributes {stable_mosaic.version = 11 : i64} {
  func.func @kernel(%arg0: i32, %arg1: memref<128x48xf32, #tpu.memory_space<vmem>>, %arg2: memref<48x32xf32, #tpu.memory_space<vmem>>, %arg3: memref<1x32xf32, #tpu.memory_space<vmem>>, %arg4: memref<1x32xf32, #tpu.memory_space<vmem>>, %arg5: memref<1x32xf32, #tpu.memory_space<vmem>>, %arg6: memref<128x32xf32, #tpu.memory_space<vmem>>) attributes {dimension_semantics = [#tpu.dimension_semantics<parallel>], iteration_bounds = array<i64: 1>, scalar_prefetch = 0 : i64, scratch_operands = 0 : i64, tpu.core_type = #tpu.core_type<tc>, window_params = [{transform_indices = @transform_0, window_bounds = array<i64: 128, 48>}, {pipeline_mode = #tpu.pipeline_mode<synchronous>, transform_indices = @transform_1, window_bounds = array<i64: 48, 32>}, {pipeline_mode = #tpu.pipeline_mode<synchronous>, transform_indices = @transform_2, window_bounds = array<i64: 1, 32>}, {pipeline_mode = #tpu.pipeline_mode<synchronous>, transform_indices = @transform_3, window_bounds = array<i64: 1, 32>}, {pipeline_mode = #tpu.pipeline_mode<synchronous>, transform_indices = @transform_4, window_bounds = array<i64: 1, 32>}, {transform_indices = @transform_5, window_bounds = array<i64: 128, 32>}]} {
    %c0 = arith.constant 0 : index
    %c0_0 = arith.constant 0 : index
    %0 = vector.load %arg1[%c0, %c0_0] : memref<128x48xf32, #tpu.memory_space<vmem>>, vector<128x48xf32>
    %1 = arith.truncf %0 : vector<128x48xf32> to vector<128x48xbf16>
    %c0_1 = arith.constant 0 : index
    %c0_2 = arith.constant 0 : index
    %2 = vector.load %arg2[%c0_1, %c0_2] : memref<48x32xf32, #tpu.memory_space<vmem>>, vector<48x32xf32>
    %3 = arith.truncf %2 : vector<48x32xf32> to vector<48x32xbf16>
    %cst = arith.constant dense<0.000000e+00> : vector<128x32xf32>
    %4 = tpu.matmul %1, %3, %cst {dimension_numbers = #tpu.dot_dimension_numbers<[1], [0], [0], [1], [0, 0, 1, 1], [], []>} : vector<128x48xbf16>, vector<48x32xbf16>, vector<128x32xf32> -> vector<128x32xf32>
    %c0_3 = arith.constant 0 : index
    %c0_4 = arith.constant 0 : index
    %5 = vector.load %arg3[%c0_3, %c0_4] : memref<1x32xf32, #tpu.memory_space<vmem>>, vector<1x32xf32>
    %6 = vector.broadcast %5 : vector<1x32xf32> to vector<128x32xf32>
    %7 = arith.addf %4, %6 : vector<128x32xf32>
    %c0_5 = arith.constant 0 : index
    %c0_6 = arith.constant 0 : index
    %8 = vector.load %arg4[%c0_5, %c0_6] : memref<1x32xf32, #tpu.memory_space<vmem>>, vector<1x32xf32>
    %c0_7 = arith.constant 0 : index
    %c0_8 = arith.constant 0 : index
    %9 = vector.load %arg5[%c0_7, %c0_8] : memref<1x32xf32, #tpu.memory_space<vmem>>, vector<1x32xf32>
    %cst_9 = arith.constant dense<0.000000e+00> : vector<128xf32>
    %10 = vector.multi_reduction <add>, %7, %cst_9 [1] : vector<128x32xf32> to vector<128xf32>
    %11 = vector.shape_cast %10 : vector<128xf32> to vector<128x1xf32>
    %cst_10 = arith.constant 3.200000e+01 : f32
    %12 = vector.broadcast %cst_10 : f32 to vector<128x1xf32>
    %13 = arith.divf %11, %12 : vector<128x1xf32>
    %14 = vector.broadcast %13 : vector<128x1xf32> to vector<128x32xf32>
    %15 = arith.subf %7, %14 : vector<128x32xf32>
    %16 = arith.mulf %15, %15 : vector<128x32xf32>
    %cst_11 = arith.constant dense<0.000000e+00> : vector<128xf32>
    %17 = vector.multi_reduction <add>, %16, %cst_11 [1] : vector<128x32xf32> to vector<128xf32>
    %18 = vector.shape_cast %17 : vector<128xf32> to vector<128x1xf32>
    %cst_12 = arith.constant 3.200000e+01 : f32
    %19 = vector.broadcast %cst_12 : f32 to vector<128x1xf32>
    %20 = arith.divf %18, %19 : vector<128x1xf32>
    %21 = vector.broadcast %13 : vector<128x1xf32> to vector<128x32xf32>
    %22 = arith.subf %7, %21 : vector<128x32xf32>
    %cst_13 = arith.constant 9.99999974E-6 : f32
    %23 = vector.broadcast %cst_13 : f32 to vector<128x1xf32>
    %24 = arith.addf %20, %23 : vector<128x1xf32>
    %25 = math.rsqrt %24 : vector<128x1xf32>
    %26 = vector.broadcast %25 : vector<128x1xf32> to vector<128x32xf32>
    %27 = arith.mulf %22, %26 : vector<128x32xf32>
    %28 = vector.broadcast %8 : vector<1x32xf32> to vector<128x32xf32>
    %29 = arith.mulf %27, %28 : vector<128x32xf32>
    %30 = vector.broadcast %9 : vector<1x32xf32> to vector<128x32xf32>
    %31 = arith.addf %29, %30 : vector<128x32xf32>
    %c0_14 = arith.constant 0 : index
    %c0_15 = arith.constant 0 : index
    %32 = vector.load %arg6[%c0_14, %c0_15] : memref<128x32xf32, #tpu.memory_space<vmem>>, vector<128x32xf32>
    tpu.vector_store %arg6[%c0_14, %c0_15], %31 {strides = array<i32>} : memref<128x32xf32, #tpu.memory_space<vmem>>, vector<128x32xf32>,
    return
  }
  func.func @transform_0(%arg0: i32) -> (i32, i32) {
    %c0_i32 = arith.constant 0 : i32
    %c0_i32_0 = arith.constant 0 : i32
    return %arg0, %c0_i32 : i32, i32
  }
  func.func @transform_1(%arg0: i32) -> (i32, i32) {
    %c0_i32 = arith.constant 0 : i32
    %c0_i32_0 = arith.constant 0 : i32
    %c0_i32_1 = arith.constant 0 : i32
    return %c0_i32, %c0_i32_0 : i32, i32
  }
  func.func @transform_2(%arg0: i32) -> (i32, i32) {
    %c0_i32 = arith.constant 0 : i32
    %c0_i32_0 = arith.constant 0 : i32
    %c0_i32_1 = arith.constant 0 : i32
    return %c0_i32, %c0_i32_0 : i32, i32
  }
  func.func @transform_3(%arg0: i32) -> (i32, i32) {
    %c0_i32 = arith.constant 0 : i32
    %c0_i32_0 = arith.constant 0 : i32
    %c0_i32_1 = arith.constant 0 : i32
    return %c0_i32, %c0_i32_0 : i32, i32
  }
  func.func @transform_4(%arg0: i32) -> (i32, i32) {
    %c0_i32 = arith.constant 0 : i32
    %c0_i32_0 = arith.constant 0 : i32
    %c0_i32_1 = arith.constant 0 : i32
    return %c0_i32, %c0_i32_0 : i32, i32
  }
  func.func @transform_5(%arg0: i32) -> (i32, i32) {
    %c0_i32 = arith.constant 0 : i32
    %c0_i32_0 = arith.constant 0 : i32
    return %arg0, %c0_i32 : i32, i32
  }
}

module attributes {stable_mosaic.version = 11 : i64} {
  func.func @kernel(%arg0: i32, %arg1: memref<64x32xf32, #tpu.memory_space<vmem>>, %arg2: memref<1x32xf32, #tpu.memory_space<vmem>>, %arg3: memref<1x32xf32, #tpu.memory_space<vmem>>, %arg4: memref<32x96xf32, #tpu.memory_space<vmem>>, %arg5: memref<1x96xf32, #tpu.memory_space<vmem>>, %arg6: memref<32x32xf32, #tpu.memory_space<vmem>>, %arg7: memref<1x32xf32, #tpu.memory_space<vmem>>, %arg8: memref<2x4x16x16xbf16, #tpu.memory_space<vmem>>, %arg9: memref<1x32xf32, #tpu.memory_space<vmem>>, %arg10: memref<1x32xf32, #tpu.memory_space<vmem>>, %arg11: memref<32x128xf32, #tpu.memory_space<vmem>>, %arg12: memref<1x128xf32, #tpu.memory_space<vmem>>, %arg13: memref<128x32xf32, #tpu.memory_space<vmem>>, %arg14: memref<1x32xf32, #tpu.memory_space<vmem>>, %arg15: memref<64x32xf32, #tpu.memory_space<vmem>>) attributes {dimension_semantics = [#tpu.dimension_semantics<parallel>], iteration_bounds = array<i64: 2>, scalar_prefetch = 0 : i64, scratch_operands = 0 : i64, tpu.core_type = #tpu.core_type<tc>, window_params = [{transform_indices = @transform_0, window_bounds = array<i64: 64, 32>}, {pipeline_mode = #tpu.pipeline_mode<synchronous>, transform_indices = @transform_1, window_bounds = array<i64: 1, 32>}, {pipeline_mode = #tpu.pipeline_mode<synchronous>, transform_indices = @transform_2, window_bounds = array<i64: 1, 32>}, {pipeline_mode = #tpu.pipeline_mode<synchronous>, transform_indices = @transform_3, window_bounds = array<i64: 32, 96>}, {pipeline_mode = #tpu.pipeline_mode<synchronous>, transform_indices = @transform_4, window_bounds = array<i64: 1, 96>}, {pipeline_mode = #tpu.pipeline_mode<synchronous>, transform_indices = @transform_5, window_bounds = array<i64: 32, 32>}, {pipeline_mode = #tpu.pipeline_mode<synchronous>, transform_indices = @transform_6, window_bounds = array<i64: 1, 32>}, {pipeline_mode = #tpu.pipeline_mode<synchronous>, transform_indices = @transform_7, window_bounds = array<i64: 2, 4, 16, 16>}, {pipeline_mode = #tpu.pipeline_mode<synchronous>, transform_indices = @transform_8, window_bounds = array<i64: 1, 32>}, {pipeline_mode = #tpu.pipeline_mode<synchronous>, transform_indices = @transform_9, window_bounds = array<i64: 1, 32>}, {pipeline_mode = #tpu.pipeline_mode<synchronous>, transform_indices = @transform_10, window_bounds = array<i64: 32, 128>}, {pipeline_mode = #tpu.pipeline_mode<synchronous>, transform_indices = @transform_11, window_bounds = array<i64: 1, 128>}, {pipeline_mode = #tpu.pipeline_mode<synchronous>, transform_indices = @transform_12, window_bounds = array<i64: 128, 32>}, {pipeline_mode = #tpu.pipeline_mode<synchronous>, transform_indices = @transform_13, window_bounds = array<i64: 1, 32>}, {transform_indices = @transform_14, window_bounds = array<i64: 64, 32>}]} {
    %c0 = arith.constant 0 : index
    %c0_0 = arith.constant 0 : index
    %0 = vector.load %arg1[%c0, %c0_0] : memref<64x32xf32, #tpu.memory_space<vmem>>, vector<64x32xf32>
    %c0_1 = arith.constant 0 : index
    %c0_2 = arith.constant 0 : index
    %1 = vector.load %arg2[%c0_1, %c0_2] : memref<1x32xf32, #tpu.memory_space<vmem>>, vector<1x32xf32>
    %c0_3 = arith.constant 0 : index
    %c0_4 = arith.constant 0 : index
    %2 = vector.load %arg3[%c0_3, %c0_4] : memref<1x32xf32, #tpu.memory_space<vmem>>, vector<1x32xf32>
    %cst = arith.constant dense<0.000000e+00> : vector<64xf32>
    %3 = vector.multi_reduction <add>, %0, %cst [1] : vector<64x32xf32> to vector<64xf32>
    %4 = vector.shape_cast %3 : vector<64xf32> to vector<64x1xf32>
    %cst_5 = arith.constant 3.200000e+01 : f32
    %5 = vector.broadcast %cst_5 : f32 to vector<64x1xf32>
    %6 = arith.divf %4, %5 : vector<64x1xf32>
    %7 = vector.broadcast %6 : vector<64x1xf32> to vector<64x32xf32>
    %8 = arith.subf %0, %7 : vector<64x32xf32>
    %9 = arith.mulf %8, %8 : vector<64x32xf32>
    %cst_6 = arith.constant dense<0.000000e+00> : vector<64xf32>
    %10 = vector.multi_reduction <add>, %9, %cst_6 [1] : vector<64x32xf32> to vector<64xf32>
    %11 = vector.shape_cast %10 : vector<64xf32> to vector<64x1xf32>
    %cst_7 = arith.constant 3.200000e+01 : f32
    %12 = vector.broadcast %cst_7 : f32 to vector<64x1xf32>
    %13 = arith.divf %11, %12 : vector<64x1xf32>
    %14 = vector.broadcast %6 : vector<64x1xf32> to vector<64x32xf32>
    %15 = arith.subf %0, %14 : vector<64x32xf32>
    %cst_8 = arith.constant 9.99999974E-6 : f32
    %16 = vector.broadcast %cst_8 : f32 to vector<64x1xf32>
    %17 = arith.addf %13, %16 : vector<64x1xf32>
    %18 = math.rsqrt %17 : vector<64x1xf32>
    %19 = vector.broadcast %18 : vector<64x1xf32> to vector<64x32xf32>
    %20 = arith.mulf %15, %19 : vector<64x32xf32>
    %21 = vector.broadcast %1 : vector<1x32xf32> to vector<64x32xf32>
    %22 = arith.mulf %20, %21 : vector<64x32xf32>
    %23 = vector.broadcast %2 : vector<1x32xf32> to vector<64x32xf32>
    %24 = arith.addf %22, %23 : vector<64x32xf32>
    %25 = arith.truncf %24 : vector<64x32xf32> to vector<64x32xbf16>
    %c0_9 = arith.constant 0 : index
    %c0_10 = arith.constant 0 : index
    %26 = vector.load %arg4[%c0_9, %c0_10] : memref<32x96xf32, #tpu.memory_space<vmem>>, vector<32x96xf32>
    %27 = arith.truncf %26 : vector<32x96xf32> to vector<32x96xbf16>
    %cst_11 = arith.constant dense<0.000000e+00> : vector<64x96xf32>
    %28 = tpu.matmul %25, %27, %cst_11 {dimension_numbers = #tpu.dot_dimension_numbers<[1], [0], [0], [1], [0, 0, 1, 1], [], []>} : vector<64x32xbf16>, vector<32x96xbf16>, vector<64x96xf32> -> vector<64x96xf32>
    %c0_12 = arith.constant 0 : index
    %c0_13 = arith.constant 0 : index
    %29 = vector.load %arg5[%c0_12, %c0_13] : memref<1x96xf32, #tpu.memory_space<vmem>>, vector<1x96xf32>
    %30 = vector.broadcast %29 : vector<1x96xf32> to vector<64x96xf32>
    %31 = arith.addf %28, %30 : vector<64x96xf32>
    %32 = vector.shape_cast %31 : vector<64x96xf32> to vector<4x16x96xf32>
    %33 = vector.extract_strided_slice %32 {offsets = [0, 0, 0], sizes = [4, 16, 16], strides = [1, 1, 1]} : vector<4x16x96xf32> to vector<4x16x16xf32>
    %34 = vector.extract_strided_slice %32 {offsets = [0, 0, 16], sizes = [4, 16, 16], strides = [1, 1, 1]} : vector<4x16x96xf32> to vector<4x16x16xf32>
    %35 = tpu.concatenate %33, %34 in 0 : vector<4x16x16xf32>, vector<4x16x16xf32> -> vector<8x16x16xf32>
    %cst_14 = arith.constant 2.500000e-01 : f32
    %36 = vector.broadcast %cst_14 : f32 to vector<8x16x16xf32>
    %37 = arith.mulf %35, %36 : vector<8x16x16xf32>
    %38 = vector.extract_strided_slice %32 {offsets = [0, 0, 32], sizes = [4, 16, 16], strides = [1, 1, 1]} : vector<4x16x96xf32> to vector<4x16x16xf32>
    %39 = vector.extract_strided_slice %32 {offsets = [0, 0, 48], sizes = [4, 16, 16], strides = [1, 1, 1]} : vector<4x16x96xf32> to vector<4x16x16xf32>
    %40 = tpu.concatenate %38, %39 in 0 : vector<4x16x16xf32>, vector<4x16x16xf32> -> vector<8x16x16xf32>
    %41 = vector.extract_strided_slice %32 {offsets = [0, 0, 64], sizes = [4, 16, 16], strides = [1, 1, 1]} : vector<4x16x96xf32> to vector<4x16x16xf32>
    %42 = vector.extract_strided_slice %32 {offsets = [0, 0, 80], sizes = [4, 16, 16], strides = [1, 1, 1]} : vector<4x16x96xf32> to vector<4x16x16xf32>
    %43 = tpu.concatenate %41, %42 in 0 : vector<4x16x16xf32>, vector<4x16x16xf32> -> vector<8x16x16xf32>
    %44 = arith.truncf %37 : vector<8x16x16xf32> to vector<8x16x16xbf16>
    %45 = arith.truncf %40 : vector<8x16x16xf32> to vector<8x16x16xbf16>
    "tpu.trace_start"() <{level = 10 : i32, message = "bqd,bkd->bqk"}> : () -> ()
    %cst_15 = arith.constant dense<0.000000e+00> : vector<8x16x16xf32>
    %46 = tpu.matmul %44, %45, %cst_15 {dimension_numbers = #tpu.dot_dimension_numbers<[2], [2], [1], [1], [0, 0, 0, 1, 1, 1], [0], [0]>} : vector<8x16x16xbf16>, vector<8x16x16xbf16>, vector<8x16x16xf32> -> vector<8x16x16xf32>
    "tpu.trace_stop"() : () -> ()
    %c0_16 = arith.constant 0 : index
    %c0_17 = arith.constant 0 : index
    %c0_18 = arith.constant 0 : index
    %c0_19 = arith.constant 0 : index
    %47 = vector.load %arg8[%c0_16, %c0_17, %c0_18, %c0_19] : memref<2x4x16x16xbf16, #tpu.memory_space<vmem>>, vector<2x4x16x16xbf16>
    %48 = arith.extf %47 : vector<2x4x16x16xbf16> to vector<2x4x16x16xf32>
    %49 = vector.shape_cast %48 : vector<2x4x16x16xf32> to vector<8x16x16xf32>
    %50 = arith.addf %46, %49 : vector<8x16x16xf32>
    %cst_20 = arith.constant dense<0xFF800000> : vector<8x16xf32>
    %51 = vector.multi_reduction <maximumf>, %50, %cst_20 [2] : vector<8x16x16xf32> to vector<8x16xf32>
    %52 = vector.shape_cast %51 : vector<8x16xf32> to vector<8x16x1xf32>
    %53 = vector.broadcast %52 : vector<8x16x1xf32> to vector<8x16x16xf32>
    %54 = arith.subf %50, %53 : vector<8x16x16xf32>
    %55 = math.exp %54 : vector<8x16x16xf32>
    %cst_21 = arith.constant dense<0.000000e+00> : vector<8x16xf32>
    %56 = vector.multi_reduction <add>, %55, %cst_21 [2] : vector<8x16x16xf32> to vector<8x16xf32>
    %57 = vector.shape_cast %56 : vector<8x16xf32> to vector<8x16x1xf32>
    %58 = arith.truncf %55 : vector<8x16x16xf32> to vector<8x16x16xbf16>
    %59 = arith.truncf %43 : vector<8x16x16xf32> to vector<8x16x16xbf16>
    "tpu.trace_start"() <{level = 10 : i32, message = "bqk,bkd->bqd"}> : () -> ()
    %cst_22 = arith.constant dense<0.000000e+00> : vector<8x16x16xf32>
    %60 = tpu.matmul %58, %59, %cst_22 {dimension_numbers = #tpu.dot_dimension_numbers<[2], [1], [1], [2], [0, 0, 0, 1, 1, 2], [0], [0]>} : vector<8x16x16xbf16>, vector<8x16x16xbf16>, vector<8x16x16xf32> -> vector<8x16x16xf32>
    "tpu.trace_stop"() : () -> ()
    %61 = tpu.reciprocal %57 {approx = true} : vector<8x16x1xf32> -> vector<8x16x1xf32>
    %62 = vector.broadcast %61 : vector<8x16x1xf32> to vector<8x16x16xf32>
    %63 = arith.mulf %60, %62 : vector<8x16x16xf32>
    %64 = vector.extract_strided_slice %63 {offsets = [0, 0, 0], sizes = [4, 16, 16], strides = [1, 1, 1]} : vector<8x16x16xf32> to vector<4x16x16xf32>
    %65 = vector.extract_strided_slice %63 {offsets = [4, 0, 0], sizes = [4, 16, 16], strides = [1, 1, 1]} : vector<8x16x16xf32> to vector<4x16x16xf32>
    %66 = tpu.concatenate %64, %65 in 2 : vector<4x16x16xf32>, vector<4x16x16xf32> -> vector<4x16x32xf32>
    %67 = vector.shape_cast %66 : vector<4x16x32xf32> to vector<64x32xf32>
    %68 = arith.truncf %67 : vector<64x32xf32> to vector<64x32xbf16>
    %c0_23 = arith.constant 0 : index
    %c0_24 = arith.constant 0 : index
    %69 = vector.load %arg6[%c0_23, %c0_24] : memref<32x32xf32, #tpu.memory_space<vmem>>, vector<32x32xf32>
    %70 = arith.truncf %69 : vector<32x32xf32> to vector<32x32xbf16>
    %cst_25 = arith.constant dense<0.000000e+00> : vector<64x32xf32>
    %71 = tpu.matmul %68, %70, %cst_25 {dimension_numbers = #tpu.dot_dimension_numbers<[1], [0], [0], [1], [0, 0, 1, 1], [], []>} : vector<64x32xbf16>, vector<32x32xbf16>, vector<64x32xf32> -> vector<64x32xf32>
    %c0_26 = arith.constant 0 : index
    %c0_27 = arith.constant 0 : index
    %72 = vector.load %arg7[%c0_26, %c0_27] : memref<1x32xf32, #tpu.memory_space<vmem>>, vector<1x32xf32>
    %73 = vector.broadcast %72 : vector<1x32xf32> to vector<64x32xf32>
    %74 = arith.addf %71, %73 : vector<64x32xf32>
    %75 = arith.addf %0, %74 : vector<64x32xf32>
    %c0_28 = arith.constant 0 : index
    %c0_29 = arith.constant 0 : index
    %76 = vector.load %arg9[%c0_28, %c0_29] : memref<1x32xf32, #tpu.memory_space<vmem>>, vector<1x32xf32>
    %c0_30 = arith.constant 0 : index
    %c0_31 = arith.constant 0 : index
    %77 = vector.load %arg10[%c0_30, %c0_31] : memref<1x32xf32, #tpu.memory_space<vmem>>, vector<1x32xf32>
    %cst_32 = arith.constant dense<0.000000e+00> : vector<64xf32>
    %78 = vector.multi_reduction <add>, %75, %cst_32 [1] : vector<64x32xf32> to vector<64xf32>
    %79 = vector.shape_cast %78 : vector<64xf32> to vector<64x1xf32>
    %cst_33 = arith.constant 3.200000e+01 : f32
    %80 = vector.broadcast %cst_33 : f32 to vector<64x1xf32>
    %81 = arith.divf %79, %80 : vector<64x1xf32>
    %82 = vector.broadcast %81 : vector<64x1xf32> to vector<64x32xf32>
    %83 = arith.subf %75, %82 : vector<64x32xf32>
    %84 = arith.mulf %83, %83 : vector<64x32xf32>
    %cst_34 = arith.constant dense<0.000000e+00> : vector<64xf32>
    %85 = vector.multi_reduction <add>, %84, %cst_34 [1] : vector<64x32xf32> to vector<64xf32>
    %86 = vector.shape_cast %85 : vector<64xf32> to vector<64x1xf32>
    %cst_35 = arith.constant 3.200000e+01 : f32
    %87 = vector.broadcast %cst_35 : f32 to vector<64x1xf32>
    %88 = arith.divf %86, %87 : vector<64x1xf32>
    %89 = vector.broadcast %81 : vector<64x1xf32> to vector<64x32xf32>
    %90 = arith.subf %75, %89 : vector<64x32xf32>
    %cst_36 = arith.constant 9.99999974E-6 : f32
    %91 = vector.broadcast %cst_36 : f32 to vector<64x1xf32>
    %92 = arith.addf %88, %91 : vector<64x1xf32>
    %93 = math.rsqrt %92 : vector<64x1xf32>
    %94 = vector.broadcast %93 : vector<64x1xf32> to vector<64x32xf32>
    %95 = arith.mulf %90, %94 : vector<64x32xf32>
    %96 = vector.broadcast %76 : vector<1x32xf32> to vector<64x32xf32>
    %97 = arith.mulf %95, %96 : vector<64x32xf32>
    %98 = vector.broadcast %77 : vector<1x32xf32> to vector<64x32xf32>
    %99 = arith.addf %97, %98 : vector<64x32xf32>
    %100 = arith.truncf %99 : vector<64x32xf32> to vector<64x32xbf16>
    %c0_37 = arith.constant 0 : index
    %c0_38 = arith.constant 0 : index
    %101 = vector.load %arg11[%c0_37, %c0_38] : memref<32x128xf32, #tpu.memory_space<vmem>>, vector<32x128xf32>
    %102 = arith.truncf %101 : vector<32x128xf32> to vector<32x128xbf16>
    %cst_39 = arith.constant dense<0.000000e+00> : vector<64x128xf32>
    %103 = tpu.matmul %100, %102, %cst_39 {dimension_numbers = #tpu.dot_dimension_numbers<[1], [0], [0], [1], [0, 0, 1, 1], [], []>} : vector<64x32xbf16>, vector<32x128xbf16>, vector<64x128xf32> -> vector<64x128xf32>
    %c0_40 = arith.constant 0 : index
    %c0_41 = arith.constant 0 : index
    %104 = vector.load %arg12[%c0_40, %c0_41] : memref<1x128xf32, #tpu.memory_space<vmem>>, vector<1x128xf32>
    %105 = vector.broadcast %104 : vector<1x128xf32> to vector<64x128xf32>
    %106 = arith.addf %103, %105 : vector<64x128xf32>
    %cst_42 = arith.constant 0.707106769 : f32
    %107 = vector.broadcast %cst_42 : f32 to vector<64x128xf32>
    %108 = arith.mulf %106, %107 : vector<64x128xf32>
    %109 = math.absf %108 : vector<64x128xf32>
    %cst_43 = arith.constant 0.327591091 : f32
    %110 = vector.broadcast %cst_43 : f32 to vector<64x128xf32>
    %111 = arith.mulf %110, %109 : vector<64x128xf32>
    %cst_44 = arith.constant 1.000000e+00 : f32
    %112 = vector.broadcast %cst_44 : f32 to vector<64x128xf32>
    %113 = arith.addf %112, %111 : vector<64x128xf32>
    %cst_45 = arith.constant 1.000000e+00 : f32
    %114 = vector.broadcast %cst_45 : f32 to vector<64x128xf32>
    %115 = arith.divf %114, %113 : vector<64x128xf32>
    %cst_46 = arith.constant 1.06140542 : f32
    %116 = vector.broadcast %cst_46 : f32 to vector<64x128xf32>
    %117 = arith.mulf %116, %115 : vector<64x128xf32>
    %cst_47 = arith.constant 1.45315206 : f32
    %118 = vector.broadcast %cst_47 : f32 to vector<64x128xf32>
    %119 = arith.subf %117, %118 : vector<64x128xf32>
    %120 = arith.mulf %119, %115 : vector<64x128xf32>
    %cst_48 = arith.constant 1.42141378 : f32
    %121 = vector.broadcast %cst_48 : f32 to vector<64x128xf32>
    %122 = arith.addf %120, %121 : vector<64x128xf32>
    %123 = arith.mulf %122, %115 : vector<64x128xf32>
    %cst_49 = arith.constant 0.284496725 : f32
    %124 = vector.broadcast %cst_49 : f32 to vector<64x128xf32>
    %125 = arith.subf %123, %124 : vector<64x128xf32>
    %126 = arith.mulf %125, %115 : vector<64x128xf32>
    %cst_50 = arith.constant 0.254829586 : f32
    %127 = vector.broadcast %cst_50 : f32 to vector<64x128xf32>
    %128 = arith.addf %126, %127 : vector<64x128xf32>
    %129 = arith.mulf %128, %115 : vector<64x128xf32>
    %cst_51 = arith.constant 0.000000e+00 : f32
    %130 = vector.broadcast %cst_51 : f32 to vector<64x128xf32>
    %131 = arith.subf %130, %109 : vector<64x128xf32>
    %132 = arith.mulf %131, %109 : vector<64x128xf32>
    %133 = math.exp %132 : vector<64x128xf32>
    %134 = arith.mulf %129, %133 : vector<64x128xf32>
    %cst_52 = arith.constant 1.000000e+00 : f32
    %135 = vector.broadcast %cst_52 : f32 to vector<64x128xf32>
    %136 = arith.subf %135, %134 : vector<64x128xf32>
    %cst_53 = arith.constant 0.000000e+00 : f32
    %137 = vector.broadcast %cst_53 : f32 to vector<64x128xf32>
    %138 = arith.cmpf oge, %108, %137 : vector<64x128xf32>
    %cst_54 = arith.constant 0.000000e+00 : f32
    %139 = vector.broadcast %cst_54 : f32 to vector<64x128xf32>
    %140 = arith.subf %139, %136 : vector<64x128xf32>
    %141 = arith.select %138, %136, %140 : vector<64x128xi1>, vector<64x128xf32>
    %cst_55 = arith.constant 5.000000e-01 : f32
    %142 = vector.broadcast %cst_55 : f32 to vector<64x128xf32>
    %143 = arith.mulf %142, %106 : vector<64x128xf32>
    %cst_56 = arith.constant 1.000000e+00 : f32
    %144 = vector.broadcast %cst_56 : f32 to vector<64x128xf32>
    %145 = arith.addf %144, %141 : vector<64x128xf32>
    %146 = arith.mulf %143, %145 : vector<64x128xf32>
    %147 = arith.truncf %146 : vector<64x128xf32> to vector<64x128xbf16>
    %c0_57 = arith.constant 0 : index
    %c0_58 = arith.constant 0 : index
    %148 = vector.load %arg13[%c0_57, %c0_58] : memref<128x32xf32, #tpu.memory_space<vmem>>, vector<128x32xf32>
    %149 = arith.truncf %148 : vector<128x32xf32> to vector<128x32xbf16>
    %cst_59 = arith.constant dense<0.000000e+00> : vector<64x32xf32>
    %150 = tpu.matmul %147, %149, %cst_59 {dimension_numbers = #tpu.dot_dimension_numbers<[1], [0], [0], [1], [0, 0, 1, 1], [], []>} : vector<64x128xbf16>, vector<128x32xbf16>, vector<64x32xf32> -> vector<64x32xf32>
    %c0_60 = arith.constant 0 : index
    %c0_61 = arith.constant 0 : index
    %151 = vector.load %arg14[%c0_60, %c0_61] : memref<1x32xf32, #tpu.memory_space<vmem>>, vector<1x32xf32>
    %152 = vector.broadcast %151 : vector<1x32xf32> to vector<64x32xf32>
    %153 = arith.addf %150, %152 : vector<64x32xf32>
    %154 = arith.addf %75, %153 : vector<64x32xf32>
    %c0_62 = arith.constant 0 : index
    %c0_63 = arith.constant 0 : index
    %155 = vector.load %arg15[%c0_62, %c0_63] : memref<64x32xf32, #tpu.memory_space<vmem>>, vector<64x32xf32>
    tpu.vector_store %arg15[%c0_62, %c0_63], %154 {strides = array<i32>} : memref<64x32xf32, #tpu.memory_space<vmem>>, vector<64x32xf32>,
    return
  }
  func.func @transform_0(%arg0: i32) -> (i32, i32) {
    %c0_i32 = arith.constant 0 : i32
    %c0_i32_0 = arith.constant 0 : i32
    return %arg0, %c0_i32 : i32, i32
  }
  func.func @transform_1(%arg0: i32) -> (i32, i32) {
    %c0_i32 = arith.constant 0 : i32
    %c0_i32_0 = arith.constant 0 : i32
    %c0_i32_1 = arith.constant 0 : i32
    return %c0_i32, %c0_i32_0 : i32, i32
  }
  func.func @transform_2(%arg0: i32) -> (i32, i32) {
    %c0_i32 = arith.constant 0 : i32
    %c0_i32_0 = arith.constant 0 : i32
    %c0_i32_1 = arith.constant 0 : i32
    return %c0_i32, %c0_i32_0 : i32, i32
  }
  func.func @transform_3(%arg0: i32) -> (i32, i32) {
    %c0_i32 = arith.constant 0 : i32
    %c0_i32_0 = arith.constant 0 : i32
    %c0_i32_1 = arith.constant 0 : i32
    return %c0_i32, %c0_i32_0 : i32, i32
  }
  func.func @transform_4(%arg0: i32) -> (i32, i32) {
    %c0_i32 = arith.constant 0 : i32
    %c0_i32_0 = arith.constant 0 : i32
    %c0_i32_1 = arith.constant 0 : i32
    return %c0_i32, %c0_i32_0 : i32, i32
  }
  func.func @transform_5(%arg0: i32) -> (i32, i32) {
    %c0_i32 = arith.constant 0 : i32
    %c0_i32_0 = arith.constant 0 : i32
    %c0_i32_1 = arith.constant 0 : i32
    return %c0_i32, %c0_i32_0 : i32, i32
  }
  func.func @transform_6(%arg0: i32) -> (i32, i32) {
    %c0_i32 = arith.constant 0 : i32
    %c0_i32_0 = arith.constant 0 : i32
    %c0_i32_1 = arith.constant 0 : i32
    return %c0_i32, %c0_i32_0 : i32, i32
  }
  func.func @transform_7(%arg0: i32) -> (i32, i32, i32, i32) {
    %c0_i32 = arith.constant 0 : i32
    %c0_i32_0 = arith.constant 0 : i32
    %c0_i32_1 = arith.constant 0 : i32
    %c0_i32_2 = arith.constant 0 : i32
    %c0_i32_3 = arith.constant 0 : i32
    return %c0_i32, %c0_i32_0, %c0_i32_1, %c0_i32_2 : i32, i32, i32, i32
  }
  func.func @transform_8(%arg0: i32) -> (i32, i32) {
    %c0_i32 = arith.constant 0 : i32
    %c0_i32_0 = arith.constant 0 : i32
    %c0_i32_1 = arith.constant 0 : i32
    return %c0_i32, %c0_i32_0 : i32, i32
  }
  func.func @transform_9(%arg0: i32) -> (i32, i32) {
    %c0_i32 = arith.constant 0 : i32
    %c0_i32_0 = arith.constant 0 : i32
    %c0_i32_1 = arith.constant 0 : i32
    return %c0_i32, %c0_i32_0 : i32, i32
  }
  func.func @transform_10(%arg0: i32) -> (i32, i32) {
    %c0_i32 = arith.constant 0 : i32
    %c0_i32_0 = arith.constant 0 : i32
    %c0_i32_1 = arith.constant 0 : i32
    return %c0_i32, %c0_i32_0 : i32, i32
  }
  func.func @transform_11(%arg0: i32) -> (i32, i32) {
    %c0_i32 = arith.constant 0 : i32
    %c0_i32_0 = arith.constant 0 : i32
    %c0_i32_1 = arith.constant 0 : i32
    return %c0_i32, %c0_i32_0 : i32, i32
  }
  func.func @transform_12(%arg0: i32) -> (i32, i32) {
    %c0_i32 = arith.constant 0 : i32
    %c0_i32_0 = arith.constant 0 : i32
    %c0_i32_1 = arith.constant 0 : i32
    return %c0_i32, %c0_i32_0 : i32, i32
  }
  func.func @transform_13(%arg0: i32) -> (i32, i32) {
    %c0_i32 = arith.constant 0 : i32
    %c0_i32_0 = arith.constant 0 : i32
    %c0_i32_1 = arith.constant 0 : i32
    return %c0_i32, %c0_i32_0 : i32, i32
  }
  func.func @transform_14(%arg0: i32) -> (i32, i32) {
    %c0_i32 = arith.constant 0 : i32
    %c0_i32_0 = arith.constant 0 : i32
    return %arg0, %c0_i32 : i32, i32
  }
}

module attributes {stable_mosaic.version = 11 : i64} {
  func.func @kernel(%arg0: i32, %arg1: memref<32x128xf32, #tpu.memory_space<vmem>>, %arg2: memref<1x128xf32, #tpu.memory_space<vmem>>, %arg3: memref<1x128xf32, #tpu.memory_space<vmem>>, %arg4: memref<128x64xf32, #tpu.memory_space<vmem>>, %arg5: memref<32x64xf32, #tpu.memory_space<vmem>>) attributes {dimension_semantics = [#tpu.dimension_semantics<parallel>], iteration_bounds = array<i64: 1>, scalar_prefetch = 0 : i64, scratch_operands = 0 : i64, tpu.core_type = #tpu.core_type<tc>, window_params = [{transform_indices = @transform_0, window_bounds = array<i64: 32, 128>}, {pipeline_mode = #tpu.pipeline_mode<synchronous>, transform_indices = @transform_1, window_bounds = array<i64: 1, 128>}, {pipeline_mode = #tpu.pipeline_mode<synchronous>, transform_indices = @transform_2, window_bounds = array<i64: 1, 128>}, {pipeline_mode = #tpu.pipeline_mode<synchronous>, transform_indices = @transform_3, window_bounds = array<i64: 128, 64>}, {transform_indices = @transform_4, window_bounds = array<i64: 32, 64>}]} {
    %c0 = arith.constant 0 : index
    %c0_0 = arith.constant 0 : index
    %0 = vector.load %arg1[%c0, %c0_0] : memref<32x128xf32, #tpu.memory_space<vmem>>, vector<32x128xf32>
    %c0_1 = arith.constant 0 : index
    %c0_2 = arith.constant 0 : index
    %1 = vector.load %arg2[%c0_1, %c0_2] : memref<1x128xf32, #tpu.memory_space<vmem>>, vector<1x128xf32>
    %c0_3 = arith.constant 0 : index
    %c0_4 = arith.constant 0 : index
    %2 = vector.load %arg3[%c0_3, %c0_4] : memref<1x128xf32, #tpu.memory_space<vmem>>, vector<1x128xf32>
    %cst = arith.constant dense<0.000000e+00> : vector<32xf32>
    %3 = vector.multi_reduction <add>, %0, %cst [1] : vector<32x128xf32> to vector<32xf32>
    %4 = vector.shape_cast %3 : vector<32xf32> to vector<32x1xf32>
    %cst_5 = arith.constant 1.280000e+02 : f32
    %5 = vector.broadcast %cst_5 : f32 to vector<32x1xf32>
    %6 = arith.divf %4, %5 : vector<32x1xf32>
    %7 = vector.broadcast %6 : vector<32x1xf32> to vector<32x128xf32>
    %8 = arith.subf %0, %7 : vector<32x128xf32>
    %9 = arith.mulf %8, %8 : vector<32x128xf32>
    %cst_6 = arith.constant dense<0.000000e+00> : vector<32xf32>
    %10 = vector.multi_reduction <add>, %9, %cst_6 [1] : vector<32x128xf32> to vector<32xf32>
    %11 = vector.shape_cast %10 : vector<32xf32> to vector<32x1xf32>
    %cst_7 = arith.constant 1.280000e+02 : f32
    %12 = vector.broadcast %cst_7 : f32 to vector<32x1xf32>
    %13 = arith.divf %11, %12 : vector<32x1xf32>
    %14 = vector.broadcast %6 : vector<32x1xf32> to vector<32x128xf32>
    %15 = arith.subf %0, %14 : vector<32x128xf32>
    %cst_8 = arith.constant 9.99999974E-6 : f32
    %16 = vector.broadcast %cst_8 : f32 to vector<32x1xf32>
    %17 = arith.addf %13, %16 : vector<32x1xf32>
    %18 = math.rsqrt %17 : vector<32x1xf32>
    %19 = vector.broadcast %18 : vector<32x1xf32> to vector<32x128xf32>
    %20 = arith.mulf %15, %19 : vector<32x128xf32>
    %21 = vector.broadcast %1 : vector<1x128xf32> to vector<32x128xf32>
    %22 = arith.mulf %20, %21 : vector<32x128xf32>
    %23 = vector.broadcast %2 : vector<1x128xf32> to vector<32x128xf32>
    %24 = arith.addf %22, %23 : vector<32x128xf32>
    %25 = arith.truncf %24 : vector<32x128xf32> to vector<32x128xbf16>
    %c0_9 = arith.constant 0 : index
    %c0_10 = arith.constant 0 : index
    %26 = vector.load %arg4[%c0_9, %c0_10] : memref<128x64xf32, #tpu.memory_space<vmem>>, vector<128x64xf32>
    %27 = arith.truncf %26 : vector<128x64xf32> to vector<128x64xbf16>
    %cst_11 = arith.constant dense<0.000000e+00> : vector<32x64xf32>
    %28 = tpu.matmul %25, %27, %cst_11 {dimension_numbers = #tpu.dot_dimension_numbers<[1], [0], [0], [1], [0, 0, 1, 1], [], []>} : vector<32x128xbf16>, vector<128x64xbf16>, vector<32x64xf32> -> vector<32x64xf32>
    %c0_12 = arith.constant 0 : index
    %c0_13 = arith.constant 0 : index
    %29 = vector.load %arg5[%c0_12, %c0_13] : memref<32x64xf32, #tpu.memory_space<vmem>>, vector<32x64xf32>
    tpu.vector_store %arg5[%c0_12, %c0_13], %28 {strides = array<i32>} : memref<32x64xf32, #tpu.memory_space<vmem>>, vector<32x64xf32>,
    return
  }
  func.func @transform_0(%arg0: i32) -> (i32, i32) {
    %c0_i32 = arith.constant 0 : i32
    %c0_i32_0 = arith.constant 0 : i32
    return %arg0, %c0_i32 : i32, i32
  }
  func.func @transform_1(%arg0: i32) -> (i32, i32) {
    %c0_i32 = arith.constant 0 : i32
    %c0_i32_0 = arith.constant 0 : i32
    %c0_i32_1 = arith.constant 0 : i32
    return %c0_i32, %c0_i32_0 : i32, i32
  }
  func.func @transform_2(%arg0: i32) -> (i32, i32) {
    %c0_i32 = arith.constant 0 : i32
    %c0_i32_0 = arith.constant 0 : i32
    %c0_i32_1 = arith.constant 0 : i32
    return %c0_i32, %c0_i32_0 : i32, i32
  }
  func.func @transform_3(%arg0: i32) -> (i32, i32) {
    %c0_i32 = arith.constant 0 : i32
    %c0_i32_0 = arith.constant 0 : i32
    %c0_i32_1 = arith.constant 0 : i32
    return %c0_i32, %c0_i32_0 : i32, i32
  }
  func.func @transform_4(%arg0: i32) -> (i32, i32) {
    %c0_i32 = arith.constant 0 : i32
    %c0_i32_0 = arith.constant 0 : i32
    return %arg0, %c0_i32 : i32, i32
  }
}

module attributes {stable_mosaic.version = 11 : i64} {
  func.func @kernel(%arg0: i32, %arg1: memref<16x64xf32, #tpu.memory_space<vmem>>, %arg2: memref<1x64xf32, #tpu.memory_space<vmem>>, %arg3: memref<1x64xf32, #tpu.memory_space<vmem>>, %arg4: memref<64x192xf32, #tpu.memory_space<vmem>>, %arg5: memref<1x192xf32, #tpu.memory_space<vmem>>, %arg6: memref<64x64xf32, #tpu.memory_space<vmem>>, %arg7: memref<1x64xf32, #tpu.memory_space<vmem>>, %arg8: memref<4x1x16x16xbf16, #tpu.memory_space<vmem>>, %arg9: memref<1x64xf32, #tpu.memory_space<vmem>>, %arg10: memref<1x64xf32, #tpu.memory_space<vmem>>, %arg11: memref<64x256xf32, #tpu.memory_space<vmem>>, %arg12: memref<1x256xf32, #tpu.memory_space<vmem>>, %arg13: memref<256x64xf32, #tpu.memory_space<vmem>>, %arg14: memref<1x64xf32, #tpu.memory_space<vmem>>, %arg15: memref<16x64xf32, #tpu.memory_space<vmem>>) attributes {dimension_semantics = [#tpu.dimension_semantics<parallel>], iteration_bounds = array<i64: 2>, scalar_prefetch = 0 : i64, scratch_operands = 0 : i64, tpu.core_type = #tpu.core_type<tc>, window_params = [{transform_indices = @transform_0, window_bounds = array<i64: 16, 64>}, {pipeline_mode = #tpu.pipeline_mode<synchronous>, transform_indices = @transform_1, window_bounds = array<i64: 1, 64>}, {pipeline_mode = #tpu.pipeline_mode<synchronous>, transform_indices = @transform_2, window_bounds = array<i64: 1, 64>}, {pipeline_mode = #tpu.pipeline_mode<synchronous>, transform_indices = @transform_3, window_bounds = array<i64: 64, 192>}, {pipeline_mode = #tpu.pipeline_mode<synchronous>, transform_indices = @transform_4, window_bounds = array<i64: 1, 192>}, {pipeline_mode = #tpu.pipeline_mode<synchronous>, transform_indices = @transform_5, window_bounds = array<i64: 64, 64>}, {pipeline_mode = #tpu.pipeline_mode<synchronous>, transform_indices = @transform_6, window_bounds = array<i64: 1, 64>}, {pipeline_mode = #tpu.pipeline_mode<synchronous>, transform_indices = @transform_7, window_bounds = array<i64: 4, 1, 16, 16>}, {pipeline_mode = #tpu.pipeline_mode<synchronous>, transform_indices = @transform_8, window_bounds = array<i64: 1, 64>}, {pipeline_mode = #tpu.pipeline_mode<synchronous>, transform_indices = @transform_9, window_bounds = array<i64: 1, 64>}, {pipeline_mode = #tpu.pipeline_mode<synchronous>, transform_indices = @transform_10, window_bounds = array<i64: 64, 256>}, {pipeline_mode = #tpu.pipeline_mode<synchronous>, transform_indices = @transform_11, window_bounds = array<i64: 1, 256>}, {pipeline_mode = #tpu.pipeline_mode<synchronous>, transform_indices = @transform_12, window_bounds = array<i64: 256, 64>}, {pipeline_mode = #tpu.pipeline_mode<synchronous>, transform_indices = @transform_13, window_bounds = array<i64: 1, 64>}, {transform_indices = @transform_14, window_bounds = array<i64: 16, 64>}]} {
    %c0 = arith.constant 0 : index
    %c0_0 = arith.constant 0 : index
    %0 = vector.load %arg1[%c0, %c0_0] : memref<16x64xf32, #tpu.memory_space<vmem>>, vector<16x64xf32>
    %c0_1 = arith.constant 0 : index
    %c0_2 = arith.constant 0 : index
    %1 = vector.load %arg2[%c0_1, %c0_2] : memref<1x64xf32, #tpu.memory_space<vmem>>, vector<1x64xf32>
    %c0_3 = arith.constant 0 : index
    %c0_4 = arith.constant 0 : index
    %2 = vector.load %arg3[%c0_3, %c0_4] : memref<1x64xf32, #tpu.memory_space<vmem>>, vector<1x64xf32>
    %cst = arith.constant dense<0.000000e+00> : vector<16xf32>
    %3 = vector.multi_reduction <add>, %0, %cst [1] : vector<16x64xf32> to vector<16xf32>
    %4 = vector.shape_cast %3 : vector<16xf32> to vector<16x1xf32>
    %cst_5 = arith.constant 6.400000e+01 : f32
    %5 = vector.broadcast %cst_5 : f32 to vector<16x1xf32>
    %6 = arith.divf %4, %5 : vector<16x1xf32>
    %7 = vector.broadcast %6 : vector<16x1xf32> to vector<16x64xf32>
    %8 = arith.subf %0, %7 : vector<16x64xf32>
    %9 = arith.mulf %8, %8 : vector<16x64xf32>
    %cst_6 = arith.constant dense<0.000000e+00> : vector<16xf32>
    %10 = vector.multi_reduction <add>, %9, %cst_6 [1] : vector<16x64xf32> to vector<16xf32>
    %11 = vector.shape_cast %10 : vector<16xf32> to vector<16x1xf32>
    %cst_7 = arith.constant 6.400000e+01 : f32
    %12 = vector.broadcast %cst_7 : f32 to vector<16x1xf32>
    %13 = arith.divf %11, %12 : vector<16x1xf32>
    %14 = vector.broadcast %6 : vector<16x1xf32> to vector<16x64xf32>
    %15 = arith.subf %0, %14 : vector<16x64xf32>
    %cst_8 = arith.constant 9.99999974E-6 : f32
    %16 = vector.broadcast %cst_8 : f32 to vector<16x1xf32>
    %17 = arith.addf %13, %16 : vector<16x1xf32>
    %18 = math.rsqrt %17 : vector<16x1xf32>
    %19 = vector.broadcast %18 : vector<16x1xf32> to vector<16x64xf32>
    %20 = arith.mulf %15, %19 : vector<16x64xf32>
    %21 = vector.broadcast %1 : vector<1x64xf32> to vector<16x64xf32>
    %22 = arith.mulf %20, %21 : vector<16x64xf32>
    %23 = vector.broadcast %2 : vector<1x64xf32> to vector<16x64xf32>
    %24 = arith.addf %22, %23 : vector<16x64xf32>
    %25 = arith.truncf %24 : vector<16x64xf32> to vector<16x64xbf16>
    %c0_9 = arith.constant 0 : index
    %c0_10 = arith.constant 0 : index
    %26 = vector.load %arg4[%c0_9, %c0_10] : memref<64x192xf32, #tpu.memory_space<vmem>>, vector<64x192xf32>
    %27 = arith.truncf %26 : vector<64x192xf32> to vector<64x192xbf16>
    %cst_11 = arith.constant dense<0.000000e+00> : vector<16x192xf32>
    %28 = tpu.matmul %25, %27, %cst_11 {dimension_numbers = #tpu.dot_dimension_numbers<[1], [0], [0], [1], [0, 0, 1, 1], [], []>} : vector<16x64xbf16>, vector<64x192xbf16>, vector<16x192xf32> -> vector<16x192xf32>
    %c0_12 = arith.constant 0 : index
    %c0_13 = arith.constant 0 : index
    %29 = vector.load %arg5[%c0_12, %c0_13] : memref<1x192xf32, #tpu.memory_space<vmem>>, vector<1x192xf32>
    %30 = vector.broadcast %29 : vector<1x192xf32> to vector<16x192xf32>
    %31 = arith.addf %28, %30 : vector<16x192xf32>
    %32 = vector.shape_cast %31 : vector<16x192xf32> to vector<1x16x192xf32>
    %33 = vector.extract_strided_slice %32 {offsets = [0, 0, 0], sizes = [1, 16, 16], strides = [1, 1, 1]} : vector<1x16x192xf32> to vector<1x16x16xf32>
    %34 = vector.extract_strided_slice %32 {offsets = [0, 0, 16], sizes = [1, 16, 16], strides = [1, 1, 1]} : vector<1x16x192xf32> to vector<1x16x16xf32>
    %35 = vector.extract_strided_slice %32 {offsets = [0, 0, 32], sizes = [1, 16, 16], strides = [1, 1, 1]} : vector<1x16x192xf32> to vector<1x16x16xf32>
    %36 = vector.extract_strided_slice %32 {offsets = [0, 0, 48], sizes = [1, 16, 16], strides = [1, 1, 1]} : vector<1x16x192xf32> to vector<1x16x16xf32>
    %37 = tpu.concatenate %33, %34, %35, %36 in 0 : vector<1x16x16xf32>, vector<1x16x16xf32>, vector<1x16x16xf32>, vector<1x16x16xf32> -> vector<4x16x16xf32>
    %cst_14 = arith.constant 2.500000e-01 : f32
    %38 = vector.broadcast %cst_14 : f32 to vector<4x16x16xf32>
    %39 = arith.mulf %37, %38 : vector<4x16x16xf32>
    %40 = vector.extract_strided_slice %32 {offsets = [0, 0, 64], sizes = [1, 16, 16], strides = [1, 1, 1]} : vector<1x16x192xf32> to vector<1x16x16xf32>
    %41 = vector.extract_strided_slice %32 {offsets = [0, 0, 80], sizes = [1, 16, 16], strides = [1, 1, 1]} : vector<1x16x192xf32> to vector<1x16x16xf32>
    %42 = vector.extract_strided_slice %32 {offsets = [0, 0, 96], sizes = [1, 16, 16], strides = [1, 1, 1]} : vector<1x16x192xf32> to vector<1x16x16xf32>
    %43 = vector.extract_strided_slice %32 {offsets = [0, 0, 112], sizes = [1, 16, 16], strides = [1, 1, 1]} : vector<1x16x192xf32> to vector<1x16x16xf32>
    %44 = tpu.concatenate %40, %41, %42, %43 in 0 : vector<1x16x16xf32>, vector<1x16x16xf32>, vector<1x16x16xf32>, vector<1x16x16xf32> -> vector<4x16x16xf32>
    %45 = vector.extract_strided_slice %32 {offsets = [0, 0, 128], sizes = [1, 16, 16], strides = [1, 1, 1]} : vector<1x16x192xf32> to vector<1x16x16xf32>
    %46 = vector.extract_strided_slice %32 {offsets = [0, 0, 144], sizes = [1, 16, 16], strides = [1, 1, 1]} : vector<1x16x192xf32> to vector<1x16x16xf32>
    %47 = vector.extract_strided_slice %32 {offsets = [0, 0, 160], sizes = [1, 16, 16], strides = [1, 1, 1]} : vector<1x16x192xf32> to vector<1x16x16xf32>
    %48 = vector.extract_strided_slice %32 {offsets = [0, 0, 176], sizes = [1, 16, 16], strides = [1, 1, 1]} : vector<1x16x192xf32> to vector<1x16x16xf32>
    %49 = tpu.concatenate %45, %46, %47, %48 in 0 : vector<1x16x16xf32>, vector<1x16x16xf32>, vector<1x16x16xf32>, vector<1x16x16xf32> -> vector<4x16x16xf32>
    %50 = arith.truncf %39 : vector<4x16x16xf32> to vector<4x16x16xbf16>
    %51 = arith.truncf %44 : vector<4x16x16xf32> to vector<4x16x16xbf16>
    "tpu.trace_start"() <{level = 10 : i32, message = "bqd,bkd->bqk"}> : () -> ()
    %cst_15 = arith.constant dense<0.000000e+00> : vector<4x16x16xf32>
    %52 = tpu.matmul %50, %51, %cst_15 {dimension_numbers = #tpu.dot_dimension_numbers<[2], [2], [1], [1], [0, 0, 0, 1, 1, 1], [0], [0]>} : vector<4x16x16xbf16>, vector<4x16x16xbf16>, vector<4x16x16xf32> -> vector<4x16x16xf32>
    "tpu.trace_stop"() : () -> ()
    %c0_16 = arith.constant 0 : index
    %c0_17 = arith.constant 0 : index
    %c0_18 = arith.constant 0 : index
    %c0_19 = arith.constant 0 : index
    %53 = vector.load %arg8[%c0_16, %c0_17, %c0_18, %c0_19] : memref<4x1x16x16xbf16, #tpu.memory_space<vmem>>, vector<4x1x16x16xbf16>
    %54 = arith.extf %53 : vector<4x1x16x16xbf16> to vector<4x1x16x16xf32>
    %55 = vector.shape_cast %54 : vector<4x1x16x16xf32> to vector<4x16x16xf32>
    %56 = arith.addf %52, %55 : vector<4x16x16xf32>
    %cst_20 = arith.constant dense<0xFF800000> : vector<4x16xf32>
    %57 = vector.multi_reduction <maximumf>, %56, %cst_20 [2] : vector<4x16x16xf32> to vector<4x16xf32>
    %58 = vector.shape_cast %57 : vector<4x16xf32> to vector<4x16x1xf32>
    %59 = vector.broadcast %58 : vector<4x16x1xf32> to vector<4x16x16xf32>
    %60 = arith.subf %56, %59 : vector<4x16x16xf32>
    %61 = math.exp %60 : vector<4x16x16xf32>
    %cst_21 = arith.constant dense<0.000000e+00> : vector<4x16xf32>
    %62 = vector.multi_reduction <add>, %61, %cst_21 [2] : vector<4x16x16xf32> to vector<4x16xf32>
    %63 = vector.shape_cast %62 : vector<4x16xf32> to vector<4x16x1xf32>
    %64 = arith.truncf %61 : vector<4x16x16xf32> to vector<4x16x16xbf16>
    %65 = arith.truncf %49 : vector<4x16x16xf32> to vector<4x16x16xbf16>
    "tpu.trace_start"() <{level = 10 : i32, message = "bqk,bkd->bqd"}> : () -> ()
    %cst_22 = arith.constant dense<0.000000e+00> : vector<4x16x16xf32>
    %66 = tpu.matmul %64, %65, %cst_22 {dimension_numbers = #tpu.dot_dimension_numbers<[2], [1], [1], [2], [0, 0, 0, 1, 1, 2], [0], [0]>} : vector<4x16x16xbf16>, vector<4x16x16xbf16>, vector<4x16x16xf32> -> vector<4x16x16xf32>
    "tpu.trace_stop"() : () -> ()
    %67 = tpu.reciprocal %63 {approx = true} : vector<4x16x1xf32> -> vector<4x16x1xf32>
    %68 = vector.broadcast %67 : vector<4x16x1xf32> to vector<4x16x16xf32>
    %69 = arith.mulf %66, %68 : vector<4x16x16xf32>
    %70 = vector.extract_strided_slice %69 {offsets = [0, 0, 0], sizes = [1, 16, 16], strides = [1, 1, 1]} : vector<4x16x16xf32> to vector<1x16x16xf32>
    %71 = vector.extract_strided_slice %69 {offsets = [1, 0, 0], sizes = [1, 16, 16], strides = [1, 1, 1]} : vector<4x16x16xf32> to vector<1x16x16xf32>
    %72 = vector.extract_strided_slice %69 {offsets = [2, 0, 0], sizes = [1, 16, 16], strides = [1, 1, 1]} : vector<4x16x16xf32> to vector<1x16x16xf32>
    %73 = vector.extract_strided_slice %69 {offsets = [3, 0, 0], sizes = [1, 16, 16], strides = [1, 1, 1]} : vector<4x16x16xf32> to vector<1x16x16xf32>
    %74 = tpu.concatenate %70, %71, %72, %73 in 2 : vector<1x16x16xf32>, vector<1x16x16xf32>, vector<1x16x16xf32>, vector<1x16x16xf32> -> vector<1x16x64xf32>
    %75 = vector.shape_cast %74 : vector<1x16x64xf32> to vector<16x64xf32>
    %76 = arith.truncf %75 : vector<16x64xf32> to vector<16x64xbf16>
    %c0_23 = arith.constant 0 : index
    %c0_24 = arith.constant 0 : index
    %77 = vector.load %arg6[%c0_23, %c0_24] : memref<64x64xf32, #tpu.memory_space<vmem>>, vector<64x64xf32>
    %78 = arith.truncf %77 : vector<64x64xf32> to vector<64x64xbf16>
    %cst_25 = arith.constant dense<0.000000e+00> : vector<16x64xf32>
    %79 = tpu.matmul %76, %78, %cst_25 {dimension_numbers = #tpu.dot_dimension_numbers<[1], [0], [0], [1], [0, 0, 1, 1], [], []>} : vector<16x64xbf16>, vector<64x64xbf16>, vector<16x64xf32> -> vector<16x64xf32>
    %c0_26 = arith.constant 0 : index
    %c0_27 = arith.constant 0 : index
    %80 = vector.load %arg7[%c0_26, %c0_27] : memref<1x64xf32, #tpu.memory_space<vmem>>, vector<1x64xf32>
    %81 = vector.broadcast %80 : vector<1x64xf32> to vector<16x64xf32>
    %82 = arith.addf %79, %81 : vector<16x64xf32>
    %83 = arith.addf %0, %82 : vector<16x64xf32>
    %c0_28 = arith.constant 0 : index
    %c0_29 = arith.constant 0 : index
    %84 = vector.load %arg9[%c0_28, %c0_29] : memref<1x64xf32, #tpu.memory_space<vmem>>, vector<1x64xf32>
    %c0_30 = arith.constant 0 : index
    %c0_31 = arith.constant 0 : index
    %85 = vector.load %arg10[%c0_30, %c0_31] : memref<1x64xf32, #tpu.memory_space<vmem>>, vector<1x64xf32>
    %cst_32 = arith.constant dense<0.000000e+00> : vector<16xf32>
    %86 = vector.multi_reduction <add>, %83, %cst_32 [1] : vector<16x64xf32> to vector<16xf32>
    %87 = vector.shape_cast %86 : vector<16xf32> to vector<16x1xf32>
    %cst_33 = arith.constant 6.400000e+01 : f32
    %88 = vector.broadcast %cst_33 : f32 to vector<16x1xf32>
    %89 = arith.divf %87, %88 : vector<16x1xf32>
    %90 = vector.broadcast %89 : vector<16x1xf32> to vector<16x64xf32>
    %91 = arith.subf %83, %90 : vector<16x64xf32>
    %92 = arith.mulf %91, %91 : vector<16x64xf32>
    %cst_34 = arith.constant dense<0.000000e+00> : vector<16xf32>
    %93 = vector.multi_reduction <add>, %92, %cst_34 [1] : vector<16x64xf32> to vector<16xf32>
    %94 = vector.shape_cast %93 : vector<16xf32> to vector<16x1xf32>
    %cst_35 = arith.constant 6.400000e+01 : f32
    %95 = vector.broadcast %cst_35 : f32 to vector<16x1xf32>
    %96 = arith.divf %94, %95 : vector<16x1xf32>
    %97 = vector.broadcast %89 : vector<16x1xf32> to vector<16x64xf32>
    %98 = arith.subf %83, %97 : vector<16x64xf32>
    %cst_36 = arith.constant 9.99999974E-6 : f32
    %99 = vector.broadcast %cst_36 : f32 to vector<16x1xf32>
    %100 = arith.addf %96, %99 : vector<16x1xf32>
    %101 = math.rsqrt %100 : vector<16x1xf32>
    %102 = vector.broadcast %101 : vector<16x1xf32> to vector<16x64xf32>
    %103 = arith.mulf %98, %102 : vector<16x64xf32>
    %104 = vector.broadcast %84 : vector<1x64xf32> to vector<16x64xf32>
    %105 = arith.mulf %103, %104 : vector<16x64xf32>
    %106 = vector.broadcast %85 : vector<1x64xf32> to vector<16x64xf32>
    %107 = arith.addf %105, %106 : vector<16x64xf32>
    %108 = arith.truncf %107 : vector<16x64xf32> to vector<16x64xbf16>
    %c0_37 = arith.constant 0 : index
    %c0_38 = arith.constant 0 : index
    %109 = vector.load %arg11[%c0_37, %c0_38] : memref<64x256xf32, #tpu.memory_space<vmem>>, vector<64x256xf32>
    %110 = arith.truncf %109 : vector<64x256xf32> to vector<64x256xbf16>
    %cst_39 = arith.constant dense<0.000000e+00> : vector<16x256xf32>
    %111 = tpu.matmul %108, %110, %cst_39 {dimension_numbers = #tpu.dot_dimension_numbers<[1], [0], [0], [1], [0, 0, 1, 1], [], []>} : vector<16x64xbf16>, vector<64x256xbf16>, vector<16x256xf32> -> vector<16x256xf32>
    %c0_40 = arith.constant 0 : index
    %c0_41 = arith.constant 0 : index
    %112 = vector.load %arg12[%c0_40, %c0_41] : memref<1x256xf32, #tpu.memory_space<vmem>>, vector<1x256xf32>
    %113 = vector.broadcast %112 : vector<1x256xf32> to vector<16x256xf32>
    %114 = arith.addf %111, %113 : vector<16x256xf32>
    %cst_42 = arith.constant 0.707106769 : f32
    %115 = vector.broadcast %cst_42 : f32 to vector<16x256xf32>
    %116 = arith.mulf %114, %115 : vector<16x256xf32>
    %117 = math.absf %116 : vector<16x256xf32>
    %cst_43 = arith.constant 0.327591091 : f32
    %118 = vector.broadcast %cst_43 : f32 to vector<16x256xf32>
    %119 = arith.mulf %118, %117 : vector<16x256xf32>
    %cst_44 = arith.constant 1.000000e+00 : f32
    %120 = vector.broadcast %cst_44 : f32 to vector<16x256xf32>
    %121 = arith.addf %120, %119 : vector<16x256xf32>
    %cst_45 = arith.constant 1.000000e+00 : f32
    %122 = vector.broadcast %cst_45 : f32 to vector<16x256xf32>
    %123 = arith.divf %122, %121 : vector<16x256xf32>
    %cst_46 = arith.constant 1.06140542 : f32
    %124 = vector.broadcast %cst_46 : f32 to vector<16x256xf32>
    %125 = arith.mulf %124, %123 : vector<16x256xf32>
    %cst_47 = arith.constant 1.45315206 : f32
    %126 = vector.broadcast %cst_47 : f32 to vector<16x256xf32>
    %127 = arith.subf %125, %126 : vector<16x256xf32>
    %128 = arith.mulf %127, %123 : vector<16x256xf32>
    %cst_48 = arith.constant 1.42141378 : f32
    %129 = vector.broadcast %cst_48 : f32 to vector<16x256xf32>
    %130 = arith.addf %128, %129 : vector<16x256xf32>
    %131 = arith.mulf %130, %123 : vector<16x256xf32>
    %cst_49 = arith.constant 0.284496725 : f32
    %132 = vector.broadcast %cst_49 : f32 to vector<16x256xf32>
    %133 = arith.subf %131, %132 : vector<16x256xf32>
    %134 = arith.mulf %133, %123 : vector<16x256xf32>
    %cst_50 = arith.constant 0.254829586 : f32
    %135 = vector.broadcast %cst_50 : f32 to vector<16x256xf32>
    %136 = arith.addf %134, %135 : vector<16x256xf32>
    %137 = arith.mulf %136, %123 : vector<16x256xf32>
    %cst_51 = arith.constant 0.000000e+00 : f32
    %138 = vector.broadcast %cst_51 : f32 to vector<16x256xf32>
    %139 = arith.subf %138, %117 : vector<16x256xf32>
    %140 = arith.mulf %139, %117 : vector<16x256xf32>
    %141 = math.exp %140 : vector<16x256xf32>
    %142 = arith.mulf %137, %141 : vector<16x256xf32>
    %cst_52 = arith.constant 1.000000e+00 : f32
    %143 = vector.broadcast %cst_52 : f32 to vector<16x256xf32>
    %144 = arith.subf %143, %142 : vector<16x256xf32>
    %cst_53 = arith.constant 0.000000e+00 : f32
    %145 = vector.broadcast %cst_53 : f32 to vector<16x256xf32>
    %146 = arith.cmpf oge, %116, %145 : vector<16x256xf32>
    %cst_54 = arith.constant 0.000000e+00 : f32
    %147 = vector.broadcast %cst_54 : f32 to vector<16x256xf32>
    %148 = arith.subf %147, %144 : vector<16x256xf32>
    %149 = arith.select %146, %144, %148 : vector<16x256xi1>, vector<16x256xf32>
    %cst_55 = arith.constant 5.000000e-01 : f32
    %150 = vector.broadcast %cst_55 : f32 to vector<16x256xf32>
    %151 = arith.mulf %150, %114 : vector<16x256xf32>
    %cst_56 = arith.constant 1.000000e+00 : f32
    %152 = vector.broadcast %cst_56 : f32 to vector<16x256xf32>
    %153 = arith.addf %152, %149 : vector<16x256xf32>
    %154 = arith.mulf %151, %153 : vector<16x256xf32>
    %155 = arith.truncf %154 : vector<16x256xf32> to vector<16x256xbf16>
    %c0_57 = arith.constant 0 : index
    %c0_58 = arith.constant 0 : index
    %156 = vector.load %arg13[%c0_57, %c0_58] : memref<256x64xf32, #tpu.memory_space<vmem>>, vector<256x64xf32>
    %157 = arith.truncf %156 : vector<256x64xf32> to vector<256x64xbf16>
    %cst_59 = arith.constant dense<0.000000e+00> : vector<16x64xf32>
    %158 = tpu.matmul %155, %157, %cst_59 {dimension_numbers = #tpu.dot_dimension_numbers<[1], [0], [0], [1], [0, 0, 1, 1], [], []>} : vector<16x256xbf16>, vector<256x64xbf16>, vector<16x64xf32> -> vector<16x64xf32>
    %c0_60 = arith.constant 0 : index
    %c0_61 = arith.constant 0 : index
    %159 = vector.load %arg14[%c0_60, %c0_61] : memref<1x64xf32, #tpu.memory_space<vmem>>, vector<1x64xf32>
    %160 = vector.broadcast %159 : vector<1x64xf32> to vector<16x64xf32>
    %161 = arith.addf %158, %160 : vector<16x64xf32>
    %162 = arith.addf %83, %161 : vector<16x64xf32>
    %c0_62 = arith.constant 0 : index
    %c0_63 = arith.constant 0 : index
    %163 = vector.load %arg15[%c0_62, %c0_63] : memref<16x64xf32, #tpu.memory_space<vmem>>, vector<16x64xf32>
    tpu.vector_store %arg15[%c0_62, %c0_63], %162 {strides = array<i32>} : memref<16x64xf32, #tpu.memory_space<vmem>>, vector<16x64xf32>,
    return
  }
  func.func @transform_0(%arg0: i32) -> (i32, i32) {
    %c0_i32 = arith.constant 0 : i32
    %c0_i32_0 = arith.constant 0 : i32
    return %arg0, %c0_i32 : i32, i32
  }
  func.func @transform_1(%arg0: i32) -> (i32, i32) {
    %c0_i32 = arith.constant 0 : i32
    %c0_i32_0 = arith.constant 0 : i32
    %c0_i32_1 = arith.constant 0 : i32
    return %c0_i32, %c0_i32_0 : i32, i32
  }
  func.func @transform_2(%arg0: i32) -> (i32, i32) {
    %c0_i32 = arith.constant 0 : i32
    %c0_i32_0 = arith.constant 0 : i32
    %c0_i32_1 = arith.constant 0 : i32
    return %c0_i32, %c0_i32_0 : i32, i32
  }
  func.func @transform_3(%arg0: i32) -> (i32, i32) {
    %c0_i32 = arith.constant 0 : i32
    %c0_i32_0 = arith.constant 0 : i32
    %c0_i32_1 = arith.constant 0 : i32
    return %c0_i32, %c0_i32_0 : i32, i32
  }
  func.func @transform_4(%arg0: i32) -> (i32, i32) {
    %c0_i32 = arith.constant 0 : i32
    %c0_i32_0 = arith.constant 0 : i32
    %c0_i32_1 = arith.constant 0 : i32
    return %c0_i32, %c0_i32_0 : i32, i32
  }
  func.func @transform_5(%arg0: i32) -> (i32, i32) {
    %c0_i32 = arith.constant 0 : i32
    %c0_i32_0 = arith.constant 0 : i32
    %c0_i32_1 = arith.constant 0 : i32
    return %c0_i32, %c0_i32_0 : i32, i32
  }
  func.func @transform_6(%arg0: i32) -> (i32, i32) {
    %c0_i32 = arith.constant 0 : i32
    %c0_i32_0 = arith.constant 0 : i32
    %c0_i32_1 = arith.constant 0 : i32
    return %c0_i32, %c0_i32_0 : i32, i32
  }
  func.func @transform_7(%arg0: i32) -> (i32, i32, i32, i32) {
    %c0_i32 = arith.constant 0 : i32
    %c0_i32_0 = arith.constant 0 : i32
    %c0_i32_1 = arith.constant 0 : i32
    %c0_i32_2 = arith.constant 0 : i32
    %c0_i32_3 = arith.constant 0 : i32
    return %c0_i32, %c0_i32_0, %c0_i32_1, %c0_i32_2 : i32, i32, i32, i32
  }
  func.func @transform_8(%arg0: i32) -> (i32, i32) {
    %c0_i32 = arith.constant 0 : i32
    %c0_i32_0 = arith.constant 0 : i32
    %c0_i32_1 = arith.constant 0 : i32
    return %c0_i32, %c0_i32_0 : i32, i32
  }
  func.func @transform_9(%arg0: i32) -> (i32, i32) {
    %c0_i32 = arith.constant 0 : i32
    %c0_i32_0 = arith.constant 0 : i32
    %c0_i32_1 = arith.constant 0 : i32
    return %c0_i32, %c0_i32_0 : i32, i32
  }
  func.func @transform_10(%arg0: i32) -> (i32, i32) {
    %c0_i32 = arith.constant 0 : i32
    %c0_i32_0 = arith.constant 0 : i32
    %c0_i32_1 = arith.constant 0 : i32
    return %c0_i32, %c0_i32_0 : i32, i32
  }
  func.func @transform_11(%arg0: i32) -> (i32, i32) {
    %c0_i32 = arith.constant 0 : i32
    %c0_i32_0 = arith.constant 0 : i32
    %c0_i32_1 = arith.constant 0 : i32
    return %c0_i32, %c0_i32_0 : i32, i32
  }
  func.func @transform_12(%arg0: i32) -> (i32, i32) {
    %c0_i32 = arith.constant 0 : i32
    %c0_i32_0 = arith.constant 0 : i32
    %c0_i32_1 = arith.constant 0 : i32
    return %c0_i32, %c0_i32_0 : i32, i32
  }
  func.func @transform_13(%arg0: i32) -> (i32, i32) {
    %c0_i32 = arith.constant 0 : i32
    %c0_i32_0 = arith.constant 0 : i32
    %c0_i32_1 = arith.constant 0 : i32
    return %c0_i32, %c0_i32_0 : i32, i32
  }
  func.func @transform_14(%arg0: i32) -> (i32, i32) {
    %c0_i32 = arith.constant 0 : i32
    %c0_i32_0 = arith.constant 0 : i32
    return %arg0, %c0_i32 : i32, i32
  }
}

module attributes {stable_mosaic.version = 11 : i64} {
  func.func @kernel(%arg0: i32, %arg1: memref<1x16x64xf32, #tpu.memory_space<vmem>>, %arg2: memref<1x64xf32, #tpu.memory_space<vmem>>, %arg3: memref<1x64xf32, #tpu.memory_space<vmem>>, %arg4: memref<64x5xf32, #tpu.memory_space<vmem>>, %arg5: memref<1x5xf32, #tpu.memory_space<vmem>>, %arg6: memref<64x128xf32, #tpu.memory_space<vmem>>, %arg7: memref<1x128xf32, #tpu.memory_space<vmem>>, %arg8: memref<128x5xf32, #tpu.memory_space<vmem>>, %arg9: memref<1x5xf32, #tpu.memory_space<vmem>>, %arg10: memref<1x1x5xf32, #tpu.memory_space<vmem>>) attributes {dimension_semantics = [#tpu.dimension_semantics<parallel>], iteration_bounds = array<i64: 2>, scalar_prefetch = 0 : i64, scratch_operands = 0 : i64, tpu.core_type = #tpu.core_type<tc>, window_params = [{transform_indices = @transform_0, window_bounds = array<i64: 1, 16, 64>}, {pipeline_mode = #tpu.pipeline_mode<synchronous>, transform_indices = @transform_1, window_bounds = array<i64: 1, 64>}, {pipeline_mode = #tpu.pipeline_mode<synchronous>, transform_indices = @transform_2, window_bounds = array<i64: 1, 64>}, {pipeline_mode = #tpu.pipeline_mode<synchronous>, transform_indices = @transform_3, window_bounds = array<i64: 64, 5>}, {pipeline_mode = #tpu.pipeline_mode<synchronous>, transform_indices = @transform_4, window_bounds = array<i64: 1, 5>}, {pipeline_mode = #tpu.pipeline_mode<synchronous>, transform_indices = @transform_5, window_bounds = array<i64: 64, 128>}, {pipeline_mode = #tpu.pipeline_mode<synchronous>, transform_indices = @transform_6, window_bounds = array<i64: 1, 128>}, {pipeline_mode = #tpu.pipeline_mode<synchronous>, transform_indices = @transform_7, window_bounds = array<i64: 128, 5>}, {pipeline_mode = #tpu.pipeline_mode<synchronous>, transform_indices = @transform_8, window_bounds = array<i64: 1, 5>}, {transform_indices = @transform_9, window_bounds = array<i64: 1, 1, 5>}]} {
    %c0 = arith.constant 0 : index
    %c0_0 = arith.constant 0 : index
    %c0_1 = arith.constant 0 : index
    %0 = vector.load %arg1[%c0, %c0_0, %c0_1] : memref<1x16x64xf32, #tpu.memory_space<vmem>>, vector<1x16x64xf32>
    %c0_2 = arith.constant 0 : index
    %c0_3 = arith.constant 0 : index
    %1 = vector.load %arg2[%c0_2, %c0_3] : memref<1x64xf32, #tpu.memory_space<vmem>>, vector<1x64xf32>
    %c0_4 = arith.constant 0 : index
    %c0_5 = arith.constant 0 : index
    %2 = vector.load %arg3[%c0_4, %c0_5] : memref<1x64xf32, #tpu.memory_space<vmem>>, vector<1x64xf32>
    %cst = arith.constant dense<0.000000e+00> : vector<1x16xf32>
    %3 = vector.multi_reduction <add>, %0, %cst [2] : vector<1x16x64xf32> to vector<1x16xf32>
    %4 = vector.shape_cast %3 : vector<1x16xf32> to vector<1x16x1xf32>
    %cst_6 = arith.constant 6.400000e+01 : f32
    %5 = vector.broadcast %cst_6 : f32 to vector<1x16x1xf32>
    %6 = arith.divf %4, %5 : vector<1x16x1xf32>
    %7 = vector.broadcast %6 : vector<1x16x1xf32> to vector<1x16x64xf32>
    %8 = arith.subf %0, %7 : vector<1x16x64xf32>
    %9 = arith.mulf %8, %8 : vector<1x16x64xf32>
    %cst_7 = arith.constant dense<0.000000e+00> : vector<1x16xf32>
    %10 = vector.multi_reduction <add>, %9, %cst_7 [2] : vector<1x16x64xf32> to vector<1x16xf32>
    %11 = vector.shape_cast %10 : vector<1x16xf32> to vector<1x16x1xf32>
    %cst_8 = arith.constant 6.400000e+01 : f32
    %12 = vector.broadcast %cst_8 : f32 to vector<1x16x1xf32>
    %13 = arith.divf %11, %12 : vector<1x16x1xf32>
    %14 = vector.broadcast %6 : vector<1x16x1xf32> to vector<1x16x64xf32>
    %15 = arith.subf %0, %14 : vector<1x16x64xf32>
    %cst_9 = arith.constant 9.99999974E-6 : f32
    %16 = vector.broadcast %cst_9 : f32 to vector<1x16x1xf32>
    %17 = arith.addf %13, %16 : vector<1x16x1xf32>
    %18 = math.rsqrt %17 : vector<1x16x1xf32>
    %19 = vector.broadcast %18 : vector<1x16x1xf32> to vector<1x16x64xf32>
    %20 = arith.mulf %15, %19 : vector<1x16x64xf32>
    %21 = vector.shape_cast %1 : vector<1x64xf32> to vector<1x1x64xf32>
    %22 = vector.broadcast %21 : vector<1x1x64xf32> to vector<1x16x64xf32>
    %23 = arith.mulf %20, %22 : vector<1x16x64xf32>
    %24 = vector.shape_cast %2 : vector<1x64xf32> to vector<1x1x64xf32>
    %25 = vector.broadcast %24 : vector<1x1x64xf32> to vector<1x16x64xf32>
    %26 = arith.addf %23, %25 : vector<1x16x64xf32>
    %cst_10 = arith.constant dense<0.000000e+00> : vector<1x64xf32>
    %27 = vector.multi_reduction <add>, %26, %cst_10 [1] : vector<1x16x64xf32> to vector<1x64xf32>
    %cst_11 = arith.constant 1.600000e+01 : f32
    %28 = vector.broadcast %cst_11 : f32 to vector<1x64xf32>
    %29 = arith.divf %27, %28 : vector<1x64xf32>
    %30 = arith.truncf %29 : vector<1x64xf32> to vector<1x64xbf16>
    %c0_12 = arith.constant 0 : index
    %c0_13 = arith.constant 0 : index
    %31 = vector.load %arg4[%c0_12, %c0_13] : memref<64x5xf32, #tpu.memory_space<vmem>>, vector<64x5xf32>
    %32 = arith.truncf %31 : vector<64x5xf32> to vector<64x5xbf16>
    %cst_14 = arith.constant dense<0.000000e+00> : vector<1x5xf32>
    %33 = tpu.matmul %30, %32, %cst_14 {dimension_numbers = #tpu.dot_dimension_numbers<[1], [0], [0], [1], [0, 0, 1, 1], [], []>} : vector<1x64xbf16>, vector<64x5xbf16>, vector<1x5xf32> -> vector<1x5xf32>
    %c0_15 = arith.constant 0 : index
    %c0_16 = arith.constant 0 : index
    %34 = vector.load %arg5[%c0_15, %c0_16] : memref<1x5xf32, #tpu.memory_space<vmem>>, vector<1x5xf32>
    %35 = arith.addf %33, %34 : vector<1x5xf32>
    %c0_17 = arith.constant 0 : index
    %c0_18 = arith.constant 0 : index
    %36 = vector.load %arg6[%c0_17, %c0_18] : memref<64x128xf32, #tpu.memory_space<vmem>>, vector<64x128xf32>
    %37 = arith.truncf %36 : vector<64x128xf32> to vector<64x128xbf16>
    %cst_19 = arith.constant dense<0.000000e+00> : vector<1x128xf32>
    %38 = tpu.matmul %30, %37, %cst_19 {dimension_numbers = #tpu.dot_dimension_numbers<[1], [0], [0], [1], [0, 0, 1, 1], [], []>} : vector<1x64xbf16>, vector<64x128xbf16>, vector<1x128xf32> -> vector<1x128xf32>
    %c0_20 = arith.constant 0 : index
    %c0_21 = arith.constant 0 : index
    %39 = vector.load %arg7[%c0_20, %c0_21] : memref<1x128xf32, #tpu.memory_space<vmem>>, vector<1x128xf32>
    %40 = arith.addf %38, %39 : vector<1x128xf32>
    %cst_22 = arith.constant 0.000000e+00 : f32
    %41 = vector.broadcast %cst_22 : f32 to vector<1x128xf32>
    %42 = arith.maximumf %40, %41 : vector<1x128xf32>
    %43 = arith.truncf %42 : vector<1x128xf32> to vector<1x128xbf16>
    %c0_23 = arith.constant 0 : index
    %c0_24 = arith.constant 0 : index
    %44 = vector.load %arg8[%c0_23, %c0_24] : memref<128x5xf32, #tpu.memory_space<vmem>>, vector<128x5xf32>
    %45 = arith.truncf %44 : vector<128x5xf32> to vector<128x5xbf16>
    %cst_25 = arith.constant dense<0.000000e+00> : vector<1x5xf32>
    %46 = tpu.matmul %43, %45, %cst_25 {dimension_numbers = #tpu.dot_dimension_numbers<[1], [0], [0], [1], [0, 0, 1, 1], [], []>} : vector<1x128xbf16>, vector<128x5xbf16>, vector<1x5xf32> -> vector<1x5xf32>
    %c0_26 = arith.constant 0 : index
    %c0_27 = arith.constant 0 : index
    %47 = vector.load %arg9[%c0_26, %c0_27] : memref<1x5xf32, #tpu.memory_space<vmem>>, vector<1x5xf32>
    %48 = arith.addf %46, %47 : vector<1x5xf32>
    %49 = arith.addf %35, %48 : vector<1x5xf32>
    %50 = vector.shape_cast %49 : vector<1x5xf32> to vector<1x1x5xf32>
    %c0_28 = arith.constant 0 : index
    %c0_29 = arith.constant 0 : index
    %c0_30 = arith.constant 0 : index
    %51 = vector.load %arg10[%c0_28, %c0_29, %c0_30] : memref<1x1x5xf32, #tpu.memory_space<vmem>>, vector<1x1x5xf32>
    tpu.vector_store %arg10[%c0_28, %c0_29, %c0_30], %50 {strides = array<i32>} : memref<1x1x5xf32, #tpu.memory_space<vmem>>, vector<1x1x5xf32>,
    return
  }
  func.func @transform_0(%arg0: i32) -> (i32, i32, i32) {
    %c0_i32 = arith.constant 0 : i32
    %c0_i32_0 = arith.constant 0 : i32
    %c0_i32_1 = arith.constant 0 : i32
    return %arg0, %c0_i32, %c0_i32_0 : i32, i32, i32
  }
  func.func @transform_1(%arg0: i32) -> (i32, i32) {
    %c0_i32 = arith.constant 0 : i32
    %c0_i32_0 = arith.constant 0 : i32
    %c0_i32_1 = arith.constant 0 : i32
    return %c0_i32, %c0_i32_0 : i32, i32
  }
  func.func @transform_2(%arg0: i32) -> (i32, i32) {
    %c0_i32 = arith.constant 0 : i32
    %c0_i32_0 = arith.constant 0 : i32
    %c0_i32_1 = arith.constant 0 : i32
    return %c0_i32, %c0_i32_0 : i32, i32
  }
  func.func @transform_3(%arg0: i32) -> (i32, i32) {
    %c0_i32 = arith.constant 0 : i32
    %c0_i32_0 = arith.constant 0 : i32
    %c0_i32_1 = arith.constant 0 : i32
    return %c0_i32, %c0_i32_0 : i32, i32
  }
  func.func @transform_4(%arg0: i32) -> (i32, i32) {
    %c0_i32 = arith.constant 0 : i32
    %c0_i32_0 = arith.constant 0 : i32
    %c0_i32_1 = arith.constant 0 : i32
    return %c0_i32, %c0_i32_0 : i32, i32
  }
  func.func @transform_5(%arg0: i32) -> (i32, i32) {
    %c0_i32 = arith.constant 0 : i32
    %c0_i32_0 = arith.constant 0 : i32
    %c0_i32_1 = arith.constant 0 : i32
    return %c0_i32, %c0_i32_0 : i32, i32
  }
  func.func @transform_6(%arg0: i32) -> (i32, i32) {
    %c0_i32 = arith.constant 0 : i32
    %c0_i32_0 = arith.constant 0 : i32
    %c0_i32_1 = arith.constant 0 : i32
    return %c0_i32, %c0_i32_0 : i32, i32
  }
  func.func @transform_7(%arg0: i32) -> (i32, i32) {
    %c0_i32 = arith.constant 0 : i32
    %c0_i32_0 = arith.constant 0 : i32
    %c0_i32_1 = arith.constant 0 : i32
    return %c0_i32, %c0_i32_0 : i32, i32
  }
  func.func @transform_8(%arg0: i32) -> (i32, i32) {
    %c0_i32 = arith.constant 0 : i32
    %c0_i32_0 = arith.constant 0 : i32
    %c0_i32_1 = arith.constant 0 : i32
    return %c0_i32, %c0_i32_0 : i32, i32
  }
  func.func @transform_9(%arg0: i32) -> (i32, i32, i32) {
    %c0_i32 = arith.constant 0 : i32
    %c0_i32_0 = arith.constant 0 : i32
    %c0_i32_1 = arith.constant 0 : i32
    return %arg0, %c0_i32, %c0_i32_0 : i32, i32, i32
  }
}

</mosaic_0001>

<bundles_post_ra>
// kernel: _lambda_.7
= control target key start
LH: loop header
LB: loop body
LE: loop exit
PB: predicated region body
PF: predicated region fallthrough
CT: control target
= control target key end

     0   :  { %vm61_vm0 = vcmask 392192   ;;  %vm185_vm1 = vcmask 261120   ;;  %s930_s1 = inlined_call_operand.vmem [shape: f32[48,32], index: 1, kind: input, shape index: {}]   ;;  %s931_s0 = inlined_call_operand.vmem [shape: f32[128,48], index: 0, kind: input, shape index: {}]   ;;  %s932_s2 = inlined_call_operand.vmem [shape: f32[1,32], index: 2, kind: input, shape index: {}, may-alias: {2,4}]   ;;  %s933_s3 = inlined_call_operand.vmem [shape: f32[1,32], index: 3, kind: input, shape index: {}]   ;;  %s934_s4 = inlined_call_operand.vmem [shape: f32[1,32], index: 4, kind: input, shape index: {}, may-alias: {2,4}]   ;;  %s935_s5 = inlined_call_operand.vmem [shape: f32[128,32], index: 5, kind: output, shape index: {}]  }
   0x1   :  { %v45_v0 = vld [vmem:[%s930_s1] sm:$0xff]  ;;  %v46_v1 = vld [vmem:[%s930_s1 + $0x8] sm:$0xff]  ;;  %v47_v2 = vld [vmem:[%s930_s1 + $0x10] sm:$0xff] }
   0x2   :  { %v51_v3 = vpack.c.bf16 %v46_v1, %v45_v0  ;;  %v48_v4 = vld [vmem:[%s930_s1 + $0x18] sm:$0xff]  ;;  %v49_v5 = vld [vmem:[%s930_s1 + $0x20] sm:$0xff]  ;;  %v50_v6 = vld [vmem:[%s930_s1 + $0x28] sm:$0xff] }
   0x3   :  { %v52_v7 = vpack.c.bf16 %v48_v4, %v47_v2  ;;  %v21_v8 = vld [vmem:[%s931_s0] sm:$0xff]  ;;  %v22_v9 = vld [vmem:[%s931_s0 + $0x8] sm:$0xff]  ;;  %v53_v14 = vpack.c.bf16 %v50_v6, %v49_v5  ;;  %v23_v15 = vld [vmem:[%s931_s0 + $0x10] sm:$0xff] }
   0x4   :  { %v29_v10 = vld [vmem:[%s931_s0 + $0x40] sm:$0xff]  ;;  %481 = vmatprep.subr.bf16.mxu0 %v51_v3  ;;  %503 = vmatprep.subr.bf16.mxu1 %v51_v3  ;;  %v37_v11 = vpack.c.bf16 %v22_v9, %v21_v8  ;;  %v30_v12 = vld [vmem:[%s931_s0 + $0x48] sm:$0xff]  ;;  %v24_v16 = vld [vmem:[%s931_s0 + $0x18] sm:$0xff] }
   0x5   :  { %482 = vmatpush3.bf16.msra.mxu0 %v51_v3  ;;  %506 = vmatpush3.bf16.msra.mxu1 %v51_v3  ;;  %v41_v13 = vpack.c.bf16 %v30_v12, %v29_v10  ;;  %v31_v17 = vld [vmem:[%s931_s0 + $0x50] sm:$0xff]  ;;  %v32_v18 = vld [vmem:[%s931_s0 + $0x58] sm:$0xff]  ;;  %v25_v19 = vld [vmem:[%s931_s0 + $0x20] sm:$0xff]  ;;  %v38_v23 = vpack.c.bf16 %v24_v16, %v23_v15 }
   0x6   :  { %483 = vmatprep.subr.bf16.mxu0 %v52_v7  ;;  %504 = vmatprep.subr.bf16.mxu1 %v52_v7  ;;  %v26_v20 = vld [vmem:[%s931_s0 + $0x28] sm:$0xff]  ;;  %v33_v21 = vld [vmem:[%s931_s0 + $0x60] sm:$0xff]  ;;  %v42_v24 = vpack.c.bf16 %v32_v18, %v31_v17  ;;  %v27_v27 = vld [vmem:[%s931_s0 + $0x30] sm:$0xff] }
   0x7   :  { %487 = vmatprep.mubr.msk.bf16.mxu0 %vm61_vm0, %v37_v11  ;;  %495 = vmatprep.mubr.msk.bf16.mxu1 %vm61_vm0, %v41_v13  ;;  %v34_v22 = vld [vmem:[%s931_s0 + $0x68] sm:$0xff]  ;;  %v39_v25 = vpack.c.bf16 %v26_v20, %v25_v19  ;;  %v28_v28 = vld [vmem:[%s931_s0 + $0x38] sm:$0xff]  ;;  %v35_v29 = vld [vmem:[%s931_s0 + $0x70] sm:$0xff] }
   0x8   :  { %v43_v26 = vpack.c.bf16 %v34_v22, %v33_v21  ;;  %v36_v30 = vld [vmem:[%s931_s0 + $0x78] sm:$0xff]  ;;  %v40_v31 = vpack.c.bf16 %v28_v28, %v27_v27  ;;  %v459_v33 = vld [vmem:[%s932_s2] ss:$0 sm:$0xff] }
   0x9   :  { %484 = vmatpush3.bf16.msra.mxu0 %v52_v7  ;;  %507 = vmatpush3.bf16.msra.mxu1 %v52_v7  ;;  %v44_v32 = vpack.c.bf16 %v36_v30, %v35_v29 }
   0xa   :  { %485 = vmatprep.subr.bf16.mxu0 %v53_v14  ;;  %505 = vmatprep.subr.bf16.mxu1 %v53_v14 }
   0xd   :  { %486 = vmatpush3.bf16.msra.mxu0 %v53_v14  ;;  %508 = vmatpush3.bf16.msra.mxu1 %v53_v14 }
  0x10   :  { %488 = vmatmul.mubr.msk.bf16.vlgmr.msra.gmra.mrb[0].mxu0 %vm61_vm0, %v38_v23  ;;  %496 = vmatmul.mubr.msk.bf16.vlgmr.msra.gmra.mrb[0].mxu1 %vm61_vm0, %v42_v24 }
  0x11   :  { %491 = vmatprep.mubr.msk.bf16.mxu0 %vm61_vm0, %v39_v25  ;;  %499 = vmatprep.mubr.msk.bf16.mxu1 %vm61_vm0, %v43_v26 }
  0x18   :  { %492 = vmatmul.mubr.msk.bf16.gmra.mrb[4].mxu0 %vm61_vm0, %v40_v31  ;;  %500 = vmatmul.mubr.msk.bf16.gmra.mrb[4].mxu1 %vm61_vm0, %v44_v32 }
  0xe3   :  { %v489_v34 = vpop.f32.mrb[0].mxu0  ;;  %v497_v35 = vpop.f32.mrb[0].mxu1 }
  0xe4   :  { %v648_v36 = vadd.f32 %v489_v34, %v459_v33  ;;  %v650_v37 = vadd.f32 %v497_v35, %v459_v33  ;;  %v120_v38 = vpop.f32.mrb[1].mxu0  ;;  %v152_v39 = vpop.f32.mrb[1].mxu1 }
  0xe5   :  { %v490_v40 = vpop.f32.mrb[2].mxu0  ;;  %v498_v41 = vpop.f32.mrb[2].mxu1  ;;  %v652_v42 = vadd.f32 %v459_v33, %v120_v38  ;;  %v660_v48 = vadd.f32 %v459_v33, %v152_v39 }
  0xe6   :  { %v654_v43 = vadd.f32 %v490_v40, %v459_v33  ;;  %v123_v44 = vpop.f32.mrb[3].mxu0  ;;  %v155_v45 = vpop.f32.mrb[3].mxu1  ;;  %v216_v46 = vsel %vm185_vm1, %v650_v37, 0.0  ;;  %v192_v47 = vsel %vm185_vm1, %v648_v36, 0.0  ;;  %v662_v49 = vadd.f32 %v498_v41, %v459_v33 }
  0xe7   :  { %217 = vadd.xlane.f32.xlu0 %v216_v46  ;;  %193 = vadd.xlane.f32.xlu1 %v192_v47  ;;  %v186_v51 = vsel %vm185_vm1, %v652_v42, 0.0  ;;  %v668_v58 = vadd.f32 %v459_v33, %v123_v44  ;;  %v670_v59 = vadd.f32 %v459_v33, %v155_v45  ;;  %v210_v61 = vsel %vm185_vm1, %v660_v48, 0.0 }
  0xe8   :  { %v195_v50 = vsel %vm185_vm1, %v654_v43, 0.0  ;;  %v219_v60 = vsel %vm185_vm1, %v662_v49, 0.0 }
  0xe9   :  { %v213_v2 = vsel %vm185_vm1, %v670_v59, 0.0  ;;  %v189_v3 = vsel %vm185_vm1, %v668_v58, 0.0 }
  0xeb   :  { %196 = vadd.xlane.f32.xlu1 %v195_v50  ;;  %187 = vadd.xlane.f32.xlu0 %v186_v51  ;;  %v493_v52 = vpop.f32.mrb[4].mxu0  ;;  %v501_v53 = vpop.f32.mrb[4].mxu1 }
  0xec   :  { %v136_v54 = vpop.f32.mrb[5].mxu0  ;;  %v168_v55 = vpop.f32.mrb[5].mxu1  ;;  %v676_v0 = vadd.f32 %v493_v52, %v459_v33  ;;  %v704_v14 = vadd.f32 %v501_v53, %v459_v33 }
  0xed   :  { %v494_v56 = vpop.f32.mrb[6].mxu0  ;;  %v502_v57 = vpop.f32.mrb[6].mxu1  ;;  %v688_v6 = vadd.f32 %v459_v33, %v136_v54  ;;  %v692_v8 = vadd.f32 %v459_v33, %v168_v55 }
  0xee   :  { %v139_v62 = vpop.f32.mrb[7].mxu0  ;;  %v171_v63 = vpop.f32.mrb[7].mxu1  ;;  %v678_v1 = vadd.f32 %v494_v56, %v459_v33  ;;  %v204_v5 = vsel %vm185_vm1, %v676_v0, 0.0  ;;  %v706_v15 = vadd.f32 %v502_v57, %v459_v33  ;;  %v228_v17 = vsel %vm185_vm1, %v704_v14, 0.0 }
  0xef   :  { %220 = vadd.xlane.f32.xlu1 %v219_v60  ;;  %211 = vadd.xlane.f32.xlu0 %v210_v61  ;;  %v690_v7 = vadd.f32 %v459_v33, %v139_v62  ;;  %v694_v9 = vadd.f32 %v459_v33, %v171_v63  ;;  %v198_v11 = vsel %vm185_vm1, %v688_v6, 0.0  ;;  %v222_v13 = vsel %vm185_vm1, %v692_v8, 0.0 }
  0xf0   :  { %v207_v4 = vsel %vm185_vm1, %v678_v1, 0.0  ;;  %v231_v16 = vsel %vm185_vm1, %v706_v15, 0.0 }
  0xf1   :  { %v201_v10 = vsel %vm185_vm1, %v690_v7, 0.0  ;;  %v225_v12 = vsel %vm185_vm1, %v694_v9, 0.0 }
  0xf3   :  { %214 = vadd.xlane.f32.xlu1 %v213_v2  ;;  %190 = vadd.xlane.f32.xlu0 %v189_v3 }
  0xf7   :  { %208 = vadd.xlane.f32.xlu1 %v207_v4  ;;  %205 = vadd.xlane.f32.xlu0 %v204_v5 }
  0xfb   :  { %202 = vadd.xlane.f32.xlu1 %v201_v10  ;;  %199 = vadd.xlane.f32.xlu0 %v198_v11 }
  0xff   :  { %226 = vadd.xlane.f32.xlu1 %v225_v12  ;;  %223 = vadd.xlane.f32.xlu0 %v222_v13 }
 0x103   :  { %232 = vadd.xlane.f32.xlu1 %v231_v16  ;;  %229 = vadd.xlane.f32.xlu0 %v228_v17 }
 0x174   :  { %v218_v18 = vpop.xlane.xlu0 %217  ;;  %v194_v19 = vpop.xlane.xlu1 %193 }
 0x175   :  { %v245_v20 = vmul.f32 0.03125, %v218_v18  ;;  %v237_v21 = vmul.f32 0.03125, %v194_v19 }
 0x177   :  { %v713_v22 = vsub.f32 %v650_v37, %v245_v20  ;;  %v716_v23 = vsub.f32 %v648_v36, %v237_v21 }
 0x178   :  { %v197_v24 = vpop.xlane.xlu1 %196  ;;  %v188_v25 = vpop.xlane.xlu0 %187 }
 0x179   :  { %v238_v26 = vmul.f32 0.03125, %v197_v24  ;;  %v235_v27 = vmul.f32 0.03125, %v188_v25  ;;  %v269_v28 = vmul.f32 %v716_v23, %v716_v23  ;;  %v277_v32 = vmul.f32 %v713_v22, %v713_v22 }
 0x17b   :  { %v721_v29 = vsub.f32 %v654_v43, %v238_v26  ;;  %v724_v30 = vsub.f32 %v652_v42, %v235_v27  ;;  %v289_v31 = vsel %vm185_vm1, %v269_v28, 0.0  ;;  %v313_v42 = vsel %vm185_vm1, %v277_v32, 0.0 }
 0x17c   :  { %v221_v33 = vpop.xlane.xlu1 %220  ;;  %290 = vadd.xlane.f32.xlu0 %v289_v31  ;;  %v212_v34 = vpop.xlane.xlu0 %211 }
 0x17d   :  { %v246_v35 = vmul.f32 0.03125, %v221_v33  ;;  %v243_v36 = vmul.f32 0.03125, %v212_v34  ;;  %v270_v37 = vmul.f32 %v721_v29, %v721_v29  ;;  %v267_v38 = vmul.f32 %v724_v30, %v724_v30 }
 0x17f   :  { %v734_v39 = vsub.f32 %v662_v49, %v246_v35  ;;  %v737_v40 = vsub.f32 %v660_v48, %v243_v36  ;;  %v292_v41 = vsel %vm185_vm1, %v270_v37, 0.0  ;;  %v283_v50 = vsel %vm185_vm1, %v267_v38, 0.0 }
 0x180   :  { %v215_v43 = vpop.xlane.xlu1 %214  ;;  %293 = vadd.xlane.f32.xlu1 %v292_v41  ;;  %314 = vadd.xlane.f32.xlu0 %v313_v42  ;;  %v191_v44 = vpop.xlane.xlu0 %190 }
 0x181   :  { %v244_v45 = vmul.f32 0.03125, %v215_v43  ;;  %v236_v46 = vmul.f32 0.03125, %v191_v44  ;;  %v278_v47 = vmul.f32 %v734_v39, %v734_v39  ;;  %v275_v52 = vmul.f32 %v737_v40, %v737_v40 }
 0x183   :  { %v745_v49 = vsub.f32 %v670_v59, %v244_v45  ;;  %v748_v48 = vsub.f32 %v668_v58, %v236_v46  ;;  %v316_v51 = vsel %vm185_vm1, %v278_v47, 0.0  ;;  %v307_v61 = vsel %vm185_vm1, %v275_v52, 0.0 }
 0x184   :  { %v209_v53 = vpop.xlane.xlu1 %208  ;;  %317 = vadd.xlane.f32.xlu1 %v316_v51  ;;  %284 = vadd.xlane.f32.xlu0 %v283_v50  ;;  %v206_v54 = vpop.xlane.xlu0 %205 }
 0x185   :  { %v242_v55 = vmul.f32 0.03125, %v209_v53  ;;  %v241_v56 = vmul.f32 0.03125, %v206_v54  ;;  %v268_v57 = vmul.f32 %v748_v48, %v748_v48  ;;  %v276_v59 = vmul.f32 %v745_v49, %v745_v49 }
 0x187   :  { %v758_v58 = vsub.f32 %v678_v1, %v242_v55  ;;  %v761_v60 = vsub.f32 %v676_v0, %v241_v56  ;;  %v286_v62 = vsel %vm185_vm1, %v268_v57, 0.0  ;;  %v310_v10 = vsel %vm185_vm1, %v276_v59, 0.0 }
 0x188   :  { %v203_v63 = vpop.xlane.xlu1 %202  ;;  %308 = vadd.xlane.f32.xlu0 %v307_v61  ;;  %287 = vadd.xlane.f32.xlu1 %v286_v62  ;;  %v200_v2 = vpop.xlane.xlu0 %199 }
 0x189   :  { %v240_v3 = vmul.f32 0.03125, %v203_v63  ;;  %v239_v4 = vmul.f32 0.03125, %v200_v2  ;;  %v273_v5 = vmul.f32 %v761_v60, %v761_v60  ;;  %v274_v12 = vmul.f32 %v758_v58, %v758_v58  ;;  %v811_v2 = vld [vmem:[%s933_s3] ss:$0 sm:$0xff] }
 0x18b   :  { %v769_v1 = vsub.f32 %v690_v7, %v240_v3  ;;  %v772_v0 = vsub.f32 %v688_v6, %v239_v4  ;;  %v301_v11 = vsel %vm185_vm1, %v273_v5, 0.0  ;;  %v304_v21 = vsel %vm185_vm1, %v274_v12, 0.0  ;;  %v817_v12 = vld [vmem:[%s934_s4] ss:$0 sm:$0xff] }
 0x18c   :  { %v227_v13 = vpop.xlane.xlu1 %226  ;;  %311 = vadd.xlane.f32.xlu1 %v310_v10  ;;  %302 = vadd.xlane.f32.xlu0 %v301_v11  ;;  %v224_v16 = vpop.xlane.xlu0 %223 }
 0x18d   :  { %v248_v17 = vmul.f32 0.03125, %v227_v13  ;;  %v247_v18 = vmul.f32 0.03125, %v224_v16  ;;  %v271_v19 = vmul.f32 %v772_v0, %v772_v0  ;;  %v272_v7 = vmul.f32 %v769_v1, %v769_v1 }
 0x18f   :  { %v782_v6 = vsub.f32 %v694_v9, %v248_v17  ;;  %v785_v20 = vsub.f32 %v692_v8, %v247_v18  ;;  %v295_v24 = vsel %vm185_vm1, %v271_v19, 0.0  ;;  %v298_v32 = vsel %vm185_vm1, %v272_v7, 0.0 }
 0x190   :  { %v233_v25 = vpop.xlane.xlu1 %232  ;;  %305 = vadd.xlane.f32.xlu1 %v304_v21  ;;  %296 = vadd.xlane.f32.xlu0 %v295_v24  ;;  %v230_v26 = vpop.xlane.xlu0 %229 }
 0x191   :  { %v250_v27 = vmul.f32 0.03125, %v233_v25  ;;  %v249_v28 = vmul.f32 0.03125, %v230_v26  ;;  %v279_v31 = vmul.f32 %v785_v20, %v785_v20  ;;  %v280_v34 = vmul.f32 %v782_v6, %v782_v6 }
 0x193   :  { %v793_v9 = vsub.f32 %v706_v15, %v250_v27  ;;  %v796_v8 = vsub.f32 %v704_v14, %v249_v28  ;;  %v319_v33 = vsel %vm185_vm1, %v279_v31, 0.0  ;;  %v322_v36 = vsel %vm185_vm1, %v280_v34, 0.0 }
 0x194   :  { %299 = vadd.xlane.f32.xlu1 %v298_v32  ;;  %320 = vadd.xlane.f32.xlu0 %v319_v33 }
 0x195   :  { %v281_v35 = vmul.f32 %v796_v8, %v796_v8  ;;  %v282_v15 = vmul.f32 %v793_v9, %v793_v9 }
 0x197   :  { %v325_v37 = vsel %vm185_vm1, %v281_v35, 0.0  ;;  %v328_v14 = vsel %vm185_vm1, %v282_v15, 0.0 }
 0x198   :  { %323 = vadd.xlane.f32.xlu1 %v322_v36  ;;  %326 = vadd.xlane.f32.xlu0 %v325_v37 }
 0x19c   :  { %329 = vadd.xlane.f32.xlu1 %v328_v14 }
 0x209   :  { %v291_v38 = vpop.xlane.xlu0 %290 }
 0x20a   :  { %v333_v41 = vmul.f32 0.03125, %v291_v38 }
 0x20c   :  { %v349_v42 = vadd.f32 1e-05, %v333_v41 }
 0x20d   :  { %v294_v43 = vpop.xlane.xlu1 %293  ;;  %v315_v44 = vpop.xlane.xlu0 %314 }
 0x20e   :  { %509 = vrsqrt.f32 %v349_v42  ;;  %v334_v45 = vmul.f32 0.03125, %v294_v43  ;;  %v341_v46 = vmul.f32 0.03125, %v315_v44 }
 0x210   :  { %v350_v47 = vadd.f32 1e-05, %v334_v45  ;;  %v357_v50 = vadd.f32 1e-05, %v341_v46 }
 0x211   :  { %v318_v51 = vpop.xlane.xlu1 %317  ;;  %v285_v52 = vpop.xlane.xlu0 %284 }
 0x212   :  { %511 = vrsqrt.f32 %v350_v47  ;;  %v342_v53 = vmul.f32 0.03125, %v318_v51  ;;  %v331_v54 = vmul.f32 0.03125, %v285_v52 }
 0x213   :  { %513 = vrsqrt.f32 %v357_v50 }
 0x214   :  { %v358_v55 = vadd.f32 1e-05, %v342_v53  ;;  %v347_v56 = vadd.f32 1e-05, %v331_v54 }
 0x215   :  { %v288_v57 = vpop.xlane.xlu1 %287  ;;  %v309_v59 = vpop.xlane.xlu0 %308 }
 0x216   :  { %515 = vrsqrt.f32 %v358_v55  ;;  %v332_v61 = vmul.f32 0.03125, %v288_v57  ;;  %v339_v62 = vmul.f32 0.03125, %v309_v59 }
 0x217   :  { %517 = vrsqrt.f32 %v347_v56 }
 0x218   :  { %v510_v63 = vpop.eup %509  ;;  %v348_v3 = vadd.f32 1e-05, %v332_v61  ;;  %v355_v4 = vadd.f32 1e-05, %v339_v62 }
 0x219   :  { %v381_v5 = vmul.f32 %v510_v63, %v716_v23  ;;  %v312_v10 = vpop.xlane.xlu1 %311  ;;  %v303_v11 = vpop.xlane.xlu0 %302 }
 0x21a   :  { %519 = vrsqrt.f32 %v348_v3  ;;  %v340_v13 = vmul.f32 0.03125, %v312_v10  ;;  %v337_v16 = vmul.f32 0.03125, %v303_v11 }
 0x21b   :  { %v403_v17 = vmul.f32 %v811_v2, %v381_v5  ;;  %521 = vrsqrt.f32 %v355_v4 }
 0x21c   :  { %v512_v18 = vpop.eup %511  ;;  %v356_v19 = vadd.f32 1e-05, %v340_v13  ;;  %v353_v7 = vadd.f32 1e-05, %v337_v16 }
 0x21d   :  { %v514_v21 = vpop.eup %513  ;;  %v425_v24 = vadd.f32 %v817_v12, %v403_v17  ;;  %v382_v23 = vmul.f32 %v512_v18, %v721_v29  ;;  %v306_v25 = vpop.xlane.xlu1 %305 }
 0x21e   :  { %v297_v26 = vpop.xlane.xlu0 %296  ;;  %v389_v27 = vmul.f32 %v514_v21, %v713_v22  ;;  %523 = vrsqrt.f32 %v356_v19  ;;  %v338_v28 = vmul.f32 0.03125, %v306_v25 }
 0x21f   :  { %v335_v31 = vmul.f32 0.03125, %v297_v26  ;;  %441 = vst.msk [vmem:[%s935_s5 + $0x10] sm:$0xff] %vm185_vm1, %v425_v24  ;;  %v404_v32 = vmul.f32 %v811_v2, %v382_v23  ;;  %525 = vrsqrt.f32 %v353_v7 }
 0x220   :  { %v516_v33 = vpop.eup %515  ;;  %v411_v34 = vmul.f32 %v811_v2, %v389_v27  ;;  %v354_v35 = vadd.f32 1e-05, %v338_v28 }
 0x221   :  { %v351_v29 = vadd.f32 1e-05, %v335_v31  ;;  %v518_v36 = vpop.eup %517  ;;  %v426_v37 = vadd.f32 %v817_v12, %v404_v32  ;;  %v390_v22 = vmul.f32 %v516_v33, %v734_v39  ;;  %v300_v15 = vpop.xlane.xlu1 %299 }
 0x222   :  { %v321_v14 = vpop.xlane.xlu0 %320  ;;  %v433_v38 = vadd.f32 %v817_v12, %v411_v34  ;;  %v379_v41 = vmul.f32 %v518_v36, %v724_v30  ;;  %527 = vrsqrt.f32 %v354_v35  ;;  %v336_v42 = vmul.f32 0.03125, %v300_v15 }
 0x223   :  { %442 = vst.msk [vmem:[%s935_s5 + $0x18] sm:$0xff] %vm185_vm1, %v426_v37  ;;  %v412_v43 = vmul.f32 %v811_v2, %v390_v22  ;;  %529 = vrsqrt.f32 %v351_v29  ;;  %v343_v44 = vmul.f32 0.03125, %v321_v14 }
 0x224   :  { %v520_v45 = vpop.eup %519  ;;  %449 = vst.msk [vmem:[%s935_s5 + $0x50] sm:$0xff] %vm185_vm1, %v433_v38  ;;  %v401_v39 = vmul.f32 %v811_v2, %v379_v41  ;;  %v352_v30 = vadd.f32 1e-05, %v336_v42 }
 0x225   :  { %v522_v46 = vpop.eup %521  ;;  %v434_v47 = vadd.f32 %v817_v12, %v412_v43  ;;  %v380_v50 = vmul.f32 %v520_v45, %v748_v48  ;;  %v359_v51 = vadd.f32 1e-05, %v343_v44  ;;  %v324_v52 = vpop.xlane.xlu1 %323 }
 0x226   :  { %v327_v53 = vpop.xlane.xlu0 %326  ;;  %v423_v54 = vadd.f32 %v817_v12, %v401_v39  ;;  %v387_v55 = vmul.f32 %v522_v46, %v737_v40  ;;  %531 = vrsqrt.f32 %v352_v30  ;;  %v344_v56 = vmul.f32 0.03125, %v324_v52 }
 0x227   :  { %450 = vst.msk [vmem:[%s935_s5 + $0x58] sm:$0xff] %vm185_vm1, %v434_v47  ;;  %v402_v57 = vmul.f32 %v811_v2, %v380_v50  ;;  %533 = vrsqrt.f32 %v359_v51  ;;  %v345_v59 = vmul.f32 0.03125, %v327_v53 }
 0x228   :  { %v524_v61 = vpop.eup %523  ;;  %439 = vst.msk [vmem:[%s935_s5] sm:$0xff] %vm185_vm1, %v423_v54  ;;  %v409_v48 = vmul.f32 %v811_v2, %v387_v55  ;;  %v360_v40 = vadd.f32 1e-05, %v344_v56 }
 0x229   :  { %v526_v62 = vpop.eup %525  ;;  %v424_v63 = vadd.f32 %v817_v12, %v402_v57  ;;  %v388_v3 = vmul.f32 %v524_v61, %v745_v49  ;;  %v361_v4 = vadd.f32 1e-05, %v345_v59  ;;  %v330_v5 = vpop.xlane.xlu1 %329 }
 0x22a   :  { %v431_v10 = vadd.f32 %v817_v12, %v409_v48  ;;  %v385_v11 = vmul.f32 %v526_v62, %v761_v60  ;;  %535 = vrsqrt.f32 %v360_v40  ;;  %v346_v13 = vmul.f32 0.03125, %v330_v5 }
 0x22b   :  { %440 = vst.msk [vmem:[%s935_s5 + $0x8] sm:$0xff] %vm185_vm1, %v424_v63  ;;  %v410_v16 = vmul.f32 %v811_v2, %v388_v3  ;;  %537 = vrsqrt.f32 %v361_v4 }
 0x22c   :  { %v528_v17 = vpop.eup %527  ;;  %447 = vst.msk [vmem:[%s935_s5 + $0x40] sm:$0xff] %vm185_vm1, %v431_v10  ;;  %v407_v49 = vmul.f32 %v811_v2, %v385_v11  ;;  %v362_v18 = vadd.f32 1e-05, %v346_v13 }
 0x22d   :  { %v530_v60 = vpop.eup %529  ;;  %v432_v19 = vadd.f32 %v817_v12, %v410_v16  ;;  %v386_v7 = vmul.f32 %v528_v17, %v758_v58 }
 0x22e   :  { %v429_v21 = vadd.f32 %v817_v12, %v407_v49  ;;  %v383_v24 = vmul.f32 %v530_v60, %v772_v0  ;;  %539 = vrsqrt.f32 %v362_v18 }
 0x22f   :  { %448 = vst.msk [vmem:[%s935_s5 + $0x48] sm:$0xff] %vm185_vm1, %v432_v19  ;;  %v408_v23 = vmul.f32 %v811_v2, %v386_v7 }
 0x230   :  { %v532_v25 = vpop.eup %531  ;;  %445 = vst.msk [vmem:[%s935_s5 + $0x30] sm:$0xff] %vm185_vm1, %v429_v21  ;;  %v405_v58 = vmul.f32 %v811_v2, %v383_v24 }
 0x231   :  { %v534_v26 = vpop.eup %533  ;;  %v430_v27 = vadd.f32 %v817_v12, %v408_v23  ;;  %v384_v0 = vmul.f32 %v532_v25, %v769_v1 }
 0x232   :  { %v427_v28 = vadd.f32 %v817_v12, %v405_v58  ;;  %v391_v31 = vmul.f32 %v534_v26, %v785_v20 }
 0x233   :  { %446 = vst.msk [vmem:[%s935_s5 + $0x38] sm:$0xff] %vm185_vm1, %v430_v27  ;;  %v406_v32 = vmul.f32 %v811_v2, %v384_v0 }
 0x234   :  { %v536_v33 = vpop.eup %535  ;;  %443 = vst.msk [vmem:[%s935_s5 + $0x20] sm:$0xff] %vm185_vm1, %v427_v28  ;;  %v413_v34 = vmul.f32 %v811_v2, %v391_v31 }
 0x235   :  { %v538_v1 = vpop.eup %537  ;;  %v428_v35 = vadd.f32 %v817_v12, %v406_v32  ;;  %v392_v20 = vmul.f32 %v536_v33, %v782_v6 }
 0x236   :  { %v435_v29 = vadd.f32 %v817_v12, %v413_v34  ;;  %v393_v36 = vmul.f32 %v538_v1, %v796_v8 }
 0x237   :  { %444 = vst.msk [vmem:[%s935_s5 + $0x28] sm:$0xff] %vm185_vm1, %v428_v35  ;;  %v414_v37 = vmul.f32 %v811_v2, %v392_v20 }
 0x238   :  { %v540_v22 = vpop.eup %539  ;;  %451 = vst.msk [vmem:[%s935_s5 + $0x60] sm:$0xff] %vm185_vm1, %v435_v29  ;;  %v415_v15 = vmul.f32 %v811_v2, %v393_v36 }
 0x239   :  { %v436_v6 = vadd.f32 %v817_v12, %v414_v37  ;;  %v394_v14 = vmul.f32 %v540_v22, %v793_v9 }
 0x23a   :  { %v437_v8 = vadd.f32 %v817_v12, %v415_v15 }
 0x23b   :  { %452 = vst.msk [vmem:[%s935_s5 + $0x68] sm:$0xff] %vm185_vm1, %v436_v6  ;;  %v416_v38 = vmul.f32 %v811_v2, %v394_v14 }
 0x23c   :  { %453 = vst.msk [vmem:[%s935_s5 + $0x70] sm:$0xff] %vm185_vm1, %v437_v8 }
 0x23d   :  { %v438_v41 = vadd.f32 %v817_v12, %v416_v38 }
 0x23f   :  { %454 = vst.msk [vmem:[%s935_s5 + $0x78] sm:$0xff] %vm185_vm1, %v438_v41 }

// kernel: _lambda_.10
= control target key start
LH: loop header
LB: loop body
LE: loop exit
PB: predicated region body
PF: predicated region fallthrough
CT: control target
= control target key end

     0   :  { %vm164_vm0 = vcmask 523264   ;;  %s336_s0 = inlined_call_operand.vmem [shape: f32[32,128], index: 0, kind: input, shape index: {}]   ;;  %s337_s3 = inlined_call_operand.vmem [shape: f32[128,64], index: 3, kind: input, shape index: {}]   ;;  %s338_s1 = inlined_call_operand.vmem [shape: f32[1,128], index: 1, kind: input, shape index: {}]   ;;  %s339_s2 = inlined_call_operand.vmem [shape: f32[1,128], index: 2, kind: input, shape index: {}]   ;;  %s340_s4 = inlined_call_operand.vmem [shape: f32[32,64], index: 4, kind: output, shape index: {}]  }
   0x1   :  { %v18_v0 = vld [vmem:[%s336_s0] sm:$0xff]  ;;  %v20_v1 = vld [vmem:[%s336_s0 + $0x10] sm:$0xff]  ;;  %v19_v2 = vld [vmem:[%s336_s0 + $0x8] sm:$0xff] }
   0x2   :  { %24 = vadd.xlane.f32.xlu0 %v18_v0  ;;  %28 = vadd.xlane.f32.xlu1 %v20_v1  ;;  %v21_v3 = vld [vmem:[%s336_s0 + $0x18] sm:$0xff]  ;;  %v91_v4 = vld [vmem:[%s337_s3] sm:$0xff]  ;;  %v92_v5 = vld [vmem:[%s337_s3 + $0x8] sm:$0xff] }
   0x3   :  { %v107_v6 = vpack.c.bf16 %v92_v5, %v91_v4  ;;  %v93_v23 = vld [vmem:[%s337_s3 + $0x10] sm:$0xff]  ;;  %v94_v24 = vld [vmem:[%s337_s3 + $0x18] sm:$0xff]  ;;  %v95_v26 = vld [vmem:[%s337_s3 + $0x20] sm:$0xff] }
   0x4   :  { %v108_v25 = vpack.c.bf16 %v94_v24, %v93_v23  ;;  %v96_v27 = vld [vmem:[%s337_s3 + $0x28] sm:$0xff]  ;;  %v97_v29 = vld [vmem:[%s337_s3 + $0x30] sm:$0xff]  ;;  %v98_v30 = vld [vmem:[%s337_s3 + $0x38] sm:$0xff] }
   0x5   :  { %185 = vmatprep.subr.bf16.mxu0 %v107_v6  ;;  %v109_v28 = vpack.c.bf16 %v96_v27, %v95_v26  ;;  %v110_v31 = vpack.c.bf16 %v98_v30, %v97_v29  ;;  %v99_v32 = vld [vmem:[%s337_s3 + $0x40] sm:$0xff]  ;;  %v100_v33 = vld [vmem:[%s337_s3 + $0x48] sm:$0xff]  ;;  %v101_v34 = vld [vmem:[%s337_s3 + $0x50] sm:$0xff] }
   0x6   :  { %26 = vadd.xlane.f32.xlu0 %v19_v2  ;;  %30 = vadd.xlane.f32.xlu1 %v21_v3  ;;  %v111_v35 = vpack.c.bf16 %v100_v33, %v99_v32  ;;  %v102_v36 = vld [vmem:[%s337_s3 + $0x58] sm:$0xff]  ;;  %v103_v38 = vld [vmem:[%s337_s3 + $0x60] sm:$0xff]  ;;  %v104_v39 = vld [vmem:[%s337_s3 + $0x68] sm:$0xff] }
   0x7   :  { %186 = vmatpush3.bf16.msra.mxu0 %v107_v6  ;;  %v112_v37 = vpack.c.bf16 %v102_v36, %v101_v34  ;;  %v113_v40 = vpack.c.bf16 %v104_v39, %v103_v38  ;;  %v105_v41 = vld [vmem:[%s337_s3 + $0x70] sm:$0xff]  ;;  %v106_v42 = vld [vmem:[%s337_s3 + $0x78] sm:$0xff]  ;;  %v173_v58 = vld [vmem:[%s338_s1] ss:$0 sm:$0xff] }
   0x8   :  { %187 = vmatprep.subr.bf16.mxu0 %v108_v25  ;;  %v114_v43 = vpack.c.bf16 %v106_v42, %v105_v41  ;;  %v174_v63 = vld [vmem:[%s339_s2] ss:$0 sm:$0xff] }
   0xb   :  { %188 = vmatpush3.bf16.msra.mxu0 %v108_v25 }
   0xc   :  { %189 = vmatprep.subr.bf16.mxu0 %v109_v28 }
   0xf   :  { %190 = vmatpush3.bf16.msra.mxu0 %v109_v28 }
  0x10   :  { %191 = vmatprep.subr.bf16.mxu0 %v110_v31 }
  0x13   :  { %192 = vmatpush3.bf16.msra.mxu0 %v110_v31 }
  0x14   :  { %193 = vmatprep.subr.bf16.mxu0 %v111_v35 }
  0x17   :  { %194 = vmatpush3.bf16.msra.mxu0 %v111_v35 }
  0x18   :  { %195 = vmatprep.subr.bf16.mxu0 %v112_v37 }
  0x1b   :  { %196 = vmatpush3.bf16.msra.mxu0 %v112_v37 }
  0x1c   :  { %197 = vmatprep.subr.bf16.mxu0 %v113_v40 }
  0x1f   :  { %198 = vmatpush3.bf16.msra.mxu0 %v113_v40 }
  0x20   :  { %199 = vmatprep.subr.bf16.mxu0 %v114_v43 }
  0x23   :  { %200 = vmatpush3.bf16.msra.mxu0 %v114_v43 }
  0x8f   :  { %v25_v7 = vpop.xlane.xlu0 %24  ;;  %v29_v8 = vpop.xlane.xlu1 %28 }
  0x90   :  { %v33_v9 = vmul.f32 0.0078125, %v25_v7  ;;  %v35_v10 = vmul.f32 0.0078125, %v29_v8 }
  0x92   :  { %v256_v11 = vsub.f32 %v18_v0, %v33_v9  ;;  %v258_v12 = vsub.f32 %v20_v1, %v35_v10 }
  0x93   :  { %v27_v13 = vpop.xlane.xlu0 %26  ;;  %v31_v14 = vpop.xlane.xlu1 %30 }
  0x94   :  { %v34_v15 = vmul.f32 0.0078125, %v27_v13  ;;  %v41_v16 = vmul.f32 %v256_v11, %v256_v11  ;;  %v36_v17 = vmul.f32 0.0078125, %v31_v14  ;;  %v43_v20 = vmul.f32 %v258_v12, %v258_v12 }
  0x96   :  { %v262_v18 = vsub.f32 %v19_v2, %v34_v15  ;;  %45 = vadd.xlane.f32.xlu0 %v41_v16  ;;  %v264_v19 = vsub.f32 %v21_v3, %v36_v17 }
  0x98   :  { %v42_v21 = vmul.f32 %v262_v18, %v262_v18  ;;  %v44_v22 = vmul.f32 %v264_v19, %v264_v19 }
  0x9a   :  { %49 = vadd.xlane.f32.xlu0 %v43_v20  ;;  %47 = vadd.xlane.f32.xlu1 %v42_v21 }
  0x9e   :  { %51 = vadd.xlane.f32.xlu1 %v44_v22 }
 0x123   :  { %v46_v44 = vpop.xlane.xlu0 %45 }
 0x124   :  { %v53_v45 = vmul.f32 0.0078125, %v46_v44 }
 0x126   :  { %v57_v46 = vadd.f32 1e-05, %v53_v45 }
 0x127   :  { %v48_v47 = vpop.xlane.xlu1 %47  ;;  %v50_v48 = vpop.xlane.xlu0 %49 }
 0x128   :  { %205 = vrsqrt.f32 %v57_v46  ;;  %v54_v49 = vmul.f32 0.0078125, %v48_v47  ;;  %v55_v50 = vmul.f32 0.0078125, %v50_v48 }
 0x12a   :  { %v58_v51 = vadd.f32 1e-05, %v54_v49  ;;  %v59_v52 = vadd.f32 1e-05, %v55_v50 }
 0x12b   :  { %v52_v53 = vpop.xlane.xlu1 %51 }
 0x12c   :  { %207 = vrsqrt.f32 %v58_v51  ;;  %v56_v54 = vmul.f32 0.0078125, %v52_v53 }
 0x12d   :  { %209 = vrsqrt.f32 %v59_v52 }
 0x12e   :  { %v60_v55 = vadd.f32 1e-05, %v56_v54 }
 0x130   :  { %211 = vrsqrt.f32 %v60_v55 }
 0x132   :  { %v206_v56 = vpop.eup %205 }
 0x133   :  { %v65_v57 = vmul.f32 %v206_v56, %v256_v11 }
 0x135   :  { %v75_v62 = vmul.f32 %v173_v58, %v65_v57 }
 0x136   :  { %v208_v59 = vpop.eup %207 }
 0x137   :  { %v210_v60 = vpop.eup %209  ;;  %v66_v61 = vmul.f32 %v208_v59, %v262_v18  ;;  %v85_v3 = vadd.f32 %v174_v63, %v75_v62 }
 0x138   :  { %v67_v0 = vmul.f32 %v210_v60, %v258_v12 }
 0x139   :  { %v76_v1 = vmul.f32 %v173_v58, %v66_v61 }
 0x13a   :  { %v212_v2 = vpop.eup %211  ;;  %v77_v6 = vmul.f32 %v173_v58, %v67_v0 }
 0x13b   :  { %v86_v4 = vadd.f32 %v174_v63, %v76_v1  ;;  %v68_v5 = vmul.f32 %v212_v2, %v264_v19 }
 0x13c   :  { %v87_v9 = vadd.f32 %v174_v63, %v77_v6 }
 0x13d   :  { %v89_v7 = vpack.c.bf16 %v86_v4, %v85_v3  ;;  %v78_v8 = vmul.f32 %v173_v58, %v68_v5 }
 0x13f   :  { %201 = vmatprep.mubr.bf16.mxu0 %v89_v7  ;;  %v88_v10 = vadd.f32 %v174_v63, %v78_v8 }
 0x141   :  { %v90_v11 = vpack.c.bf16 %v88_v10, %v87_v9 }
 0x143   :  { %202 = vmatmul.mubr.bf16.vlgmr.msra.gmra.mrb[0].mxu0 %v90_v11 }
 0x216   :  { %v203_v13 = vpop.f32.mrb[0].mxu0 }
 0x217   :  { %167 = vst.msk [vmem:[%s340_s4 + $0x10] sm:$0xff] %vm164_vm0, %v203_v13  ;;  %v149_v12 = vpop.f32.mrb[1].mxu0 }
 0x218   :  { %165 = vst.msk [vmem:[%s340_s4] sm:$0xff] %vm164_vm0, %v149_v12  ;;  %v204_v14 = vpop.f32.mrb[2].mxu0 }
 0x219   :  { %168 = vst.msk [vmem:[%s340_s4 + $0x18] sm:$0xff] %vm164_vm0, %v204_v14  ;;  %v152_v15 = vpop.f32.mrb[3].mxu0 }
 0x21a   :  { %166 = vst.msk [vmem:[%s340_s4 + $0x8] sm:$0xff] %vm164_vm0, %v152_v15 }

// kernel: _lambda_.8
= control target key start
LH: loop header
LB: loop body
LE: loop exit
PB: predicated region body
PF: predicated region fallthrough
CT: control target
= control target key end

     0   :  { %s3104_s29 = smov 0   ;;  %s3919_s0 = inlined_call_operand.vmem [shape: f32[128,32], index: 0, kind: input, shape index: {}]   ;;  %s3920_s1 = inlined_call_operand.vmem [shape: f32[1,32], index: 1, kind: input, shape index: {}, may-alias: {1,8}]   ;;  %s3921_s2 = inlined_call_operand.vmem [shape: f32[1,32], index: 2, kind: input, shape index: {}, may-alias: {2,6,9,13}]   ;;  %s3922_s3 = inlined_call_operand.vmem [shape: f32[32,96], index: 3, kind: input, shape index: {}]   ;;  %s3923_s4 = inlined_call_operand.vmem [shape: f32[1,96], index: 4, kind: input, shape index: {}]   ;;  %s3924_s5 = inlined_call_operand.vmem [shape: f32[32,32], index: 5, kind: input, shape index: {}]   ;;  %s3925_s6 = inlined_call_operand.vmem [shape: f32[1,32], index: 6, kind: input, shape index: {}, may-alias: {2,6,9,13}]   ;;  %s3926_s7 = inlined_call_operand.vmem [shape: bf16[2,4,16,16], index: 7, kind: input, shape index: {}]   ;;  %s3927_s8 = inlined_call_operand.vmem [shape: f32[1,32], index: 8, kind: input, shape index: {}, may-alias: {1,8}]   ;;  %s3928_s9 = inlined_call_operand.vmem [shape: f32[1,32], index: 9, kind: input, shape index: {}, may-alias: {2,6,9,13}]   ;;  %s3929_s10 = inlined_call_operand.vmem [shape: f32[32,128], index: 10, kind: input, shape index: {}]   ;;  %s3930_s11 = inlined_call_operand.vmem [shape: f32[1,128], index: 11, kind: input, shape index: {}]   ;;  %s3931_s12 = inlined_call_operand.vmem [shape: f32[128,32], index: 12, kind: input, shape index: {}]   ;;  %s3932_s13 = inlined_call_operand.vmem [shape: f32[1,32], index: 13, kind: input, shape index: {}, may-alias: {2,6,9,13}]   ;;  %s3933_s14 = inlined_call_operand.vmem [shape: f32[128,32], index: 14, kind: output, shape index: {}]  }
   0x1 LB: > { %s2525_s30 = sadd.s32 4294967295, %s3021_s29   ;;  %p2529_p0 = scmp.ge.s32.totalorder %s3021_s29, 1  ;;  %s3021_s29 = sphi %s3104_s29, %s24_s29  }
   0x2   : > { %p413_p1 = scmp.lt.s32.totalorder %s3021_s29, 3 }
   0x4   : > { %p414_p2 = pnand %p2529_p0, %p413_p1 }
   0x5   : > { %s2530_s15 = sshll.u32 (!%p414_p2), %s2525_s30, 3  ;;  %vm482_vm0 = vcmask (!%p414_p2), 261120   ;;  %v620_v56 = vld [vmem:[%s3922_s3] sm:$0xff] (!%p414_p2)  ;;  %v621_v57 = vld [vmem:[%s3922_s3 + $0x8] sm:$0xff] (!%p414_p2)  ;;  %v622_v59 = vld [vmem:[%s3922_s3 + $0x10] sm:$0xff] (!%p414_p2)  ;;  %s3023_s22 = smov (!%p414_p2), 112  }
   0x6   : > { %417 = sbr.rel (%p414_p2) target bundleno = 2564 (0xa04), region = 76  ;;  %p460_p3 = scmp.lt.s32.totalorder (!%p414_p2), %s2530_s15, 15  ;;  %v624_v58 = vpack.c.bf16 (!%p414_p2), %v621_v57, %v620_v56  ;;  %v623_v60 = vld [vmem:[%s3922_s3 + $0x18] sm:$0xff] (!%p414_p2)  ;;  %vm3025_vm1 = vmmov (!%p414_p2), 0   ;;  %vm809_vm2 = vcmask (!%p414_p2), 130048  }
   0x7   : > { %v625_v61 = vpack.c.bf16 (!%p414_p2), %v623_v60, %v622_v59  ;;  %s3026_s23 = smov (!%p414_p2), 96   ;;  %s3027_s24 = smov (!%p414_p2), 64  }
   0x8   : > { %2689 = vmatprep.subr.bf16.mxu1 (!%p414_p2), %v624_v58  ;;  %s3028_s26 = smov (!%p414_p2), 16  }
   0x9   : > { %2690 = vmatpush3.bf16.msra.mxu1 (!%p414_p2), %v624_v58 }
   0xa   : > { %2691 = vmatprep.subr.bf16.mxu1 (!%p414_p2), %v625_v61 }
   0xd   : > { %s3935_s15 = smov (!%p460_p3, %s2530_s15), 15  ;;  %2692 = vmatpush3.bf16.msra.mxu1 %v625_v61 }
   0xe   : > { %s2531_s16 = sshll.u32 %s3935_s15, 3 }
   0xf   : > { %s3120_s19 = scalar_lea.vmem %s3919_s0, %s2531_s16  ;;  %s469_s27 = scalar_lea.vmem %s3933_s14, %s2531_s16 }
  0x10   : > { %v472_v0 = vld [vmem:[%s3120_s19] sm:$0xff]  ;;  %v474_v1 = vld [vmem:[%s3120_s19 + $0x10] sm:$0xff]  ;;  %v473_v2 = vld [vmem:[%s3120_s19 + $0x8] sm:$0xff] }
  0x11   : > { %v483_v3 = vsel %vm482_vm0, %v472_v0, 0.0  ;;  %v489_v4 = vsel %vm482_vm0, %v474_v1, 0.0  ;;  %v475_v5 = vld [vmem:[%s3120_s19 + $0x18] sm:$0xff]  ;;  %v486_v6 = vsel %vm482_vm0, %v473_v2, 0.0  ;;  %v476_v8 = vld [vmem:[%s3120_s19 + $0x20] sm:$0xff]  ;;  %v477_v9 = vld [vmem:[%s3120_s19 + $0x28] sm:$0xff] }
  0x12   : > { %484 = vadd.xlane.f32.xlu0 %v483_v3  ;;  %490 = vadd.xlane.f32.xlu1 %v489_v4  ;;  %v492_v7 = vsel %vm482_vm0, %v475_v5, 0.0  ;;  %v495_v10 = vsel %vm482_vm0, %v476_v8, 0.0  ;;  %v498_v11 = vsel %vm482_vm0, %v477_v9, 0.0  ;;  %v478_v12 = vld [vmem:[%s3120_s19 + $0x30] sm:$0xff]  ;;  %v479_v13 = vld [vmem:[%s3120_s19 + $0x38] sm:$0xff] }
  0x13   : > { %v501_v14 = vsel %vm482_vm0, %v478_v12, 0.0  ;;  %v504_v15 = vsel %vm482_vm0, %v479_v13, 0.0 }
  0x16   : > { %487 = vadd.xlane.f32.xlu0 %v486_v6  ;;  %493 = vadd.xlane.f32.xlu1 %v492_v7 }
  0x1a   : > { %496 = vadd.xlane.f32.xlu0 %v495_v10  ;;  %499 = vadd.xlane.f32.xlu1 %v498_v11 }
  0x1e   : > { %502 = vadd.xlane.f32.xlu0 %v501_v14  ;;  %505 = vadd.xlane.f32.xlu1 %v504_v15 }
  0x9f   : > { %v485_v16 = vpop.xlane.xlu0 %484  ;;  %v491_v17 = vpop.xlane.xlu1 %490 }
  0xa0   : > { %v508_v18 = vmul.f32 0.03125, %v485_v16  ;;  %v510_v19 = vmul.f32 0.03125, %v491_v17 }
  0xa2   : > { %v3138_v20 = vsub.f32 %v472_v0, %v508_v18  ;;  %v3140_v21 = vsub.f32 %v474_v1, %v510_v19 }
  0xa3   : > { %v488_v22 = vpop.xlane.xlu0 %487  ;;  %v494_v23 = vpop.xlane.xlu1 %493 }
  0xa4   : > { %v509_v24 = vmul.f32 0.03125, %v488_v22  ;;  %v511_v25 = vmul.f32 0.03125, %v494_v23  ;;  %v524_v26 = vmul.f32 %v3138_v20, %v3138_v20  ;;  %v526_v27 = vmul.f32 %v3140_v21, %v3140_v21 }
  0xa6   : > { %v3146_v28 = vsub.f32 %v473_v2, %v509_v24  ;;  %v3148_v29 = vsub.f32 %v475_v5, %v511_v25  ;;  %v532_v30 = vsel %vm482_vm0, %v524_v26, 0.0  ;;  %v538_v33 = vsel %vm482_vm0, %v526_v27, 0.0  ;;  %v2534_v25 = vld [vmem:[%s3920_s1] ss:$0 sm:$0xff] }
  0xa7   : > { %533 = vadd.xlane.f32.xlu0 %v532_v30  ;;  %v497_v31 = vpop.xlane.xlu0 %496  ;;  %v500_v32 = vpop.xlane.xlu1 %499 }
  0xa8   : > { %v512_v34 = vmul.f32 0.03125, %v497_v31  ;;  %v513_v35 = vmul.f32 0.03125, %v500_v32  ;;  %v525_v36 = vmul.f32 %v3146_v28, %v3146_v28  ;;  %v527_v37 = vmul.f32 %v3148_v29, %v3148_v29 }
  0xaa   : > { %v3156_v38 = vsub.f32 %v476_v8, %v512_v34  ;;  %v3158_v39 = vsub.f32 %v477_v9, %v513_v35  ;;  %v535_v40 = vsel %vm482_vm0, %v525_v36, 0.0  ;;  %v541_v43 = vsel %vm482_vm0, %v527_v37, 0.0 }
  0xab   : > { %539 = vadd.xlane.f32.xlu0 %v538_v33  ;;  %536 = vadd.xlane.f32.xlu1 %v535_v40  ;;  %v503_v41 = vpop.xlane.xlu0 %502  ;;  %v506_v42 = vpop.xlane.xlu1 %505 }
  0xac   : > { %v514_v44 = vmul.f32 0.03125, %v503_v41  ;;  %v515_v45 = vmul.f32 0.03125, %v506_v42  ;;  %v528_v46 = vmul.f32 %v3156_v38, %v3156_v38  ;;  %v529_v47 = vmul.f32 %v3158_v39, %v3158_v39 }
  0xae   : > { %v3166_v48 = vsub.f32 %v478_v12, %v514_v44  ;;  %v3168_v49 = vsub.f32 %v479_v13, %v515_v45  ;;  %v544_v50 = vsel %vm482_vm0, %v528_v46, 0.0  ;;  %v547_v51 = vsel %vm482_vm0, %v529_v47, 0.0 }
  0xaf   : > { %542 = vadd.xlane.f32.xlu1 %v541_v43  ;;  %545 = vadd.xlane.f32.xlu0 %v544_v50 }
  0xb0   : > { %v530_v52 = vmul.f32 %v3166_v48, %v3166_v48  ;;  %v531_v53 = vmul.f32 %v3168_v49, %v3168_v49 }
  0xb2   : > { %v550_v54 = vsel %vm482_vm0, %v530_v52, 0.0  ;;  %v553_v55 = vsel %vm482_vm0, %v531_v53, 0.0 }
  0xb3   : > { %548 = vadd.xlane.f32.xlu1 %v547_v51  ;;  %551 = vadd.xlane.f32.xlu0 %v550_v54 }
  0xb7   : > { %554 = vadd.xlane.f32.xlu1 %v553_v55 }
 0x134   : > { %v534_v62 = vpop.xlane.xlu0 %533 }
 0x135   : > { %v556_v63 = vmul.f32 0.03125, %v534_v62 }
 0x137   : > { %v564_v0 = vadd.f32 1e-05, %v556_v63 }
 0x138   : > { %v537_v1 = vpop.xlane.xlu1 %536  ;;  %v540_v2 = vpop.xlane.xlu0 %539 }
 0x139   : > { %2879 = vrsqrt.f32 %v564_v0  ;;  %v557_v3 = vmul.f32 0.03125, %v537_v1  ;;  %v558_v4 = vmul.f32 0.03125, %v540_v2 }
 0x13b   : > { %v565_v5 = vadd.f32 1e-05, %v557_v3  ;;  %v566_v6 = vadd.f32 1e-05, %v558_v4 }
 0x13c   : > { %v543_v7 = vpop.xlane.xlu1 %542  ;;  %v546_v8 = vpop.xlane.xlu0 %545 }
 0x13d   : > { %2881 = vrsqrt.f32 %v565_v5  ;;  %v559_v9 = vmul.f32 0.03125, %v543_v7  ;;  %v560_v10 = vmul.f32 0.03125, %v546_v8 }
 0x13e   : > { %2883 = vrsqrt.f32 %v566_v6 }
 0x13f   : > { %v567_v11 = vadd.f32 1e-05, %v559_v9  ;;  %v568_v12 = vadd.f32 1e-05, %v560_v10 }
 0x140   : > { %v549_v13 = vpop.xlane.xlu1 %548  ;;  %v552_v14 = vpop.xlane.xlu0 %551 }
 0x141   : > { %2885 = vrsqrt.f32 %v567_v11  ;;  %v561_v15 = vmul.f32 0.03125, %v549_v13  ;;  %v562_v16 = vmul.f32 0.03125, %v552_v14  ;;  %v3024_v14 = vmov 0.0  }
 0x142   : > { %2887 = vrsqrt.f32 %v568_v12  ;;  %2701 = vmatprep.subr.bf16.mxu1 %v3024_v14  ;;  %2713 = vmatprep.subr.bf16.mxu0 %v3024_v14 }
 0x143   : > { %v2880_v17 = vpop.eup %2879  ;;  %v569_v18 = vadd.f32 1e-05, %v561_v15  ;;  %v570_v19 = vadd.f32 1e-05, %v562_v16  ;;  %2715 = vmatprep.mubr.msk.bf16.mxu0 %vm3025_vm1, %v3024_v14 }
 0x144   : > { %v555_v22 = vpop.xlane.xlu1 %554  ;;  %v580_v23 = vmul.f32 %v2880_v17, %v3138_v20  ;;  %v2535_v20 = vld [vmem:[%s3921_s2] ss:$0 sm:$0xff] }
 0x145   : > { %2889 = vrsqrt.f32 %v569_v18  ;;  %v563_v24 = vmul.f32 0.03125, %v555_v22 }
 0x146   : > { %2891 = vrsqrt.f32 %v570_v19  ;;  %v594_v32 = vmul.f32 %v2534_v25, %v580_v23 }
 0x147   : > { %v2882_v26 = vpop.eup %2881  ;;  %v571_v27 = vadd.f32 1e-05, %v563_v24 }
 0x148   : > { %v2884_v30 = vpop.eup %2883  ;;  %v581_v31 = vmul.f32 %v2882_v26, %v3146_v28  ;;  %v608_v40 = vadd.f32 %v2535_v20, %v594_v32 }
 0x149   : > { %v582_v33 = vmul.f32 %v2884_v30, %v3140_v21  ;;  %2893 = vrsqrt.f32 %v571_v27 }
 0x14a   : > { %v595_v34 = vmul.f32 %v2534_v25, %v581_v31 }
 0x14b   : > { %v2886_v35 = vpop.eup %2885  ;;  %v596_v42 = vmul.f32 %v2534_v25, %v582_v33 }
 0x14c   : > { %v2888_v36 = vpop.eup %2887  ;;  %v583_v37 = vmul.f32 %v2886_v35, %v3148_v29  ;;  %v609_v41 = vadd.f32 %v2535_v20, %v595_v34 }
 0x14d   : > { %v584_v43 = vmul.f32 %v2888_v36, %v3156_v38  ;;  %v610_v47 = vadd.f32 %v2535_v20, %v596_v42 }
 0x14e   : > { %v616_v44 = vpack.c.bf16 %v609_v41, %v608_v40  ;;  %v597_v28 = vmul.f32 %v2534_v25, %v583_v37 }
 0x14f   : > { %v2890_v45 = vpop.eup %2889  ;;  %v598_v51 = vmul.f32 %v2534_v25, %v584_v43 }
 0x150   : > { %v2892_v46 = vpop.eup %2891  ;;  %v585_v21 = vmul.f32 %v2890_v45, %v3158_v39  ;;  %2693 = vmatprep.mubr.msk.bf16.mxu1 %vm482_vm0, %v616_v44  ;;  %v611_v50 = vadd.f32 %v2535_v20, %v597_v28 }
 0x151   : > { %v586_v52 = vmul.f32 %v2892_v46, %v3166_v48  ;;  %v612_v38 = vadd.f32 %v2535_v20, %v598_v51  ;;  %v2536_v48 = vld [vmem:[%s3923_s4] ss:$0 sm:$0xff] }
 0x152   : > { %v617_v53 = vpack.c.bf16 %v611_v50, %v610_v47  ;;  %v599_v29 = vmul.f32 %v2534_v25, %v585_v21 }
 0x153   : > { %v2894_v54 = vpop.eup %2893  ;;  %v600_v57 = vmul.f32 %v2534_v25, %v586_v52 }
 0x154   : > { %v587_v55 = vmul.f32 %v2894_v54, %v3168_v49  ;;  %2694 = vmatmul.mubr.msk.bf16.vlgmr.msra.gmra.mrb[0].mxu1 %vm482_vm0, %v617_v53  ;;  %v613_v56 = vadd.f32 %v2535_v20, %v599_v29 }
 0x155   : > { %v614_v39 = vadd.f32 %v2535_v20, %v600_v57 }
 0x156   : > { %v618_v58 = vpack.c.bf16 %v613_v56, %v612_v38  ;;  %v601_v59 = vmul.f32 %v2534_v25, %v587_v55 }
 0x158   : > { %2697 = vmatprep.mubr.msk.bf16.mxu1 %vm482_vm0, %v618_v58  ;;  %v615_v60 = vadd.f32 %v2535_v20, %v601_v59 }
 0x15a   : > { %v619_v61 = vpack.c.bf16 %v615_v60, %v614_v39 }
 0x15c   : > { %2698 = vmatmul.mubr.msk.bf16.gmra.mrb[4].mxu1 %vm482_vm0, %v619_v61 }
 0x15d   : > { %2703 = vmatprep.mubr.msk.bf16.mxu1 %vm3025_vm1, %v3024_v14 }
 0x227   : > { %v2695_v62 = vpop.f32.mrb[0].mxu1 }
 0x228   : > { %v688_v49 = vadd.f32 %v2695_v62, %v2536_v48  ;;  %v679_v63 = vpop.f32.mrb[1].mxu1 }
 0x229   : > { %v680_v0 = vadd.f32 %v2536_v48, %v679_v63  ;;  %v2696_v1 = vpop.f32.mrb[2].mxu1 }
 0x22a   : > { %v691_v2 = vadd.f32 %v2696_v1, %v2536_v48  ;;  %722 = vrot.lane.b32.xlu1 %v688_v49, %s3023_s22  ;;  %v682_v3 = vpop.f32.mrb[3].mxu1  ;;  %v3213_v5 = vmul.f32 0.25, %v688_v49 }
 0x22b   : > { %v683_v4 = vadd.f32 %v2536_v48, %v682_v3  ;;  %718 = vrot.lane.b32.xlu0 %v680_v0, %s3023_s22  ;;  %v3219_v8 = vmul.f32 0.25, %v680_v0 }
 0x22c   : > { %v3215_v6 = vmul.f32 0.25, %v691_v2  ;;  %v3217_v7 = vpack.c.bf16 %v691_v2, %v688_v49 }
 0x22d   : > { %v3221_v9 = vmul.f32 0.25, %v683_v4  ;;  %v3223_v10 = vpack.c.bf16 %v683_v4, %v680_v0 }
 0x22e   : > { %v759_v11 = vpack.c.bf16 %v3215_v6, %v3213_v5  ;;  %720 = vrot.lane.b32.xlu1 %v683_v4, %s3023_s22 }
 0x22f   : > { %v758_v12 = vpack.c.bf16 %v3221_v9, %v3219_v8  ;;  %v2699_v13 = vpop.f32.mrb[4].mxu1  ;;  %v2589_v8 = vld [vmem:[%s3926_s7] sm:$0xff]  }
 0x230   : > { %v704_v15 = vadd.f32 %v2699_v13, %v2536_v48  ;;  %v695_v16 = vpop.f32.mrb[5].mxu1  ;;  %v2590_v9 = vunpack.c.l.bf16 %v2589_v8 }
 0x231   : > { %v696_v17 = vadd.f32 %v2536_v48, %v695_v16  ;;  %v2700_v18 = vpop.f32.mrb[6].mxu1  ;;  %v2621_v16 = vld [vmem:[%s3926_s7 + $0x10] sm:$0xff]  }
 0x232   : > { %v707_v19 = vadd.f32 %v2700_v18, %v2536_v48  ;;  %724 = vrot.lane.b32.xlu1 %v691_v2, %s3023_s22  ;;  %v698_v22 = vpop.f32.mrb[7].mxu1  ;;  %v3234_v24 = vmul.f32 0.25, %v704_v15 }
 0x233   : > { %v699_v23 = vadd.f32 %v2536_v48, %v698_v22  ;;  %726 = vrot.lane.b32.xlu0 %v696_v17, %s3023_s22  ;;  %v3240_v27 = vmul.f32 0.25, %v696_v17 }
 0x234   : > { %v3236_v25 = vmul.f32 0.25, %v707_v19  ;;  %v3238_v26 = vpack.c.bf16 %v707_v19, %v704_v15 }
 0x235   : > { %v3242_v30 = vmul.f32 0.25, %v699_v23  ;;  %v768_v31 = vpack.c.bf16 %v699_v23, %v696_v17  ;;  %v2620_v17 = vld [vmem:[%s3926_s7 + $0x8] sm:$0xff]  }
 0x236   : > { %v761_v32 = vpack.c.bf16 %v3236_v25, %v3234_v24  ;;  %728 = vrot.lane.b32.xlu1 %v699_v23, %s3023_s22  ;;  %v2599_v23 = vunpack.c.h.bf16 %v2621_v16 }
 0x237   : > { %v760_v33 = vpack.c.bf16 %v3242_v30, %v3240_v27  ;;  %730 = vrot.lane.b32.xlu0 %v704_v15, %s3023_s22  ;;  %v2594_v27 = vunpack.c.l.bf16 %v2620_v17 }
 0x23a   : > { %732 = vrot.lane.b32.xlu1 %v707_v19, %s3023_s22 }
 0x23b   : > { %807 = vrot.lane.b32.xlu0 %v3223_v10, %s3026_s23 }
 0x23e   : > { %858 = vrot.lane.b32.xlu1 %v3217_v7, %s3026_s23 }
 0x23f   : > { %908 = vrot.lane.b32.xlu0 %v768_v31, %s3026_s23 }
 0x242   : > { %958 = vrot.lane.b32.xlu1 %v3238_v26, %s3026_s23 }
 0x29c   : > { %v723_v20 = vpop.permute.xlu1 %722 }
 0x29d   : > { %v719_v34 = vpop.permute.xlu0 %718  ;;  %v3269_v43 = vmul.f32 0.25, %v723_v20 }
 0x29e   : > { %v3262_v36 = vmul.f32 0.25, %v719_v34 }
 0x2a0   : > { %v721_v35 = vpop.permute.xlu1 %720 }
 0x2a1   : > { %v3264_v37 = vmul.f32 0.25, %v721_v35  ;;  %v770_v40 = vpack.c.bf16 %v721_v35, %v719_v34 }
 0x2a3   : > { %v762_v41 = vpack.c.bf16 %v3264_v37, %v3262_v36  ;;  %1008 = vrot.lane.b32.xlu0 %v770_v40, %s3026_s23 }
 0x2a4   : > { %v725_v42 = vpop.permute.xlu1 %724 }
 0x2a5   : > { %v3271_v44 = vmul.f32 0.25, %v725_v42  ;;  %v771_v28 = vpack.c.bf16 %v725_v42, %v723_v20  ;;  %v727_v45 = vpop.permute.xlu0 %726 }
 0x2a6   : > { %v3276_v47 = vmul.f32 0.25, %v727_v45 }
 0x2a7   : > { %v763_v46 = vpack.c.bf16 %v3271_v44, %v3269_v43  ;;  %1058 = vrot.lane.b32.xlu1 %v771_v28, %s3026_s23  ;;  %v2622_v44 = vld [vmem:[%s3926_s7 + $0x18] sm:$0xff]  }
 0x2a8   : > { %v729_v21 = vpop.permute.xlu1 %728 }
 0x2a9   : > { %v3278_v50 = vmul.f32 0.25, %v729_v21  ;;  %v3280_v51 = vpack.c.bf16 %v729_v21, %v727_v45  ;;  %v731_v52 = vpop.permute.xlu0 %730  ;;  %v2602_v45 = vunpack.c.l.bf16 %v2622_v44  ;;  %v2603_v21 = vunpack.c.h.bf16 %v2622_v44 }
 0x2aa   : > { %v3286_v54 = vmul.f32 0.25, %v731_v52 }
 0x2ab   : > { %v764_v53 = vpack.c.bf16 %v3278_v50, %v3276_v47  ;;  %1108 = vrot.lane.b32.xlu0 %v3280_v51, %s3026_s23 }
 0x2ac   : > { %v733_v29 = vpop.permute.xlu1 %732 }
 0x2ad   : > { %v757_v55 = vmul.f32 0.25, %v733_v29  ;;  %v3288_v38 = vpack.c.bf16 %v733_v29, %v731_v52  ;;  %v808_v56 = vpop.permute.xlu0 %807 }
 0x2ae   : > { %v814_v57 = vsel %vm809_vm2, %v808_v56, 0 }
 0x2af   : > { %v765_v58 = vpack.c.bf16 %v757_v55, %v3286_v54  ;;  %1359 = vrot.lane.b32.xlu0 %v3223_v10, %s3027_s24  ;;  %1158 = vrot.lane.b32.xlu1 %v3288_v38, %s3026_s23  ;;  %v2591_v10 = vunpack.c.h.bf16 %v2589_v8 }
 0x2b0   : > { %2702 = vmatpush3.bf16.xpose.msra.mxu1 %v814_v57  ;;  %v859_v60 = vpop.permute.xlu1 %858 }
 0x2b1   : > { %v909_v59 = vpop.permute.xlu0 %908  ;;  %2707 = vmatprep.subr.bf16.mxu1 %v3024_v14  ;;  %v864_v61 = vsel %vm809_vm2, %v859_v60, 0 }
 0x2b2   : > { %v914_v39 = vsel %vm809_vm2, %v909_v59, 0  ;;  %v2623_v59 = vld [vmem:[%s3926_s7 + $0x20] sm:$0xff]  }
 0x2b3   : > { %1547 = vrot.lane.b32.xlu0 %v770_v40, %s3027_s24  ;;  %1406 = vrot.lane.b32.xlu1 %v3217_v7, %s3027_s24 }
 0x2b4   : > { %2714 = vmatpush3.bf16.xpose.msra.mxu0 %v914_v39  ;;  %v959_v48 = vpop.permute.xlu1 %958 }
 0x2b5   : > { %2725 = vmatprep.subr.bf16.mxu0 %v3024_v14  ;;  %v964_v62 = vsel %vm809_vm2, %v959_v48, 0 }
 0x2b7   : > { %2704 = vmatmul.mubr.msk.bf16.vlgmr.msra.gmra.mrb[8].mxu1 %vm809_vm2, %v758_v12  ;;  %1453 = vrot.lane.b32.xlu1 %v768_v31, %s3027_s24  ;;  %v2598_v31 = vunpack.c.l.bf16 %v2621_v16 }
 0x2b8   : > { %2708 = vmatpush3.bf16.xpose.msra.mxu1 %v864_v61  ;;  %2709 = vmatprep.mubr.msk.bf16.mxu1 %vm3025_vm1, %v3024_v14 }
 0x2b9   : > { %2719 = vmatprep.subr.bf16.mxu1 %v3024_v14 }
 0x2bb   : > { %2716 = vmatmul.mubr.msk.bf16.vlgmr.msra.gmra.mrb[0].mxu0 %vm809_vm2, %v760_v33  ;;  %1500 = vrot.lane.b32.xlu1 %v3238_v26, %s3027_s24 }
 0x2bc   : > { %2727 = vmatprep.mubr.msk.bf16.mxu0 %vm3025_vm1, %v3024_v14 }
 0x2bf   : > { %2710 = vmatmul.mubr.msk.bf16.vlgmr.msra.gmra.mrb[12].mxu1 %vm809_vm2, %v759_v11  ;;  %1594 = vrot.lane.b32.xlu1 %v771_v28, %s3027_s24 }
 0x2c0   : > { %2720 = vmatpush3.bf16.xpose.msra.mxu1 %v964_v62  ;;  %2721 = vmatprep.mubr.msk.bf16.mxu1 %vm3025_vm1, %v3024_v14  ;;  %v2606_v62 = vunpack.c.l.bf16 %v2623_v59 }
 0x2c1   : > { %2731 = vmatprep.subr.bf16.mxu1 %v3024_v14 }
 0x2c7   : > { %2722 = vmatmul.mubr.msk.bf16.vlgmr.msra.gmra.mrb[16].mxu1 %vm809_vm2, %v761_v32 }
 0x2c8   : > { %2733 = vmatprep.mubr.msk.bf16.mxu1 %vm3025_vm1, %v3024_v14 }
 0x315   : > { %v1009_v49 = vpop.permute.xlu0 %1008 }
 0x316   : > { %v1014_v63 = vsel %vm809_vm2, %v1009_v49, 0 }
 0x317   : > { %2726 = vmatpush3.bf16.xpose.msra.mxu0 %v1014_v63 }
 0x318   : > { %2737 = vmatprep.subr.bf16.mxu0 %v3024_v14 }
 0x319   : > { %v1059_v0 = vpop.permute.xlu1 %1058 }
 0x31a   : > { %v1064_v1 = vsel %vm809_vm2, %v1059_v0, 0 }
 0x31b   : > { %2732 = vmatpush3.bf16.xpose.msra.mxu1 %v1064_v1  ;;  %v2607_v1 = vunpack.c.h.bf16 %v2623_v59 }
 0x31c   : > { %2743 = vmatprep.subr.bf16.mxu1 %v3024_v14 }
 0x31d   : > { %v1109_v2 = vpop.permute.xlu0 %1108 }
 0x31e   : > { %v1114_v3 = vsel %vm809_vm2, %v1109_v2, 0  ;;  %2728 = vmatmul.mubr.msk.bf16.vlgmr.msra.gmra.mrb[4].mxu0 %vm809_vm2, %v762_v41  ;;  %v2595_v41 = vunpack.c.h.bf16 %v2620_v17 }
 0x31f   : > { %2738 = vmatpush3.bf16.xpose.msra.mxu0 %v1114_v3  ;;  %2739 = vmatprep.mubr.msk.bf16.mxu0 %vm3025_vm1, %v3024_v14 }
 0x320   : > { %2749 = vmatprep.subr.bf16.mxu0 %v3024_v14 }
 0x321   : > { %v1159_v4 = vpop.permute.xlu1 %1158  ;;  %v1360_v6 = vpop.permute.xlu0 %1359 }
 0x322   : > { %v1164_v5 = vsel %vm809_vm2, %v1159_v4, 0  ;;  %2734 = vmatmul.mubr.msk.bf16.vlgmr.msra.gmra.mrb[20].mxu1 %vm809_vm2, %v763_v46 }
 0x323   : > { %2744 = vmatpush3.bf16.xpose.msra.mxu1 %v1164_v5  ;;  %2745 = vmatprep.mubr.msk.bf16.mxu1 %vm3025_vm1, %v3024_v14  ;;  %v2626_v5 = vld [vmem:[%s3926_s7 + $0x38] sm:$0xff]  }
 0x324   : > { %2755 = vmatprep.subr.bf16.mxu1 %v3024_v14  ;;  %v2618_v17 = vunpack.c.l.bf16 %v2626_v5 }
 0x325   : > { %v1407_v7 = vpop.permute.xlu1 %1406 }
 0x326   : > { %2740 = vmatmul.mubr.msk.bf16.vlgmr.msra.gmra.mrb[8].mxu0 %vm809_vm2, %v764_v53 }
 0x327   : > { %2750 = vmatpush3.bf16.msra.mxu0 %v1360_v6  ;;  %2751 = vmatprep.mubr.msk.bf16.mxu0 %vm3025_vm1, %v3024_v14 }
 0x328   : > { %2761 = vmatprep.subr.bf16.mxu0 %v3024_v14 }
 0x32a   : > { %2746 = vmatmul.mubr.msk.bf16.vlgmr.msra.gmra.mrb[24].mxu1 %vm809_vm2, %v765_v58  ;;  %v2624_v58 = vld [vmem:[%s3926_s7 + $0x28] sm:$0xff]  }
 0x32b   : > { %2756 = vmatpush3.bf16.msra.mxu1 %v1407_v7  ;;  %2757 = vmatprep.mubr.msk.bf16.mxu1 %vm3025_vm1, %v3024_v14  ;;  %v2610_v61 = vunpack.c.l.bf16 %v2624_v58  ;;  %v2611_v63 = vunpack.c.h.bf16 %v2624_v58 }
 0x32c   : > { %2767 = vmatprep.subr.bf16.mxu1 %v3024_v14 }
 0x38a   : > { %v850_v11 = vpop.f32.mrb[8].mxu1 }
 0x38b   : > { %v3362_v12 = vadd.f32 %v2590_v9, %v850_v11  ;;  %v2705_v13 = vpop.f32.mrb[9].mxu1 }
 0x38c   : > { %v853_v15 = vpop.f32.mrb[10].mxu1 }
 0x38d   : > { %v3370_v18 = vadd.f32 %v2591_v10, %v853_v15  ;;  %v2706_v19 = vpop.f32.mrb[11].mxu1  ;;  %v1207_v22 = vsel %vm809_vm2, %v3362_v12, -inf  ;;  %v2625_v10 = vld [vmem:[%s3926_s7 + $0x30] sm:$0xff]  }
 0x38e   : > { %1208 = vmax.xlane.f32.xlu0 %v1207_v22  ;;  %v950_v24 = vpop.f32.mrb[0].mxu0  ;;  %v2614_v22 = vunpack.c.l.bf16 %v2625_v10 }
 0x38f   : > { %v2717_v25 = vpop.f32.mrb[1].mxu0  ;;  %v1210_v26 = vsel %vm809_vm2, %v3370_v18, -inf  ;;  %v3382_v40 = vadd.f32 %v2598_v31, %v950_v24 }
 0x390   : > { %1211 = vmax.xlane.f32.xlu1 %v1210_v26  ;;  %v953_v30 = vpop.f32.mrb[2].mxu0  ;;  %v2619_v25 = vunpack.c.h.bf16 %v2626_v5 }
 0x391   : > { %v3376_v32 = vadd.f32 %v2599_v23, %v953_v30  ;;  %v2718_v33 = vpop.f32.mrb[3].mxu0  ;;  %v1219_v46 = vsel %vm809_vm2, %v3382_v40, -inf }
 0x392   : > { %v900_v20 = vpop.f32.mrb[12].mxu1 }
 0x393   : > { %v3378_v34 = vadd.f32 %v2594_v27, %v900_v20  ;;  %v2711_v35 = vpop.f32.mrb[13].mxu1  ;;  %v1222_v36 = vsel %vm809_vm2, %v3376_v32, -inf  ;;  %v2615_v27 = vunpack.c.h.bf16 %v2625_v10 }
 0x394   : > { %v903_v37 = vpop.f32.mrb[14].mxu1  ;;  %1223 = vmax.xlane.f32.xlu1 %v1222_v36 }
 0x395   : > { %v2712_v42 = vpop.f32.mrb[15].mxu1  ;;  %v1213_v43 = vsel %vm809_vm2, %v3378_v34, -inf  ;;  %v3389_v28 = vadd.f32 %v2595_v41, %v903_v37 }
 0x396   : > { %1214 = vmax.xlane.f32.xlu0 %v1213_v43 }
 0x397   : > { %v1216_v55 = vsel %vm809_vm2, %v3389_v28, -inf }
 0x39a   : > { %v1000_v47 = vpop.f32.mrb[16].mxu1  ;;  %1220 = vmax.xlane.f32.xlu0 %v1219_v46  ;;  %v1454_v46 = vpop.permute.xlu1 %1453 }
 0x39b   : > { %v2723_v50 = vpop.f32.mrb[17].mxu1  ;;  %v3393_v53 = vadd.f32 %v2602_v45, %v1000_v47  ;;  %v1548_v47 = vpop.permute.xlu0 %1547 }
 0x39c   : > { %v1003_v52 = vpop.f32.mrb[18].mxu1 }
 0x39d   : > { %v3395_v29 = vadd.f32 %v2603_v21, %v1003_v52  ;;  %v2724_v54 = vpop.f32.mrb[19].mxu1  ;;  %v1225_v57 = vsel %vm809_vm2, %v3393_v53, -inf }
 0x39e   : > { %1217 = vmax.xlane.f32.xlu0 %v1216_v55  ;;  %v1501_v21 = vpop.permute.xlu1 %1500 }
 0x39f   : > { %v1228_v56 = vsel %vm809_vm2, %v3395_v29, -inf }
 0x3a0   : > { %1229 = vmax.xlane.f32.xlu1 %v1228_v56 }
 0x3a2   : > { %1226 = vmax.xlane.f32.xlu0 %v1225_v57  ;;  %v1595_v50 = vpop.permute.xlu1 %1594 }
 0x3f1   : > { %v1050_v39 = vpop.f32.mrb[4].mxu0 }
 0x3f2   : > { %v2729_v60 = vpop.f32.mrb[5].mxu0  ;;  %v3414_v6 = vadd.f32 %v2606_v62, %v1050_v39 }
 0x3f3   : > { %v1053_v48 = vpop.f32.mrb[6].mxu0 }
 0x3f4   : > { %v2730_v49 = vpop.f32.mrb[7].mxu0  ;;  %v3423_v13 = vadd.f32 %v2607_v1, %v1053_v48  ;;  %v1231_v24 = vsel %vm809_vm2, %v3414_v6, -inf }
 0x3f5   : > { %v1100_v0 = vpop.f32.mrb[20].mxu1 }
 0x3f6   : > { %v3409_v2 = vadd.f32 %v2610_v61, %v1100_v0  ;;  %v2735_v3 = vpop.f32.mrb[21].mxu1  ;;  %v1234_v33 = vsel %vm809_vm2, %v3423_v13, -inf }
 0x3f7   : > { %v1103_v4 = vpop.f32.mrb[22].mxu1 }
 0x3f8   : > { %v3416_v7 = vadd.f32 %v2611_v63, %v1103_v4  ;;  %v2736_v8 = vpop.f32.mrb[23].mxu1  ;;  %v1237_v9 = vsel %vm809_vm2, %v3409_v2, -inf }
 0x3f9   : > { %1238 = vmax.xlane.f32.xlu0 %v1237_v9  ;;  %v1150_v11 = vpop.f32.mrb[8].mxu0 }
 0x3fa   : > { %v2741_v15 = vpop.f32.mrb[9].mxu0  ;;  %v1240_v16 = vsel %vm809_vm2, %v3416_v7, -inf  ;;  %v3433_v35 = vadd.f32 %v2614_v22, %v1150_v11 }
 0x3fb   : > { %1241 = vmax.xlane.f32.xlu1 %v1240_v16  ;;  %v1153_v19 = vpop.f32.mrb[10].mxu0 }
 0x3fc   : > { %v2742_v23 = vpop.f32.mrb[11].mxu0  ;;  %v3439_v42 = vadd.f32 %v2615_v27, %v1153_v19  ;;  %v1243_v44 = vsel %vm809_vm2, %v3433_v35, -inf }
 0x3fd   : > { %v1200_v26 = vpop.f32.mrb[24].mxu1  ;;  %1232 = vmax.xlane.f32.xlu0 %v1231_v24 }
 0x3fe   : > { %v3429_v30 = vadd.f32 %v2618_v17, %v1200_v26  ;;  %v2747_v31 = vpop.f32.mrb[25].mxu1  ;;  %v1246_v45 = vsel %vm809_vm2, %v3439_v42, -inf }
 0x3ff   : > { %v1203_v20 = vpop.f32.mrb[26].mxu1  ;;  %1235 = vmax.xlane.f32.xlu1 %v1234_v33 }
 0x400   : > { %v3435_v36 = vadd.f32 %v2619_v25, %v1203_v20  ;;  %v2748_v37 = vpop.f32.mrb[27].mxu1  ;;  %v1249_v41 = vsel %vm809_vm2, %v3429_v30, -inf }
 0x401   : > { %1250 = vmax.xlane.f32.xlu0 %v1249_v41 }
 0x402   : > { %v1252_v43 = vsel %vm809_vm2, %v3435_v36, -inf }
 0x403   : > { %1253 = vmax.xlane.f32.xlu1 %v1252_v43 }
 0x405   : > { %1244 = vmax.xlane.f32.xlu0 %v1243_v44 }
 0x407   : > { %1247 = vmax.xlane.f32.xlu1 %v1246_v45 }
 0x418   : > { %1688 = vrot.lane.b32.xlu1 %v3288_v38, %s3027_s24 }
 0x41b   : > { %v1209_v52 = vpop.xlane.xlu0 %1208  ;;  %1641 = vrot.lane.b32.xlu0 %v3280_v51, %s3027_s24 }
 0x41c   : > { %v1255_v54 = vsub.f32 %v3362_v12, %v1209_v52 }
 0x41d   : > { %v1212_v55 = vpop.xlane.xlu1 %1211 }
 0x41e   : > { %v1271_v56 = vmul.f32 1.442695, %v1255_v54  ;;  %v1256_v57 = vsub.f32 %v3370_v18, %v1212_v55 }
 0x420   : > { %v1273_v58 = vmul.f32 1.442695, %v1256_v57  ;;  %2895 = vpow2.f32 %v1271_v56 }
 0x421   : > { %v1224_v59 = vpop.xlane.xlu1 %1223 }
 0x422   : > { %2897 = vpow2.f32 %v1273_v58  ;;  %v1260_v39 = vsub.f32 %v3376_v32, %v1224_v59 }
 0x423   : > { %v1215_v60 = vpop.xlane.xlu0 %1214 }
 0x424   : > { %v1281_v61 = vmul.f32 1.442695, %v1260_v39  ;;  %v1257_v38 = vsub.f32 %v3378_v34, %v1215_v60 }
 0x426   : > { %2899 = vpow2.f32 %v1281_v61  ;;  %v1275_v12 = vmul.f32 1.442695, %v1257_v38 }
 0x427   : > { %v1221_v48 = vpop.xlane.xlu0 %1220 }
 0x428   : > { %v1259_v62 = vsub.f32 %v3382_v40, %v1221_v48 }
 0x42a   : > { %v1279_v51 = vmul.f32 1.442695, %v1259_v62  ;;  %v3456_v49 = vpop.eup %2895 }
 0x42b   : > { %v1218_v63 = vpop.xlane.xlu0 %1217 }
 0x42c   : > { %v3458_v18 = vpop.eup %2897  ;;  %2901 = vpow2.f32 %v1279_v51  ;;  %v1258_v0 = vsub.f32 %v3389_v28, %v1218_v63 }
 0x42d   : > { %v1230_v1 = vpop.xlane.xlu1 %1229  ;;  %v1351_v32 = vpack.c.bf16 %v3458_v18, %v3456_v49  ;;  %2903 = vpow2.f32 %v1275_v12 }
 0x42e   : > { %v1277_v3 = vmul.f32 1.442695, %v1258_v0  ;;  %v1262_v40 = vsub.f32 %v3395_v29, %v1230_v1 }
 0x42f   : > { %2752 = vmatmul.mubr.msk.bf16.vlgmr.msra.gmra.mrb[12].mxu0 %vm809_vm2, %v1351_v32  ;;  %v1227_v34 = vpop.xlane.xlu0 %1226  ;;  %v1306_v32 = vsel %vm809_vm2, %v3458_v18, 0.0 }
 0x430   : > { %2905 = vpow2.f32 %v1277_v3  ;;  %2762 = vmatpush3.bf16.msra.mxu0 %v1454_v46  ;;  %v1261_v4 = vsub.f32 %v3393_v53, %v1227_v34  ;;  %2763 = vmatprep.mubr.msk.bf16.mxu0 %vm3025_vm1, %v3024_v14  ;;  %v1285_v5 = vmul.f32 1.442695, %v1262_v40  ;;  %v3469_v8 = vpop.eup %2899  ;;  %v1303_v3 = vsel %vm809_vm2, %v3456_v49, 0.0 }
 0x431   : > { %2773 = vmatprep.subr.bf16.mxu0 %v3024_v14 }
 0x432   : > { %v1283_v28 = vmul.f32 1.442695, %v1261_v4  ;;  %v1318_v4 = vsel %vm809_vm2, %v3469_v8, 0.0 }
 0x434   : > { %2907 = vpow2.f32 %v1283_v28 }
 0x435   : > { %2909 = vpow2.f32 %v1285_v5 }
 0x436   : > { %v3471_v9 = vpop.eup %2901 }
 0x437   : > { %v1353_v10 = vpack.c.bf16 %v3469_v8, %v3471_v9  ;;  %v3475_v29 = vpop.eup %2903  ;;  %v1315_v18 = vsel %vm809_vm2, %v3471_v9, 0.0 }
 0x438   : > { %v1309_v40 = vsel %vm809_vm2, %v3475_v29, 0.0 }
 0x439   : > { %2764 = vmatmul.mubr.msk.bf16.vlgmr.msra.gmra.mrb[16].mxu0 %vm809_vm2, %v1353_v10 }
 0x43a   : > { %v3478_v53 = vpop.eup %2905  ;;  %2774 = vmatpush3.bf16.msra.mxu0 %v1548_v47  ;;  %2775 = vmatprep.mubr.msk.bf16.mxu0 %vm3025_vm1, %v3024_v14 }
 0x43b   : > { %v1352_v11 = vpack.c.bf16 %v3478_v53, %v3475_v29  ;;  %2785 = vmatprep.subr.bf16.mxu0 %v3024_v14  ;;  %v1312_v34 = vsel %vm809_vm2, %v3478_v53, 0.0 }
 0x43d   : > { %2758 = vmatmul.mubr.msk.bf16.vlgmr.msra.gmra.mrb[28].mxu1 %vm809_vm2, %v1352_v11 }
 0x43e   : > { %2768 = vmatpush3.bf16.msra.mxu1 %v1501_v21  ;;  %2769 = vmatprep.mubr.msk.bf16.mxu1 %vm3025_vm1, %v3024_v14  ;;  %v3489_v15 = vpop.eup %2907 }
 0x43f   : > { %2779 = vmatprep.subr.bf16.mxu1 %v3024_v14  ;;  %v3491_v16 = vpop.eup %2909  ;;  %v1321_v28 = vsel %vm809_vm2, %v3489_v15, 0.0 }
 0x440   : > { %v1354_v17 = vpack.c.bf16 %v3491_v16, %v3489_v15  ;;  %v1324_v49 = vsel %vm809_vm2, %v3491_v16, 0.0 }
 0x445   : > { %2770 = vmatmul.mubr.msk.bf16.vlgmr.msra.gmra.mrb[32].mxu1 %vm809_vm2, %v1354_v17 }
 0x446   : > { %2780 = vmatpush3.bf16.msra.mxu1 %v1595_v50  ;;  %2781 = vmatprep.mubr.msk.bf16.mxu1 %vm3025_vm1, %v3024_v14 }
 0x447   : > { %2791 = vmatprep.subr.bf16.mxu1 %v3024_v14 }
 0x486   : > { %v1239_v19 = vpop.xlane.xlu0 %1238 }
 0x487   : > { %v1265_v22 = vsub.f32 %v3409_v2, %v1239_v19 }
 0x488   : > { %v1242_v23 = vpop.xlane.xlu1 %1241 }
 0x489   : > { %v1291_v24 = vmul.f32 1.442695, %v1265_v22  ;;  %v1266_v25 = vsub.f32 %v3416_v7, %v1242_v23 }
 0x48a   : > { %v1233_v26 = vpop.xlane.xlu0 %1232 }
 0x48b   : > { %v1293_v27 = vmul.f32 1.442695, %v1266_v25  ;;  %v1263_v31 = vsub.f32 %v3414_v6, %v1233_v26  ;;  %2911 = vpow2.f32 %v1291_v24 }
 0x48c   : > { %v1236_v33 = vpop.xlane.xlu1 %1235 }
 0x48d   : > { %2913 = vpow2.f32 %v1293_v27  ;;  %v1287_v20 = vmul.f32 1.442695, %v1263_v31  ;;  %v1264_v37 = vsub.f32 %v3423_v13, %v1236_v33 }
 0x48e   : > { %v1251_v41 = vpop.xlane.xlu0 %1250 }
 0x48f   : > { %2915 = vpow2.f32 %v1287_v20  ;;  %v1289_v43 = vmul.f32 1.442695, %v1264_v37  ;;  %v1269_v44 = vsub.f32 %v3429_v30, %v1251_v41 }
 0x490   : > { %v1254_v2 = vpop.xlane.xlu1 %1253 }
 0x491   : > { %2917 = vpow2.f32 %v1289_v43  ;;  %v1299_v45 = vmul.f32 1.442695, %v1269_v44  ;;  %v1270_v7 = vsub.f32 %v3435_v36, %v1254_v2  ;;  %v1811_v43 = vld [vmem:[%s3924_s5] sm:$0xff]  ;;  %v1812_v44 = vld [vmem:[%s3924_s5 + $0x8] sm:$0xff] }
 0x492   : > { %v1245_v46 = vpop.xlane.xlu0 %1244 }
 0x493   : > { %v1301_v21 = vmul.f32 1.442695, %v1270_v7  ;;  %v1267_v6 = vsub.f32 %v3433_v35, %v1245_v46  ;;  %2919 = vpow2.f32 %v1299_v45  ;;  %v1815_v45 = vpack.c.bf16 %v1812_v44, %v1811_v43  ;;  %v1813_v46 = vld [vmem:[%s3924_s5 + $0x10] sm:$0xff] }
 0x494   : > { %v1248_v47 = vpop.xlane.xlu1 %1247 }
 0x495   : > { %2921 = vpow2.f32 %v1301_v21  ;;  %v1295_v50 = vmul.f32 1.442695, %v1267_v6  ;;  %v1268_v13 = vsub.f32 %v3439_v42, %v1248_v47  ;;  %v2912_v52 = vpop.eup %2911  ;;  %v1814_v21 = vld [vmem:[%s3924_s5 + $0x18] sm:$0xff] }
 0x496   : > { %v1642_v39 = vpop.permute.xlu0 %1641  ;;  %v1333_v60 = vsel %vm809_vm2, %v2912_v52, 0.0  ;;  %v1816_v47 = vpack.c.bf16 %v1814_v21, %v1813_v46 }
 0x497   : > { %v2914_v54 = vpop.eup %2913  ;;  %v1297_v55 = vmul.f32 1.442695, %v1268_v13  ;;  %2923 = vpow2.f32 %v1295_v50 }
 0x498   : > { %v1689_v30 = vpop.permute.xlu1 %1688  ;;  %v1356_v56 = vpack.c.bf16 %v2914_v54, %v2912_v52  ;;  %v1336_v62 = vsel %vm809_vm2, %v2914_v54, 0.0 }
 0x499   : > { %v2916_v57 = vpop.eup %2915  ;;  %2925 = vpow2.f32 %v1297_v55 }
 0x49a   : > { %2782 = vmatmul.mubr.msk.bf16.vlgmr.msra.gmra.mrb[36].mxu1 %vm809_vm2, %v1356_v56  ;;  %v1327_v36 = vsel %vm809_vm2, %v2916_v57, 0.0 }
 0x49b   : > { %v2918_v58 = vpop.eup %2917  ;;  %2792 = vmatpush3.bf16.msra.mxu1 %v1689_v30  ;;  %1328 = vadd.xlane.f32.xlu0 %v1327_v36 }
 0x49c   : > { %v1330_v35 = vsel %vm809_vm2, %v2918_v58, 0.0  ;;  %v1355_v59 = vpack.c.bf16 %v2918_v58, %v2916_v57  ;;  %2793 = vmatprep.mubr.msk.bf16.mxu1 %vm3025_vm1, %v3024_v14 }
 0x49d   : > { %1331 = vadd.xlane.f32.xlu1 %v1330_v35  ;;  %v2920_v42 = vpop.eup %2919 }
 0x49e   : > { %2776 = vmatmul.mubr.msk.bf16.vlgmr.msra.gmra.mrb[20].mxu0 %vm809_vm2, %v1355_v59 }
 0x49f   : > { %v2922_v61 = vpop.eup %2921  ;;  %2786 = vmatpush3.bf16.msra.mxu0 %v1642_v39  ;;  %1334 = vadd.xlane.f32.xlu0 %v1333_v60 }
 0x4a0   : > { %v1358_v38 = vpack.c.bf16 %v2922_v61, %v2920_v42  ;;  %2787 = vmatprep.mubr.msk.bf16.mxu0 %vm3025_vm1, %v3024_v14  ;;  %v1348_v1 = vsel %vm809_vm2, %v2922_v61, 0.0  ;;  %v1345_v14 = vsel %vm809_vm2, %v2920_v42, 0.0  ;;  %2797 = vmatprep.subr.bf16.mxu0 %v1815_v45 }
 0x4a1   : > { %v2924_v48 = vpop.eup %2923 }
 0x4a2   : > { %2794 = vmatmul.mubr.msk.bf16.vlgmr.msra.gmra.mrb[40].mxu1 %vm809_vm2, %v1358_v38  ;;  %v1339_v0 = vsel %vm809_vm2, %v2924_v48, 0.0 }
 0x4a3   : > { %v2926_v51 = vpop.eup %2925  ;;  %1337 = vadd.xlane.f32.xlu0 %v1336_v62 }
 0x4a4   : > { %v1342_v12 = vsel %vm809_vm2, %v2926_v51, 0.0  ;;  %v1357_v63 = vpack.c.bf16 %v2926_v51, %v2924_v48 }
 0x4a5   : > { %1343 = vadd.xlane.f32.xlu1 %v1342_v12 }
 0x4a6   : > { %2788 = vmatmul.mubr.msk.bf16.vlgmr.msra.gmra.mrb[24].mxu0 %vm809_vm2, %v1357_v63 }
 0x4a7   : > { %1340 = vadd.xlane.f32.xlu0 %v1339_v0  ;;  %2798 = vmatpush3.bf16.msra.mxu0 %v1815_v45 }
 0x4a8   : > { %2799 = vmatprep.subr.bf16.mxu0 %v1816_v47 }
 0x4a9   : > { %1349 = vadd.xlane.f32.xlu1 %v1348_v1 }
 0x4ab   : > { %1346 = vadd.xlane.f32.xlu0 %v1345_v14  ;;  %2800 = vmatpush3.bf16.msra.mxu0 %v1816_v47 }
 0x4ad   : > { %1307 = vadd.xlane.f32.xlu1 %v1306_v32 }
 0x4af   : > { %1304 = vadd.xlane.f32.xlu0 %v1303_v3 }
 0x4b1   : > { %1313 = vadd.xlane.f32.xlu1 %v1312_v34 }
 0x4b3   : > { %1310 = vadd.xlane.f32.xlu0 %v1309_v40 }
 0x4b5   : > { %1319 = vadd.xlane.f32.xlu1 %v1318_v4 }
 0x4b7   : > { %1316 = vadd.xlane.f32.xlu0 %v1315_v18 }
 0x4b9   : > { %1325 = vadd.xlane.f32.xlu1 %v1324_v49 }
 0x4bb   : > { %1322 = vadd.xlane.f32.xlu0 %v1321_v28 }
 0x502   : > { %v3539_v5 = vpop.f32.mrb[12].mxu0 }
 0x503   : > { %v2753_v10 = vpop.f32.mrb[13].mxu0 }
 0x504   : > { %v3541_v29 = vpop.f32.mrb[14].mxu0 }
 0x505   : > { %v2754_v53 = vpop.f32.mrb[15].mxu0 }
 0x50c   : > { %v3543_v8 = vpop.f32.mrb[16].mxu0 }
 0x50d   : > { %v2765_v11 = vpop.f32.mrb[17].mxu0 }
 0x50e   : > { %v3545_v17 = vpop.f32.mrb[18].mxu0 }
 0x50f   : > { %v2766_v9 = vpop.f32.mrb[19].mxu0 }
 0x510   : > { %v3547_v19 = vpop.f32.mrb[28].mxu1 }
 0x511   : > { %v2759_v16 = vpop.f32.mrb[29].mxu1 }
 0x512   : > { %v3549_v22 = vpop.f32.mrb[30].mxu1 }
 0x513   : > { %v2760_v23 = vpop.f32.mrb[31].mxu1 }
 0x518   : > { %v3551_v15 = vpop.f32.mrb[32].mxu1 }
 0x519   : > { %v2771_v24 = vpop.f32.mrb[33].mxu1 }
 0x51a   : > { %v3553_v25 = vpop.f32.mrb[34].mxu1 }
 0x51b   : > { %v2772_v26 = vpop.f32.mrb[35].mxu1 }
 0x528   : > { %v1329_v27 = vpop.xlane.xlu0 %1328 }
 0x52a   : > { %v1332_v20 = vpop.xlane.xlu1 %1331 }
 0x52c   : > { %v1335_v31 = vpop.xlane.xlu0 %1334 }
 0x52d   : > { %2927 = vrcp.f32 %v1335_v31 }
 0x530   : > { %v1338_v33 = vpop.xlane.xlu0 %1337 }
 0x531   : > { %2929 = vrcp.f32 %v1338_v33 }
 0x532   : > { %v1344_v37 = vpop.xlane.xlu1 %1343  ;;  %2931 = vrcp.f32 %v1329_v27 }
 0x533   : > { %2933 = vrcp.f32 %v1332_v20 }
 0x534   : > { %v1341_v41 = vpop.xlane.xlu0 %1340 }
 0x536   : > { %v1350_v2 = vpop.xlane.xlu1 %1349 }
 0x537   : > { %2935 = vrcp.f32 %v1350_v2  ;;  %v2928_v50 = vpop.eup %2927 }
 0x538   : > { %v1347_v7 = vpop.xlane.xlu0 %1346 }
 0x539   : > { %2937 = vrcp.f32 %v1347_v7 }
 0x53a   : > { %2939 = vrcp.f32 %v1344_v37  ;;  %v1308_v11 = vpop.xlane.xlu1 %1307 }
 0x53b   : > { %v2930_v52 = vpop.eup %2929  ;;  %2941 = vrcp.f32 %v1341_v41 }
 0x53c   : > { %v2932_v36 = vpop.eup %2931  ;;  %v1305_v9 = vpop.xlane.xlu0 %1304 }
 0x53d   : > { %v2934_v59 = vpop.eup %2933 }
 0x53e   : > { %v1314_v16 = vpop.xlane.xlu1 %1313 }
 0x53f   : > { %2943 = vrcp.f32 %v1314_v16 }
 0x540   : > { %v1311_v23 = vpop.xlane.xlu0 %1310 }
 0x541   : > { %v2936_v48 = vpop.eup %2935  ;;  %2945 = vrcp.f32 %v1311_v23 }
 0x542   : > { %v1320_v24 = vpop.xlane.xlu1 %1319  ;;  %2947 = vrcp.f32 %v1308_v11 }
 0x543   : > { %v2938_v12 = vpop.eup %2937  ;;  %2949 = vrcp.f32 %v1305_v9  ;;  %v3010_v9 = vld [vmem:[%s3120_s19 + $0x18] sm:$0xff] }
 0x544   : > { %v2940_v3 = vpop.eup %2939  ;;  %v1317_v26 = vpop.xlane.xlu0 %1316  ;;  %2951 = vrcp.f32 %v1320_v24 }
 0x545   : > { %v2942_v4 = vpop.eup %2941  ;;  %2953 = vrcp.f32 %v1317_v26 }
 0x546   : > { %v1326_v27 = vpop.xlane.xlu1 %1325 }
 0x547   : > { %2955 = vrcp.f32 %v1326_v27 }
 0x548   : > { %v1323_v20 = vpop.xlane.xlu0 %1322 }
 0x549   : > { %v2944_v31 = vpop.eup %2943  ;;  %2957 = vrcp.f32 %v1323_v20 }
 0x54a   : > { %v1754_v43 = vmul.f32 %v2944_v31, %v3549_v22 }
 0x54b   : > { %v2946_v33 = vpop.eup %2945 }
 0x54c   : > { %v2948_v41 = vpop.eup %2947  ;;  %v1753_v45 = vmul.f32 %v2946_v33, %v3547_v19 }
 0x54d   : > { %v2950_v7 = vpop.eup %2949 }
 0x56d   : > { %v1634_v6 = vpop.f32.mrb[36].mxu1 }
 0x56e   : > { %v2783_v13 = vpop.f32.mrb[37].mxu1  ;;  %v1761_v55 = vmul.f32 %v2928_v50, %v1634_v6  ;;  %v1751_v50 = vmul.f32 %v2950_v7, %v3539_v5 }
 0x56f   : > { %v1637_v54 = vpop.f32.mrb[38].mxu1  ;;  %v1752_v13 = vmul.f32 %v2948_v41, %v3541_v29  ;;  %v3011_v41 = vld [vmem:[%s3120_s19 + $0x20] sm:$0xff] }
 0x570   : > { %v1762_v30 = vmul.f32 %v2930_v52, %v1637_v54  ;;  %v2784_v56 = vpop.f32.mrb[39].mxu1 }
 0x571   : > { %v1587_v57 = vpop.f32.mrb[20].mxu0 }
 0x572   : > { %v2864_v58 = vpack.i.bf16 %v1762_v30, %v1761_v55  ;;  %v2777_v35 = vpop.f32.mrb[21].mxu0  ;;  %v1759_v39 = vmul.f32 %v2932_v36, %v1587_v57  ;;  %v2952_v30 = vpop.eup %2951 }
 0x573   : > { %v1590_v42 = vpop.f32.mrb[22].mxu0  ;;  %v2954_v56 = vpop.eup %2953 }
 0x574   : > { %v1760_v60 = vmul.f32 %v2934_v59, %v1590_v42  ;;  %v2778_v61 = vpop.f32.mrb[23].mxu0  ;;  %2865 = vrot.lane.b32.xlu1 %v2864_v58, %s3028_s26  ;;  %v2956_v36 = vpop.eup %2955  ;;  %v1756_v58 = vmul.f32 %v2952_v30, %v3545_v17  ;;  %v1755_v29 = vmul.f32 %v2954_v56, %v3543_v8 }
 0x575   : > { %v1728_v38 = vpop.f32.mrb[40].mxu1  ;;  %v2958_v59 = vpop.eup %2957 }
 0x576   : > { %v2859_v62 = vpack.i.bf16 %v1760_v60, %v1759_v39  ;;  %v2795_v51 = vpop.f32.mrb[41].mxu1  ;;  %v1765_v0 = vmul.f32 %v2938_v12, %v1728_v38  ;;  %v1758_v38 = vmul.f32 %v2956_v36, %v3553_v25  ;;  %v2557_v25 = vld [vmem:[%s3925_s6] ss:$0 sm:$0xff] }
 0x577   : > { %v1731_v63 = vpop.f32.mrb[42].mxu1  ;;  %v1757_v51 = vmul.f32 %v2958_v59, %v3551_v15 }
 0x578   : > { %v1766_v1 = vmul.f32 %v2936_v48, %v1731_v63  ;;  %v2796_v14 = vpop.f32.mrb[43].mxu1  ;;  %2860 = vrot.lane.b32.xlu0 %v2859_v62, %s3028_s26 }
 0x579   : > { %v1681_v32 = vpop.f32.mrb[24].mxu0 }
 0x57a   : > { %v2874_v34 = vpack.i.bf16 %v1766_v1, %v1765_v0  ;;  %v2789_v40 = vpop.f32.mrb[25].mxu0  ;;  %v1763_v49 = vmul.f32 %v2942_v4, %v1681_v32  ;;  %v3008_v4 = vld [vmem:[%s3120_s19 + $0x10] sm:$0xff] }
 0x57b   : > { %v1684_v18 = vpop.f32.mrb[26].mxu0 }
 0x57c   : > { %v1764_v28 = vmul.f32 %v2940_v3, %v1684_v18  ;;  %v2790_v10 = vpop.f32.mrb[27].mxu0  ;;  %v3007_v3 = vld [vmem:[%s3120_s19] sm:$0xff] }
 0x57e   : > { %v2869_v53 = vpack.i.bf16 %v1764_v28, %v1763_v49  ;;  %v3009_v28 = vld [vmem:[%s3120_s19 + $0x8] sm:$0xff] }
 0x580   : > { %2870 = vrot.lane.b32.xlu1 %v2869_v53, %s3028_s26 }
 0x584   : > { %2875 = vrot.lane.b32.xlu1 %v2874_v34, %s3028_s26 }
 0x5e6   : > { %v2866_v37 = vpop.permute.xlu1 %2865 }
 0x5e7   : > { %v2868_v44 = vunpack.i.h.bf16 %v2866_v37  ;;  %v2867_v2 = vunpack.i.l.bf16 %v2866_v37 }
 0x5e9   : > { %v1802_v46 = vsel %vm809_vm2, %v1754_v43, %v2868_v44  ;;  %v1801_v21 = vsel %vm809_vm2, %v1753_v45, %v2867_v2  ;;  %v3012_v45 = vld [vmem:[%s3120_s19 + $0x28] sm:$0xff] }
 0x5ea   : > { %v1808_v6 = vpack.c.bf16 %v1802_v46, %v1801_v21  ;;  %v2861_v47 = vpop.permute.xlu0 %2860  ;;  %v3013_v21 = vld [vmem:[%s3120_s19 + $0x30] sm:$0xff] }
 0x5eb   : > { %v2863_v52 = vunpack.i.h.bf16 %v2861_v47  ;;  %v2862_v54 = vunpack.i.l.bf16 %v2861_v47  ;;  %v3014_v47 = vld [vmem:[%s3120_s19 + $0x38] sm:$0xff] }
 0x5ed   : > { %v1800_v22 = vsel %vm809_vm2, %v1752_v13, %v2863_v52  ;;  %v1799_v55 = vsel %vm809_vm2, %v1751_v50, %v2862_v54 }
 0x5ee   : > { %v1807_v19 = vpack.c.bf16 %v1800_v22, %v1799_v55 }
 0x5f0   : > { %2801 = vmatprep.mubr.msk.bf16.mxu0 %vm482_vm0, %v1807_v19 }
 0x5f1   : > { %2802 = vmatmul.mubr.msk.bf16.vlgmr.msra.gmra.mrb[28].mxu0 %vm482_vm0, %v1808_v6 }
 0x5f2   : > { %v2871_v57 = vpop.permute.xlu1 %2870 }
 0x5f3   : > { %v2873_v5 = vunpack.i.h.bf16 %v2871_v57  ;;  %v2872_v35 = vunpack.i.l.bf16 %v2871_v57 }
 0x5f5   : > { %v1804_v42 = vsel %vm809_vm2, %v1756_v58, %v2873_v5  ;;  %v1803_v39 = vsel %vm809_vm2, %v1755_v29, %v2872_v35 }
 0x5f6   : > { %v1809_v60 = vpack.c.bf16 %v1804_v42, %v1803_v39  ;;  %v2876_v61 = vpop.permute.xlu1 %2875 }
 0x5f7   : > { %v2878_v48 = vunpack.i.h.bf16 %v2876_v61  ;;  %v2877_v62 = vunpack.i.l.bf16 %v2876_v61 }
 0x5f8   : > { %2805 = vmatprep.mubr.msk.bf16.mxu0 %vm482_vm0, %v1809_v60 }
 0x5f9   : > { %v1806_v17 = vsel %vm809_vm2, %v1758_v38, %v2878_v48  ;;  %v1805_v8 = vsel %vm809_vm2, %v1757_v51, %v2877_v62 }
 0x5fa   : > { %v1810_v12 = vpack.c.bf16 %v1806_v17, %v1805_v8 }
 0x5fc   : > { %2806 = vmatmul.mubr.msk.bf16.gmra.mrb[32].mxu0 %vm482_vm0, %v1810_v12 }
 0x6c4   : > { %v2803_v63 = vpop.f32.mrb[28].mxu0 }
 0x6c5   : > { %v1870_v0 = vpop.f32.mrb[29].mxu0  ;;  %v1879_v1 = vadd.f32 %v2803_v63, %v2557_v25 }
 0x6c6   : > { %v1871_v15 = vadd.f32 %v2557_v25, %v1870_v0  ;;  %v2804_v14 = vpop.f32.mrb[30].mxu0 }
 0x6c7   : > { %v1873_v32 = vpop.f32.mrb[31].mxu0  ;;  %v3594_v18 = vadd.f32 %v3008_v4, %v1879_v1  ;;  %v1882_v49 = vadd.f32 %v2804_v14, %v2557_v25 }
 0x6c8   : > { %v3591_v34 = vadd.f32 %v3007_v3, %v1871_v15  ;;  %v1874_v40 = vadd.f32 %v2557_v25, %v1873_v32 }
 0x6c9   : > { %v3604_v16 = vadd.f32 %v3010_v9, %v1882_v49  ;;  %v1917_v23 = vsel %vm482_vm0, %v3594_v18, 0.0 }
 0x6ca   : > { %v3597_v10 = vadd.f32 %v3009_v28, %v1874_v40  ;;  %v1911_v53 = vsel %vm482_vm0, %v3591_v34, 0.0 }
 0x6cb   : > { %1912 = vadd.xlane.f32.xlu0 %v1911_v53  ;;  %v1920_v37 = vsel %vm482_vm0, %v3604_v16, 0.0 }
 0x6cc   : > { %v1914_v11 = vsel %vm482_vm0, %v3597_v10, 0.0 }
 0x6cd   : > { %1915 = vadd.xlane.f32.xlu1 %v1914_v11 }
 0x6cf   : > { %v2807_v24 = vpop.f32.mrb[32].mxu0  ;;  %1918 = vadd.xlane.f32.xlu0 %v1917_v23 }
 0x6d0   : > { %v1886_v26 = vpop.f32.mrb[33].mxu0  ;;  %v1895_v33 = vadd.f32 %v2807_v24, %v2557_v25 }
 0x6d1   : > { %v1887_v27 = vadd.f32 %v2557_v25, %v1886_v26  ;;  %v2808_v31 = vpop.f32.mrb[34].mxu0  ;;  %v2047_v26 = vld [vmem:[%s3929_s10] sm:$0xff] }
 0x6d2   : > { %v1889_v20 = vpop.f32.mrb[35].mxu0  ;;  %v1898_v44 = vadd.f32 %v2808_v31, %v2557_v25  ;;  %v3619_v6 = vadd.f32 %v3013_v21, %v1895_v33  ;;  %v2049_v33 = vld [vmem:[%s3929_s10 + $0x10] sm:$0xff] }
 0x6d3   : > { %v3611_v43 = vadd.f32 %v3011_v41, %v1887_v27  ;;  %v1890_v2 = vadd.f32 %v2557_v25, %v1889_v20  ;;  %1921 = vadd.xlane.f32.xlu0 %v1920_v37  ;;  %v2048_v27 = vld [vmem:[%s3929_s10 + $0x8] sm:$0xff]  ;;  %v2050_v20 = vld [vmem:[%s3929_s10 + $0x18] sm:$0xff] }
 0x6d4   : > { %v3622_v50 = vadd.f32 %v3014_v47, %v1898_v44  ;;  %v1929_v52 = vsel %vm482_vm0, %v3619_v6, 0.0  ;;  %v2051_v31 = vpack.c.bf16 %v2048_v27, %v2047_v26  ;;  %v2052_v37 = vpack.c.bf16 %v2050_v20, %v2049_v33 }
 0x6d5   : > { %v3614_v7 = vadd.f32 %v3012_v45, %v1890_v2  ;;  %v1923_v46 = vsel %vm482_vm0, %v3611_v43, 0.0 }
 0x6d6   : > { %v1932_v54 = vsel %vm482_vm0, %v3622_v50, 0.0  ;;  %2809 = vmatprep.subr.bf16.mxu1 %v2051_v31 }
 0x6d7   : > { %1924 = vadd.xlane.f32.xlu0 %v1923_v46  ;;  %v1926_v13 = vsel %vm482_vm0, %v3614_v7, 0.0  ;;  %2810 = vmatpush3.bf16.msra.mxu1 %v2051_v31 }
 0x6d8   : > { %1927 = vadd.xlane.f32.xlu1 %v1926_v13  ;;  %2811 = vmatprep.subr.bf16.mxu1 %v2052_v37 }
 0x6db   : > { %1930 = vadd.xlane.f32.xlu0 %v1929_v52  ;;  %2812 = vmatpush3.bf16.msra.mxu1 %v2052_v37 }
 0x6dc   : > { %1933 = vadd.xlane.f32.xlu1 %v1932_v54 }
 0x758   : > { %v1913_v22 = vpop.xlane.xlu0 %1912 }
 0x759   : > { %v1935_v55 = vmul.f32 0.03125, %v1913_v22 }
 0x75a   : > { %v1916_v19 = vpop.xlane.xlu1 %1915 }
 0x75b   : > { %v3631_v30 = vsub.f32 %v3591_v34, %v1935_v55  ;;  %v1936_v56 = vmul.f32 0.03125, %v1916_v19 }
 0x75c   : > { %v1919_v57 = vpop.xlane.xlu0 %1918 }
 0x75d   : > { %v3634_v36 = vsub.f32 %v3597_v10, %v1936_v56  ;;  %v1937_v58 = vmul.f32 0.03125, %v1919_v57  ;;  %v1951_v5 = vmul.f32 %v3631_v30, %v3631_v30 }
 0x75f   : > { %v3639_v35 = vsub.f32 %v3594_v18, %v1937_v58  ;;  %v1959_v29 = vsel %vm482_vm0, %v1951_v5, 0.0  ;;  %v1952_v59 = vmul.f32 %v3634_v36, %v3634_v36 }
 0x760   : > { %1960 = vadd.xlane.f32.xlu0 %v1959_v29  ;;  %v1922_v42 = vpop.xlane.xlu0 %1921  ;;  %v2562_v29 = vld [vmem:[%s3927_s8] ss:$0 sm:$0xff] }
 0x761   : > { %v1938_v39 = vmul.f32 0.03125, %v1922_v42  ;;  %v1962_v60 = vsel %vm482_vm0, %v1952_v59, 0.0  ;;  %v1953_v61 = vmul.f32 %v3639_v35, %v3639_v35 }
 0x762   : > { %1963 = vadd.xlane.f32.xlu1 %v1962_v60 }
 0x763   : > { %v3648_v38 = vsub.f32 %v3604_v16, %v1938_v39  ;;  %v1965_v48 = vsel %vm482_vm0, %v1953_v61, 0.0 }
 0x764   : > { %1966 = vadd.xlane.f32.xlu0 %v1965_v48  ;;  %v1925_v62 = vpop.xlane.xlu0 %1924 }
 0x765   : > { %v1939_v51 = vmul.f32 0.03125, %v1925_v62  ;;  %v1928_v17 = vpop.xlane.xlu1 %1927  ;;  %v1954_v8 = vmul.f32 %v3648_v38, %v3648_v38 }
 0x766   : > { %v1940_v12 = vmul.f32 0.03125, %v1928_v17 }
 0x767   : > { %v3654_v25 = vsub.f32 %v3611_v43, %v1939_v51  ;;  %v1968_v63 = vsel %vm482_vm0, %v1954_v8, 0.0 }
 0x768   : > { %v3658_v0 = vsub.f32 %v3614_v7, %v1940_v12  ;;  %1969 = vadd.xlane.f32.xlu1 %v1968_v63  ;;  %v1931_v1 = vpop.xlane.xlu0 %1930 }
 0x769   : > { %v1941_v15 = vmul.f32 0.03125, %v1931_v1  ;;  %v1934_v14 = vpop.xlane.xlu1 %1933  ;;  %v1955_v32 = vmul.f32 %v3654_v25, %v3654_v25  ;;  %v2563_v1 = vld [vmem:[%s3928_s9] ss:$0 sm:$0xff] }
 0x76a   : > { %v1942_v3 = vmul.f32 0.03125, %v1934_v14  ;;  %v1956_v40 = vmul.f32 %v3658_v0, %v3658_v0 }
 0x76b   : > { %v3665_v4 = vsub.f32 %v3619_v6, %v1941_v15  ;;  %v1971_v49 = vsel %vm482_vm0, %v1955_v32, 0.0 }
 0x76c   : > { %v3669_v28 = vsub.f32 %v3622_v50, %v1942_v3  ;;  %1972 = vadd.xlane.f32.xlu0 %v1971_v49  ;;  %v1974_v53 = vsel %vm482_vm0, %v1956_v40, 0.0 }
 0x76d   : > { %1975 = vadd.xlane.f32.xlu1 %v1974_v53  ;;  %v1957_v11 = vmul.f32 %v3665_v4, %v3665_v4 }
 0x76e   : > { %v1958_v9 = vmul.f32 %v3669_v28, %v3669_v28 }
 0x76f   : > { %v1977_v23 = vsel %vm482_vm0, %v1957_v11, 0.0 }
 0x770   : > { %1978 = vadd.xlane.f32.xlu0 %v1977_v23  ;;  %v1980_v24 = vsel %vm482_vm0, %v1958_v9, 0.0 }
 0x771   : > { %1981 = vadd.xlane.f32.xlu1 %v1980_v24 }
 0x7ed   : > { %v1961_v41 = vpop.xlane.xlu0 %1960 }
 0x7ee   : > { %v1983_v44 = vmul.f32 0.03125, %v1961_v41 }
 0x7ef   : > { %v1964_v2 = vpop.xlane.xlu1 %1963 }
 0x7f0   : > { %v1991_v45 = vadd.f32 1e-05, %v1983_v44  ;;  %v1984_v46 = vmul.f32 0.03125, %v1964_v2 }
 0x7f1   : > { %v1967_v21 = vpop.xlane.xlu0 %1966 }
 0x7f2   : > { %2959 = vrsqrt.f32 %v1991_v45  ;;  %v1992_v47 = vadd.f32 1e-05, %v1984_v46  ;;  %v1985_v13 = vmul.f32 0.03125, %v1967_v21 }
 0x7f4   : > { %2961 = vrsqrt.f32 %v1992_v47  ;;  %v1993_v52 = vadd.f32 1e-05, %v1985_v13 }
 0x7f5   : > { %v1970_v54 = vpop.xlane.xlu1 %1969 }
 0x7f6   : > { %2963 = vrsqrt.f32 %v1993_v52  ;;  %v1986_v22 = vmul.f32 0.03125, %v1970_v54  ;;  %v2358_v52 = vld [vmem:[%s3931_s12 + $0x8] sm:$0xff]  ;;  %v2359_v54 = vld [vmem:[%s3931_s12 + $0x10] sm:$0xff] }
 0x7f8   : > { %v1994_v55 = vadd.f32 1e-05, %v1986_v22  ;;  %v2360_v22 = vld [vmem:[%s3931_s12 + $0x18] sm:$0xff] }
 0x7f9   : > { %v1973_v19 = vpop.xlane.xlu0 %1972 }
 0x7fa   : > { %2965 = vrsqrt.f32 %v1994_v55  ;;  %v1987_v56 = vmul.f32 0.03125, %v1973_v19  ;;  %v1976_v57 = vpop.xlane.xlu1 %1975  ;;  %v2374_v55 = vpack.c.bf16 %v2360_v22, %v2359_v54  ;;  %v2361_v19 = vld [vmem:[%s3931_s12 + $0x20] sm:$0xff] }
 0x7fb   : > { %v1988_v58 = vmul.f32 0.03125, %v1976_v57 }
 0x7fc   : > { %v2960_v5 = vpop.eup %2959  ;;  %v1995_v59 = vadd.f32 1e-05, %v1987_v56  ;;  %v2362_v56 = vld [vmem:[%s3931_s12 + $0x28] sm:$0xff] }
 0x7fd   : > { %v2007_v42 = vmul.f32 %v2960_v5, %v3631_v30  ;;  %v1996_v39 = vadd.f32 1e-05, %v1988_v58  ;;  %v1979_v60 = vpop.xlane.xlu0 %1978  ;;  %v2375_v57 = vpack.c.bf16 %v2362_v56, %v2361_v19  ;;  %v2363_v58 = vld [vmem:[%s3931_s12 + $0x30] sm:$0xff]  ;;  %v2364_v5 = vld [vmem:[%s3931_s12 + $0x38] sm:$0xff] }
 0x7fe   : > { %v2962_v61 = vpop.eup %2961  ;;  %2967 = vrsqrt.f32 %v1995_v59  ;;  %v1989_v48 = vmul.f32 0.03125, %v1979_v60  ;;  %v1982_v62 = vpop.xlane.xlu1 %1981  ;;  %v2365_v59 = vld [vmem:[%s3931_s12 + $0x40] sm:$0xff]  ;;  %v2367_v60 = vld [vmem:[%s3931_s12 + $0x50] sm:$0xff] }
 0x7ff   : > { %v2008_v51 = vmul.f32 %v2962_v61, %v3634_v36  ;;  %2969 = vrsqrt.f32 %v1996_v39  ;;  %v1990_v17 = vmul.f32 0.03125, %v1982_v62  ;;  %v2021_v8 = vmul.f32 %v2562_v29, %v2007_v42  ;;  %v2366_v42 = vld [vmem:[%s3931_s12 + $0x48] sm:$0xff]  ;;  %v2368_v61 = vld [vmem:[%s3931_s12 + $0x58] sm:$0xff]  ;;  %v2369_v62 = vld [vmem:[%s3931_s12 + $0x60] sm:$0xff] }
 0x800   : > { %v2964_v12 = vpop.eup %2963  ;;  %v1997_v63 = vadd.f32 1e-05, %v1989_v48  ;;  %v2377_v39 = vpack.c.bf16 %v2366_v42, %v2365_v59  ;;  %v2378_v48 = vpack.c.bf16 %v2368_v61, %v2367_v60 }
 0x801   : > { %v2009_v15 = vmul.f32 %v2964_v12, %v3639_v35  ;;  %v1998_v30 = vadd.f32 1e-05, %v1990_v17  ;;  %v2022_v14 = vmul.f32 %v2562_v29, %v2008_v51  ;;  %v2035_v32 = vadd.f32 %v2563_v1, %v2021_v8  ;;  %v2370_v51 = vld [vmem:[%s3931_s12 + $0x68] sm:$0xff]  ;;  %v2371_v8 = vld [vmem:[%s3931_s12 + $0x70] sm:$0xff]  ;;  %v2372_v12 = vld [vmem:[%s3931_s12 + $0x78] sm:$0xff] }
 0x802   : > { %2971 = vrsqrt.f32 %v1997_v63  ;;  %v2379_v17 = vpack.c.bf16 %v2370_v51, %v2369_v62  ;;  %v2380_v63 = vpack.c.bf16 %v2372_v12, %v2371_v8 }
 0x803   : > { %2973 = vrsqrt.f32 %v1998_v30  ;;  %v2036_v3 = vadd.f32 %v2563_v1, %v2022_v14  ;;  %v2023_v49 = vmul.f32 %v2562_v29, %v2009_v15 }
 0x804   : > { %v2966_v40 = vpop.eup %2965 }
 0x805   : > { %v2010_v36 = vmul.f32 %v2966_v40, %v3648_v38  ;;  %v2043_v53 = vpack.c.bf16 %v2036_v3, %v2035_v32  ;;  %v2037_v26 = vadd.f32 %v2563_v1, %v2023_v49 }
 0x807   : > { %v2024_v11 = vmul.f32 %v2562_v29, %v2010_v36  ;;  %2813 = vmatprep.mubr.msk.bf16.mxu1 %vm482_vm0, %v2043_v53 }
 0x808   : > { %v2968_v9 = vpop.eup %2967 }
 0x809   : > { %v2970_v23 = vpop.eup %2969  ;;  %v2011_v24 = vmul.f32 %v2968_v9, %v3654_v25  ;;  %v2038_v35 = vadd.f32 %v2563_v1, %v2024_v11 }
 0x80a   : > { %v2012_v27 = vmul.f32 %v2970_v23, %v3658_v0 }
 0x80b   : > { %v2044_v31 = vpack.c.bf16 %v2038_v35, %v2037_v26  ;;  %v2025_v33 = vmul.f32 %v2562_v29, %v2011_v24 }
 0x80c   : > { %v2972_v20 = vpop.eup %2971  ;;  %v2026_v37 = vmul.f32 %v2562_v29, %v2012_v27 }
 0x80d   : > { %v2974_v41 = vpop.eup %2973  ;;  %v2013_v44 = vmul.f32 %v2972_v20, %v3665_v4  ;;  %2814 = vmatmul.mubr.msk.bf16.vlgmr.msra.gmra.mrb[44].mxu1 %vm482_vm0, %v2044_v31  ;;  %v2039_v38 = vadd.f32 %v2563_v1, %v2025_v33  ;;  %v2357_v4 = vld [vmem:[%s3931_s12] sm:$0xff] }
 0x80e   : > { %v2014_v2 = vmul.f32 %v2974_v41, %v3669_v28  ;;  %v2040_v45 = vadd.f32 %v2563_v1, %v2026_v37  ;;  %v2373_v28 = vpack.c.bf16 %v2358_v52, %v2357_v4 }
 0x80f   : > { %v2027_v46 = vmul.f32 %v2562_v29, %v2013_v44 }
 0x810   : > { %v2045_v21 = vpack.c.bf16 %v2040_v45, %v2039_v38  ;;  %v2028_v25 = vmul.f32 %v2562_v29, %v2014_v2  ;;  %2821 = vmatprep.subr.bf16.mxu0 %v2373_v28  ;;  %v2376_v29 = vpack.c.bf16 %v2364_v5, %v2363_v58 }
 0x811   : > { %v2041_v47 = vadd.f32 %v2563_v1, %v2027_v46  ;;  %2822 = vmatpush3.bf16.msra.mxu0 %v2373_v28 }
 0x812   : > { %2817 = vmatprep.mubr.msk.bf16.mxu1 %vm482_vm0, %v2045_v21  ;;  %v2042_v0 = vadd.f32 %v2563_v1, %v2028_v25  ;;  %2823 = vmatprep.subr.bf16.mxu0 %v2374_v55  ;;  %v2564_v1 = vld [vmem:[%s3930_s11] ss:$0 sm:$0xff] }
 0x814   : > { %v2046_v13 = vpack.c.bf16 %v2042_v0, %v2041_v47 }
 0x815   : > { %2824 = vmatpush3.bf16.msra.mxu0 %v2374_v55 }
 0x816   : > { %2818 = vmatmul.mubr.msk.bf16.gmra.mrb[48].mxu1 %vm482_vm0, %v2046_v13  ;;  %2825 = vmatprep.subr.bf16.mxu0 %v2375_v57 }
 0x819   : > { %2826 = vmatpush3.bf16.msra.mxu0 %v2375_v57 }
 0x81a   : > { %2827 = vmatprep.subr.bf16.mxu0 %v2376_v29 }
 0x81d   : > { %2828 = vmatpush3.bf16.msra.mxu0 %v2376_v29 }
 0x81e   : > { %2829 = vmatprep.subr.bf16.mxu0 %v2377_v39 }
 0x821   : > { %2830 = vmatpush3.bf16.msra.mxu0 %v2377_v39 }
 0x822   : > { %2831 = vmatprep.subr.bf16.mxu0 %v2378_v48 }
 0x825   : > { %2832 = vmatpush3.bf16.msra.mxu0 %v2378_v48 }
 0x826   : > { %2833 = vmatprep.subr.bf16.mxu0 %v2379_v17 }
 0x829   : > { %2834 = vmatpush3.bf16.msra.mxu0 %v2379_v17 }
 0x82a   : > { %2835 = vmatprep.subr.bf16.mxu0 %v2380_v63 }
 0x82d   : > { %2836 = vmatpush3.bf16.msra.mxu0 %v2380_v63 }
 0x8e0   : > { %v2815_v15 = vpop.f32.mrb[44].mxu1 }
 0x8e1   : > { %v2115_v30 = vadd.f32 %v2815_v15, %v2564_v1  ;;  %v2106_v14 = vpop.f32.mrb[45].mxu1 }
 0x8e2   : > { %v3759_v32 = vadd.f32 %v2564_v1, %v2106_v14  ;;  %v2816_v3 = vpop.f32.mrb[46].mxu1 }
 0x8e3   : > { %v3761_v40 = vmul.f32 0.70710677, %v2115_v30  ;;  %v3763_v49 = vadd.f32 %v2816_v3, %v2564_v1  ;;  %v2109_v36 = vpop.f32.mrb[47].mxu1  ;;  %v3800_v39 = vmul.f32 0.5, %v2115_v30 }
 0x8e4   : > { %v3766_v53 = vmul.f32 0.70710677, %v3759_v32  ;;  %v3768_v11 = vadd.f32 %v2564_v1, %v2109_v36 }
 0x8e5   : > { %v2147_v9 = vand.u32 2147483647, %v3761_v40  ;;  %v3772_v23 = vmul.f32 0.70710677, %v3763_v49  ;;  %vm2307_vm3 = vcmp.ge.f32.partialorder %v3761_v40, 0.0 }
 0x8e6   : > { %v2145_v24 = vand.u32 2147483647, %v3766_v53  ;;  %v3776_v26 = vmul.f32 0.70710677, %v3768_v11  ;;  %vm2305_vm4 = vcmp.ge.f32.partialorder %v3766_v53, 0.0 }
 0x8e7   : > { %v2155_v35 = vmul.f32 0.3275911, %v2147_v9  ;;  %v2148_v27 = vand.u32 2147483647, %v3772_v23  ;;  %v2259_v28 = vsub.f32 0.0, %v2147_v9  ;;  %vm2308_vm5 = vcmp.ge.f32.partialorder %v3772_v23, 0.0 }
 0x8e8   : > { %v2153_v31 = vmul.f32 0.3275911, %v2145_v24  ;;  %v2146_v33 = vand.u32 2147483647, %v3776_v26  ;;  %v2257_v55 = vsub.f32 0.0, %v2145_v24  ;;  %vm2306_vm6 = vcmp.ge.f32.partialorder %v3776_v26, 0.0 }
 0x8e9   : > { %v2163_v20 = vadd.f32 1.0, %v2155_v35  ;;  %v2156_v37 = vmul.f32 0.3275911, %v2148_v27  ;;  %v2819_v41 = vpop.f32.mrb[48].mxu1  ;;  %v2260_v57 = vsub.f32 0.0, %v2148_v27  ;;  %v2267_v42 = vmul.f32 %v2259_v28, %v2147_v9 }
 0x8ea   : > { %v2161_v44 = vadd.f32 1.0, %v2153_v31  ;;  %v2154_v38 = vmul.f32 0.3275911, %v2146_v33  ;;  %v2122_v2 = vpop.f32.mrb[49].mxu1  ;;  %v3780_v47 = vadd.f32 %v2819_v41, %v2564_v1  ;;  %v2258_v58 = vsub.f32 0.0, %v2146_v33 }
 0x8eb   : > { %2975 = vrcp.f32 %v2163_v20  ;;  %v2164_v45 = vadd.f32 1.0, %v2156_v37  ;;  %v2820_v46 = vpop.f32.mrb[50].mxu1  ;;  %v3782_v0 = vadd.f32 %v2564_v1, %v2122_v2  ;;  %v2265_v62 = vmul.f32 %v2257_v55, %v2145_v24 }
 0x8ec   : > { %2977 = vrcp.f32 %v2161_v44  ;;  %v2125_v21 = vpop.f32.mrb[51].mxu1  ;;  %v2162_v25 = vadd.f32 1.0, %v2154_v38  ;;  %v3784_v13 = vadd.f32 %v2820_v46, %v2564_v1  ;;  %v3787_v4 = vmul.f32 0.70710677, %v3780_v47 }
 0x8ed   : > { %2979 = vrcp.f32 %v2164_v45  ;;  %v3790_v52 = vmul.f32 0.70710677, %v3782_v0  ;;  %v3795_v22 = vadd.f32 %v2564_v1, %v2125_v21  ;;  %v2268_v1 = vmul.f32 %v2260_v57, %v2148_v27 }
 0x8ee   : > { %v3793_v54 = vmul.f32 0.70710677, %v3784_v13  ;;  %2981 = vrcp.f32 %v2162_v25  ;;  %v2151_v19 = vand.u32 2147483647, %v3787_v4  ;;  %v2266_v15 = vmul.f32 %v2258_v58, %v2146_v33 }
 0x8ef   : > { %v2149_v56 = vand.u32 2147483647, %v3790_v52  ;;  %v3803_v61 = vmul.f32 0.70710677, %v3795_v22  ;;  %v2277_v35 = vmul.f32 1.442695, %v2267_v42 }
 0x8f0   : > { %v2152_v5 = vand.u32 2147483647, %v3793_v54  ;;  %v2159_v29 = vmul.f32 0.3275911, %v2151_v19  ;;  %v2263_v17 = vsub.f32 0.0, %v2151_v19  ;;  %vm2311_vm7 = vcmp.ge.f32.partialorder %v3787_v4, 0.0 }
 0x8f1   : > { %v2157_v59 = vmul.f32 0.3275911, %v2149_v56  ;;  %v2150_v14 = vand.u32 2147483647, %v3803_v61  ;;  %v2261_v3 = vsub.f32 0.0, %v2149_v56  ;;  %vm2312_vm8 = vcmp.ge.f32.partialorder %v3793_v54, 0.0 }
 0x8f2   : > { %v2160_v60 = vmul.f32 0.3275911, %v2152_v5  ;;  %v2167_v51 = vadd.f32 1.0, %v2159_v29  ;;  %v2273_v37 = vmul.f32 1.442695, %v2265_v62  ;;  %v2271_v41 = vmul.f32 %v2263_v17, %v2151_v19 }
 0x8f3   : > { %v2165_v8 = vadd.f32 1.0, %v2157_v59  ;;  %v2158_v24 = vmul.f32 0.3275911, %v2150_v14  ;;  %v2264_v44 = vsub.f32 0.0, %v2152_v5  ;;  %v2279_v38 = vmul.f32 1.442695, %v2268_v1 }
 0x8f4   : > { %2983 = vrcp.f32 %v2167_v51  ;;  %v2168_v36 = vadd.f32 1.0, %v2160_v60  ;;  %v2275_v21 = vmul.f32 1.442695, %v2266_v15  ;;  %v2269_v25 = vmul.f32 %v2261_v3, %v2149_v56 }
 0x8f5   : > { %v3805_v48 = vpop.eup %2975  ;;  %2985 = vrcp.f32 %v2165_v8  ;;  %v2166_v2 = vadd.f32 1.0, %v2158_v24  ;;  %v2285_v58 = vmul.f32 1.442695, %v2271_v41  ;;  %v2272_v29 = vmul.f32 %v2264_v44, %v2152_v5 }
 0x8f6   : > { %v3807_v12 = vpop.eup %2977  ;;  %v2187_v63 = vmul.f32 1.0614054, %v3805_v48  ;;  %2987 = vrcp.f32 %v2168_v36  ;;  %v2281_v56 = vmul.f32 1.442695, %v2269_v25  ;;  %v2262_v51 = vsub.f32 0.0, %v2150_v14 }
 0x8f7   : > { %v2185_v30 = vmul.f32 1.0614054, %v3807_v12  ;;  %v3812_v31 = vpop.eup %2979  ;;  %2989 = vpow2.f32 %v2277_v35  ;;  %v3827_v15 = vmul.f32 0.5, %v3759_v32  ;;  %vm2309_vm9 = vcmp.ge.f32.partialorder %v3790_v52, 0.0 }
 0x8f8   : > { %v2571_v9 = vadd.f32 -1.4531521, %v2187_v63  ;;  %v2188_v33 = vmul.f32 1.0614054, %v3812_v31  ;;  %v3816_v45 = vpop.eup %2981  ;;  %2991 = vrcp.f32 %v2166_v2  ;;  %v2270_v41 = vmul.f32 %v2262_v51, %v2150_v14 }
 0x8f9   : > { %v2569_v20 = vadd.f32 -1.4531521, %v2185_v30  ;;  %v2186_v57 = vmul.f32 1.0614054, %v3816_v45  ;;  %2993 = vpow2.f32 %v2273_v37  ;;  %v2287_v30 = vmul.f32 1.442695, %v2272_v29 }
 0x8fa   : > { %v2203_v27 = vmul.f32 %v3805_v48, %v2571_v9  ;;  %v2572_v55 = vadd.f32 -1.4531521, %v2188_v33  ;;  %2995 = vpow2.f32 %v2279_v38  ;;  %vm2310_vm10 = vcmp.ge.f32.partialorder %v3803_v61, 0.0 }
 0x8fb   : > { %v2201_v46 = vmul.f32 %v3807_v12, %v2569_v20  ;;  %v2570_v60 = vadd.f32 -1.4531521, %v2186_v57  ;;  %2997 = vpow2.f32 %v2275_v21 }
 0x8fc   : > { %v2211_v28 = vadd.f32 1.4214138, %v2203_v27  ;;  %v2204_v42 = vmul.f32 %v3812_v31, %v2572_v55  ;;  %2999 = vpow2.f32 %v2285_v58 }
 0x8fd   : > { %v2209_v19 = vadd.f32 1.4214138, %v2201_v46  ;;  %v2202_v63 = vmul.f32 %v3816_v45, %v2570_v60  ;;  %3001 = vpow2.f32 %v2281_v56  ;;  %v3841_v46 = vmul.f32 0.5, %v3763_v49 }
 0x8fe   : > { %v2219_v59 = vmul.f32 %v3805_v48, %v2211_v28  ;;  %v2212_v8 = vadd.f32 1.4214138, %v2204_v42  ;;  %v3824_v1 = vpop.eup %2983  ;;  %3003 = vpow2.f32 %v2287_v30 }
 0x8ff   : > { %v2217_v62 = vmul.f32 %v3807_v12, %v2209_v19  ;;  %v3829_v3 = vpop.eup %2985  ;;  %v2210_v35 = vadd.f32 1.4214138, %v2202_v63  ;;  %v2191_v24 = vmul.f32 1.0614054, %v3824_v1 }
 0x900   : > { %v2579_v17 = vadd.f32 -0.28449672, %v2219_v59  ;;  %v2220_v9 = vmul.f32 %v3812_v31, %v2212_v8  ;;  %v2189_v37 = vmul.f32 1.0614054, %v3829_v3  ;;  %v3837_v38 = vpop.eup %2987  ;;  %v2283_v59 = vmul.f32 1.442695, %v2270_v41 }
 0x901   : > { %v2577_v5 = vadd.f32 -0.28449672, %v2217_v62  ;;  %v2218_v27 = vmul.f32 %v3816_v45, %v2210_v35  ;;  %v2575_v33 = vadd.f32 -1.4531521, %v2191_v24  ;;  %v2990_v25 = vpop.eup %2989  ;;  %v2192_v49 = vmul.f32 1.0614054, %v3837_v38 }
 0x902   : > { %v2235_v36 = vmul.f32 %v3805_v48, %v2579_v17  ;;  %v2580_v32 = vadd.f32 -0.28449672, %v2220_v9  ;;  %v2573_v21 = vadd.f32 -1.4531521, %v2189_v37  ;;  %v3847_v19 = vpop.eup %2991  ;;  %3005 = vpow2.f32 %v2283_v59 }
 0x903   : > { %v2233_v20 = vmul.f32 %v3807_v12, %v2577_v5  ;;  %v2578_v55 = vadd.f32 -0.28449672, %v2218_v27  ;;  %v2207_v57 = vmul.f32 %v3824_v1, %v2575_v33  ;;  %v2994_v42 = vpop.eup %2993  ;;  %v2576_v63 = vadd.f32 -1.4531521, %v2192_v49 }
 0x904   : > { %v2243_v44 = vadd.f32 0.2548296, %v2235_v36  ;;  %v2236_v14 = vmul.f32 %v3812_v31, %v2580_v32  ;;  %v2205_v29 = vmul.f32 %v3829_v3, %v2573_v21  ;;  %v2996_v51 = vpop.eup %2995  ;;  %v2190_v5 = vmul.f32 1.0614054, %v3847_v19 }
 0x905   : > { %v2241_v2 = vadd.f32 0.2548296, %v2233_v20  ;;  %v2215_v56 = vadd.f32 1.4214138, %v2207_v57  ;;  %v2208_v41 = vmul.f32 %v3837_v38, %v2576_v63  ;;  %v2330_v59 = vmul.f32 0.5, %v3768_v11 }
 0x906   : > { %v2251_v28 = vmul.f32 %v3805_v48, %v2243_v44  ;;  %v2244_v62 = vadd.f32 0.2548296, %v2236_v14  ;;  %v2234_v48 = vmul.f32 %v3816_v45, %v2578_v55  ;;  %v2213_v8 = vadd.f32 1.4214138, %v2205_v29 }
 0x907   : > { %v2249_v58 = vmul.f32 %v3807_v12, %v2241_v2  ;;  %v2998_v12 = vpop.eup %2997  ;;  %v2223_v35 = vmul.f32 %v3824_v1, %v2215_v56  ;;  %v2574_v44 = vadd.f32 -1.4531521, %v2190_v5  ;;  %v2216_v14 = vadd.f32 1.4214138, %v2208_v41 }
 0x908   : > { %v2291_v60 = vmul.f32 %v2990_v25, %v2251_v28  ;;  %v2252_v36 = vmul.f32 %v3812_v31, %v2244_v62  ;;  %v2242_v9 = vadd.f32 0.2548296, %v2234_v48  ;;  %v3000_v24 = vpop.eup %2999  ;;  %v2221_v37 = vmul.f32 %v3829_v3, %v2213_v8 }
 0x909   : > { %v2289_v17 = vmul.f32 %v2994_v42, %v2249_v58  ;;  %v2583_v2 = vadd.f32 -0.28449672, %v2223_v35  ;;  %v3002_v21 = vpop.eup %3001  ;;  %v2206_v31 = vmul.f32 %v3847_v19, %v2574_v44 }
 0x90a   : > { %v2299_v30 = vsub.f32 1.0, %v2291_v60  ;;  %v2292_v27 = vmul.f32 %v2996_v51, %v2252_v36  ;;  %v2250_v33 = vmul.f32 %v3816_v45, %v2242_v9  ;;  %v2581_v28 = vadd.f32 -0.28449672, %v2221_v37  ;;  %v3004_v49 = vpop.eup %3003 }
 0x90b   : > { %v2297_v20 = vsub.f32 1.0, %v2289_v17  ;;  %v2239_v29 = vmul.f32 %v3824_v1, %v2583_v2  ;;  %v2224_v60 = vmul.f32 %v3837_v38, %v2216_v14  ;;  %v2214_v8 = vadd.f32 1.4214138, %v2206_v31 }
 0x90c   : > { %v2315_v32 = vsub.f32 0.0, %v2299_v30  ;;  %v2300_v57 = vsub.f32 1.0, %v2292_v27  ;;  %v2290_v58 = vmul.f32 %v2998_v12, %v2250_v33  ;;  %v2237_v45 = vmul.f32 %v3829_v3, %v2581_v28 }
 0x90d   : > { %v2313_v25 = vsub.f32 0.0, %v2297_v20  ;;  %v2247_v51 = vadd.f32 0.2548296, %v2239_v29  ;;  %v2584_v17 = vadd.f32 -0.28449672, %v2224_v60  ;;  %v2222_v35 = vmul.f32 %v3847_v19, %v2214_v8 }
 0x90e   : > { %v2323_v55 = vsel %vm2307_vm3, %v2299_v30, %v2315_v32  ;;  %v2316_v48 = vsub.f32 0.0, %v2300_v57  ;;  %v2298_v56 = vsub.f32 1.0, %v2290_v58  ;;  %v2245_v40 = vadd.f32 0.2548296, %v2237_v45 }
 0x90f   : > { %v2321_v42 = vsel %vm2305_vm4, %v2297_v20, %v2313_v25  ;;  %v2339_v62 = vadd.f32 1.0, %v2323_v55  ;;  %v2255_v12 = vmul.f32 %v3824_v1, %v2247_v51  ;;  %v2240_v9 = vmul.f32 %v3837_v38, %v2584_v17 }
 0x910   : > { %v2337_v63 = vadd.f32 1.0, %v2321_v42  ;;  %v2324_v5 = vsel %vm2308_vm5, %v2300_v57, %v2316_v48  ;;  %v2314_v53 = vsub.f32 0.0, %v2298_v56  ;;  %v2253_v36 = vmul.f32 %v3829_v3, %v2245_v40 }
 0x911   : > { %v2340_v30 = vadd.f32 1.0, %v2324_v5  ;;  %v2347_v20 = vmul.f32 %v2339_v62, %v3800_v39  ;;  %v2295_v41 = vmul.f32 %v3000_v24, %v2255_v12  ;;  %v2248_v1 = vadd.f32 0.2548296, %v2240_v9  ;;  %v3006_v24 = vpop.eup %3005 }
 0x912   : > { %v2322_v37 = vsel %vm2306_vm6, %v2298_v56, %v2314_v53  ;;  %v2293_v32 = vmul.f32 %v3002_v21, %v2253_v36  ;;  %v2582_v33 = vadd.f32 -0.28449672, %v2222_v35  ;;  %v2345_v3 = vmul.f32 %v2337_v63, %v3827_v15 }
 0x913   : > { %v2348_v23 = vmul.f32 %v2340_v30, %v3841_v46  ;;  %v2338_v44 = vadd.f32 1.0, %v2322_v37  ;;  %v2303_v27 = vsub.f32 1.0, %v2295_v41  ;;  %v2256_v28 = vmul.f32 %v3837_v38, %v2248_v1 }
 0x914   : > { %v2301_v14 = vsub.f32 1.0, %v2293_v32  ;;  %v2238_v26 = vmul.f32 %v3847_v19, %v2582_v33  ;;  %v2335_v42 = vmul.f32 0.5, %v3780_v47  ;;  %v2336_v45 = vmul.f32 0.5, %v3784_v13  ;;  %v2585_v13 = vld [vmem:[%s3932_s13] ss:$0 sm:$0xff] }
 0x915   : > { %v2354_v2 = vpack.c.bf16 %v2348_v23, %v2347_v20  ;;  %v2346_v25 = vmul.f32 %v2338_v44, %v2330_v59  ;;  %v2319_v39 = vsub.f32 0.0, %v2303_v27  ;;  %v2296_v31 = vmul.f32 %v3004_v49, %v2256_v28 }
 0x916   : > { %v2246_v46 = vadd.f32 0.2548296, %v2238_v26  ;;  %v2317_v57 = vsub.f32 0.0, %v2301_v14  ;;  %v2333_v17 = vmul.f32 0.5, %v3782_v0  ;;  %v2334_v47 = vmul.f32 0.5, %v3795_v22 }
 0x917   : > { %v2353_v11 = vpack.c.bf16 %v2346_v25, %v2345_v3  ;;  %v2327_v21 = vsel %vm2311_vm7, %v2303_v27, %v2319_v39  ;;  %v2304_v55 = vsub.f32 1.0, %v2296_v31 }
 0x918   : > { %v2254_v15 = vmul.f32 %v3847_v19, %v2246_v46  ;;  %v2343_v29 = vadd.f32 1.0, %v2327_v21  ;;  %v2325_v4 = vsel %vm2309_vm9, %v2301_v14, %v2317_v57 }
 0x919   : > { %2837 = vmatprep.mubr.bf16.mxu0 %v2353_v11  ;;  %v2320_v58 = vsub.f32 0.0, %v2304_v55  ;;  %v2341_v19 = vadd.f32 1.0, %v2325_v4 }
 0x91a   : > { %2838 = vmatmul.mubr.bf16.vlgmr.msra.gmra.mrb[36].mxu0 %v2354_v2  ;;  %v2294_v38 = vmul.f32 %v3006_v24, %v2254_v15  ;;  %v2351_v48 = vmul.f32 %v2343_v29, %v2335_v42 }
 0x91b   : > { %v2328_v49 = vsel %vm2312_vm8, %v2304_v55, %v2320_v58  ;;  %v2349_v8 = vmul.f32 %v2341_v19, %v2333_v17 }
 0x91c   : > { %v2344_v60 = vadd.f32 1.0, %v2328_v49  ;;  %v2302_v62 = vsub.f32 1.0, %v2294_v38 }
 0x91e   : > { %v2352_v56 = vmul.f32 %v2344_v60, %v2336_v45  ;;  %v2318_v51 = vsub.f32 0.0, %v2302_v62 }
 0x920   : > { %v2326_v40 = vsel %vm2310_vm10, %v2302_v62, %v2318_v51  ;;  %v2356_v54 = vpack.c.bf16 %v2352_v56, %v2351_v48 }
 0x921   : > { %v2342_v52 = vadd.f32 1.0, %v2326_v40 }
 0x923   : > { %v2350_v63 = vmul.f32 %v2342_v52, %v2334_v47 }
 0x925   : > { %v2355_v5 = vpack.c.bf16 %v2350_v63, %v2349_v8 }
 0x927   : > { %2841 = vmatprep.mubr.bf16.mxu0 %v2355_v5 }
 0x928   : > { %2842 = vmatmul.mubr.bf16.gmra.mrb[40].mxu0 %v2356_v54 }
 0x9ed   : > { %v2839_v53 = vpop.f32.mrb[36].mxu0 }
 0x9ee   : > { %v2431_v12 = vadd.f32 %v2839_v53, %v2585_v13  ;;  %v2422_v30 = vpop.f32.mrb[37].mxu0 }
 0x9ef   : > { %v2423_v0 = vadd.f32 %v2585_v13, %v2422_v30  ;;  %v2840_v22 = vpop.f32.mrb[38].mxu0 }
 0x9f0   : > { %v2455_v61 = vadd.f32 %v2431_v12, %v3594_v18  ;;  %v2434_v36 = vadd.f32 %v2840_v22, %v2585_v13  ;;  %v2425_v9 = vpop.f32.mrb[39].mxu0 }
 0x9f1   : > { %v2453_v35 = vadd.f32 %v2423_v0, %v3591_v34  ;;  %v2426_v20 = vadd.f32 %v2585_v13, %v2425_v9 }
 0x9f2   : > { %2463 = vst.msk [vmem:[%s469_s27 + $0x10] sm:$0xff] %vm482_vm0, %v2455_v61  ;;  %v2456_v37 = vadd.f32 %v2434_v36, %v3604_v16 }
 0x9f3   : > { %2461 = vst.msk [vmem:[%s469_s27] sm:$0xff] %vm482_vm0, %v2453_v35  ;;  %v2454_v59 = vadd.f32 %v2426_v20, %v3597_v10 }
 0x9f4   : > { %2464 = vst.msk [vmem:[%s469_s27 + $0x18] sm:$0xff] %vm482_vm0, %v2456_v37 }
 0x9f5   : > { %2462 = vst.msk [vmem:[%s469_s27 + $0x8] sm:$0xff] %vm482_vm0, %v2454_v59 }
 0x9fb   : > { %v2843_v41 = vpop.f32.mrb[40].mxu0 }
 0x9fc   : > { %v2447_v23 = vadd.f32 %v2843_v41, %v2585_v13  ;;  %v2438_v18 = vpop.f32.mrb[41].mxu0 }
 0x9fd   : > { %v2439_v44 = vadd.f32 %v2585_v13, %v2438_v18  ;;  %v2844_v32 = vpop.f32.mrb[42].mxu0 }
 0x9fe   : > { %v2459_v34 = vadd.f32 %v2447_v23, %v3619_v6  ;;  %v2450_v1 = vadd.f32 %v2844_v32, %v2585_v13  ;;  %v2441_v27 = vpop.f32.mrb[43].mxu0 }
 0x9ff   : > { %v2457_v33 = vadd.f32 %v2439_v44, %v3611_v43  ;;  %v2442_v16 = vadd.f32 %v2585_v13, %v2441_v27 }
 0xa00   : > { %2467 = vst.msk [vmem:[%s469_s27 + $0x30] sm:$0xff] %vm482_vm0, %v2459_v34  ;;  %v2460_v10 = vadd.f32 %v2450_v1, %v3622_v50 }
 0xa01   : > { %2465 = vst.msk [vmem:[%s469_s27 + $0x20] sm:$0xff] %vm482_vm0, %v2457_v33  ;;  %v2458_v3 = vadd.f32 %v2442_v16, %v3614_v7 }
 0xa02   : > { %2468 = vst.msk [vmem:[%s469_s27 + $0x38] sm:$0xff] %vm482_vm0, %v2460_v10 }
 0xa03   : > { %2466 = vst.msk [vmem:[%s469_s27 + $0x28] sm:$0xff] %vm482_vm0, %v2458_v3 }
 0xa04 PF: > { %s24_s29 = sadd.s32 1, %s3021_s29  }
 0xa05   : > { %p21_p4 = scmp.ge.s32.totalorder %s24_s29, 4  }
 0xa07   :  { %23 = sbr.rel (!%p21_p4) target bundleno = 1 (0x1), region = 106 }

// kernel: _lambda_.13
= control target key start
LH: loop header
LB: loop body
LE: loop exit
PB: predicated region body
PF: predicated region fallthrough
CT: control target
= control target key end

     0   :  { %14 = vsyncpa [#allocation3], 0  ;;  %s1121_s0 = inlined_call_operand.vmem [shape: f32[2,16,64], index: 0, kind: input, shape index: {}]   ;;  %s1122_s1 = inlined_call_operand.vmem [shape: f32[1,64], index: 1, kind: input, shape index: {}]   ;;  %s1123_s2 = inlined_call_operand.vmem [shape: f32[1,64], index: 2, kind: input, shape index: {}]   ;;  %s1124_s3 = inlined_call_operand.vmem [shape: f32[64,5], index: 3, kind: input, shape index: {}]   ;;  %s1125_s4 = inlined_call_operand.vmem [shape: f32[1,5], index: 4, kind: input, shape index: {}, may-alias: {4,8}]   ;;  %s1126_s5 = inlined_call_operand.vmem [shape: f32[64,128], index: 5, kind: input, shape index: {}]   ;;  %s1127_s6 = inlined_call_operand.vmem [shape: f32[1,128], index: 6, kind: input, shape index: {}]   ;;  %s1128_s7 = inlined_call_operand.vmem [shape: f32[128,5], index: 7, kind: input, shape index: {}]   ;;  %s1129_s8 = inlined_call_operand.vmem [shape: f32[1,5], index: 8, kind: input, shape index: {}, may-alias: {4,8}]   ;;  %s1130_s9 = inlined_call_operand.hbm [shape: f32[2,1,5], index: 9, kind: output, shape index: {}]  }
   0x1   :  { %16 = vsyncpa [#allocation3 + $0x1], 0  ;;  %s880_s30 = smov 0   ;;  %s882_s10 = smov 0  }
   0x2   :  { %s884_s11 = smov 0   ;;  %s886_s12 = smov 0  }
   0x3 LB: > { %s901_s13 = sadd.s32 4294967295, %s825_s12   ;;  %s638_s14 = sadd.s32 4294967294, %s825_s12   ;;  %s825_s12 = sphi %s886_s12, %s1136_s12   ;;  %s821_s11 = sphi %s884_s11, %s1135_s11   ;;  %s817_s10 = sphi %s882_s10, %s1134_s10   ;;  %s813_s30 = sphi %s880_s30, %s1133_s30  }
   0x4   : > { %s905_s15 = sadd.s32 1, %s825_s12   ;;  %s223_s16 = sadd.s32 1, %s821_s11 }
   0x5   : > { %s220_s17 = ssub.s32 %s825_s12, %s905_s15  ;;  %p233_p0 = scmp.ne.s32.totalorder %s821_s11, %s817_s10 }
   0x6   : > { %p221_p1 = scmp.eq.s32.totalorder %s220_s17, 0  ;;  %p234_p2 = scmp.eq.s32.totalorder %s901_s13, 1 }
   0x7   : > { %p239_p3 = scmp.ne.s32.totalorder %s817_s10, %s813_s30  ;;  %p240_p4 = scmp.eq.s32.totalorder %s638_s14, 1 }
   0x8   : > { %s916_s18 = scalar_select %p221_p1, %s821_s11, %s223_s16  }
   0x9   : > { %p918_p5 = por %p234_p2, %p233_p0  ;;  %p922_p6 = por %p240_p4, %p239_p3 }
   0xa   : > { %p641_p7 = scmp.ge.s32.totalorder %s825_s12, 1  ;;  %p290_p8 = scmp.lt.s32.totalorder %s825_s12, 3 }
   0xc   : > { %p291_p9 = pnand %p641_p7, %p290_p8 }
   0xd   : > { %p325_p10 = scmp.lt.s32.totalorder (!%p291_p9), %s901_s13, 1  ;;  %vm335_vm0 = vcmask (!%p291_p9), 523264   ;;  %v391_v14 = vld [vmem:[%s1124_s3] sm:$0xff] (!%p291_p9)  ;;  %v392_v15 = vld [vmem:[%s1124_s3 + $0x8] sm:$0xff] (!%p291_p9)  ;;  %v393_v16 = vld [vmem:[%s1124_s3 + $0x10] sm:$0xff] (!%p291_p9)  ;;  %v827_v17 = vmov (!%p291_p9), 0.0  }
   0xe   : > { %294 = sbr.rel (%p291_p9) target bundleno = 824 (0x338), region = 56  ;;  %671 = vmatprep.subr.bf16.mxu1 (!%p291_p9), %v827_v17  ;;  %v399_v18 = vpack.c.bf16 (!%p291_p9), %v392_v15, %v391_v14  ;;  %v394_v19 = vld [vmem:[%s1124_s3 + $0x18] sm:$0xff] (!%p291_p9)  ;;  %vm828_vm1 = vmmov (!%p291_p9), 0   ;;  %695 = vmatprep.subr.bf16.mxu0 (!%p291_p9), %v827_v17  ;;  %v395_v21 = vld [vmem:[%s1124_s3 + $0x20] sm:$0xff] (!%p291_p9)  ;;  %v396_v22 = vld [vmem:[%s1124_s3 + $0x28] sm:$0xff] (!%p291_p9)  ;;  %s323_s26 = sand.u32 (!%p291_p9), 1, %s817_s10  }
   0xf   : > { %679 = vmatprep.mubr.msk.bf16.mxu1 (!%p291_p9), %vm828_vm1, %v827_v17  ;;  %711 = vmatprep.mubr.msk.bf16.mxu0 (!%p291_p9), %vm828_vm1, %v827_v17  ;;  %v400_v20 = vpack.c.bf16 (!%p291_p9), %v394_v19, %v393_v16  ;;  %v401_v23 = vpack.c.bf16 (!%p291_p9), %v396_v22, %v395_v21  ;;  %v397_v24 = vld [vmem:[%s1124_s3 + $0x30] sm:$0xff] (!%p291_p9)  ;;  %v398_v25 = vld [vmem:[%s1124_s3 + $0x38] sm:$0xff] (!%p291_p9)  ;;  %v502_v27 = vld [vmem:[%s1128_s7] sm:$0xff] (!%p291_p9)  ;;  %s648_s29 = sshll.u32 (!%p291_p9), %s901_s13, 4  ;;  %s324_s14 = scalar_lea.vmem (!%p291_p9), [#allocation2], %s323_s26  ;;  %vm568_vm2 = vcmask (!%p291_p9), 32768  }
  0x10   : > { %672 = vmatpush3.bf16.msra.mxu1 (!%p291_p9), %v399_v18  ;;  %v402_v26 = vpack.c.bf16 (!%p291_p9), %v398_v25, %v397_v24  ;;  %v503_v28 = vld [vmem:[%s1128_s7 + $0x8] sm:$0xff] (!%p291_p9)  ;;  %v504_v29 = vld [vmem:[%s1128_s7 + $0x10] sm:$0xff] (!%p291_p9)  ;;  %v505_v31 = vld [vmem:[%s1128_s7 + $0x18] sm:$0xff] (!%p291_p9)  ;;  %s583_s16 = sshll.u32 (!%p291_p9), %s324_s14, 4  ;;  %s829_s24 = smov (!%p291_p9), [#allocation2]   ;;  %s1081_s16 = int_to_ptr.vmem [resolvable:$true] %s583_s16 }
  0x11   : > { %673 = vmatprep.subr.bf16.mxu1 (!%p291_p9), %v827_v17  ;;  %v518_v30 = vpack.c.bf16 (!%p291_p9), %v503_v28, %v502_v27  ;;  %v519_v32 = vpack.c.bf16 (!%p291_p9), %v505_v31, %v504_v29  ;;  %v506_v33 = vld [vmem:[%s1128_s7 + $0x20] sm:$0xff] (!%p291_p9)  ;;  %v507_v34 = vld [vmem:[%s1128_s7 + $0x28] sm:$0xff] (!%p291_p9)  ;;  %v512_v18 = vld [vmem:[%s1128_s7 + $0x50] sm:$0xff] (!%p291_p9)  ;;  %s763_s23 = scalar_lea.vmem (!%p291_p9), %s1081_s16, 16 }
  0x12   : > { %v520_v35 = vpack.c.bf16 (!%p291_p9), %v507_v34, %v506_v33  ;;  %v644_v43 = vld [vmem:[%s1122_s1] ss:$0 sm:$0xff] (!%p291_p9)  ;;  %v448_v62 = vld [vmem:[%s1126_s5 + $0x8] sm:$0xff] (!%p291_p9)  ;;  %v513_v19 = vld [vmem:[%s1128_s7 + $0x58] sm:$0xff] (!%p291_p9)  ;;  %p764_p11 = scmp.ne.s32.totalorder (!%p291_p9), %s1081_s16, %s763_s23 }
  0x13   : > { %696 = vmatpush3.bf16.msra.mxu0 (!%p291_p9), %v518_v30  ;;  %v645_v47 = vld [vmem:[%s1123_s2] ss:$0 sm:$0xff] (!%p291_p9)  ;;  %v511_v15 = vld [vmem:[%s1128_s7 + $0x48] sm:$0xff] (!%p291_p9)  ;;  %v516_v24 = vld [vmem:[%s1128_s7 + $0x70] sm:$0xff] (!%p291_p9) }
  0x14   : > { %674 = vmatpush3.bf16.msra.mxu1 (!%p291_p9), %v400_v20  ;;  %697 = vmatprep.subr.bf16.mxu0 (!%p291_p9), %v827_v17  ;;  %v447_v61 = vld [vmem:[%s1126_s5] sm:$0xff] (!%p291_p9)  ;;  %v523_v20 = vpack.c.bf16 (!%p291_p9), %v513_v19, %v512_v18  ;;  %v515_v22 = vld [vmem:[%s1128_s7 + $0x68] sm:$0xff] (!%p291_p9)  ;;  %v517_v25 = vld [vmem:[%s1128_s7 + $0x78] sm:$0xff] (!%p291_p9)  ;;  %p765_p12 = pnand (!%p291_p9), %p764_p11, %p918_p5 }
  0x15   : > { %s326_s21 = scalar_select %p325_p10, %s901_s13, 1  ;;  %675 = vmatprep.subr.bf16.mxu1 %v827_v17  ;;  %v510_v14 = vld [vmem:[%s1128_s7 + $0x40] sm:$0xff] }
  0x16   : > { %v522_v16 = vpack.c.bf16 %v511_v15, %v510_v14  ;;  %v514_v21 = vld [vmem:[%s1128_s7 + $0x60] sm:$0xff]  ;;  %s571_s13 = scalar_lea.sflag [#allocation3], %s323_s26  ;;  %p766_p13 = pneg %p765_p12 }
  0x17   : > { %s651_s22 = sshll.u32 %s326_s21, 4  ;;  %698 = vmatpush3.bf16.msra.mxu0 %v519_v32 }
  0x18   : > { %s329_s25 = scalar_lea.vmem %s1121_s0, %s651_s22  ;;  %676 = vmatpush3.bf16.msra.mxu1 %v401_v23  ;;  %699 = vmatprep.subr.bf16.mxu0 %v827_v17  ;;  %v524_v23 = vpack.c.bf16 %v515_v22, %v514_v21  ;;  %s1079_s22 = scalar_lea.hbm %s1130_s9, %s648_s29 }
  0x19   : > { %v331_v0 = vld [vmem:[%s329_s25] sm:$0xff]  ;;  %v332_v1 = vld [vmem:[%s329_s25 + $0x8] sm:$0xff]  ;;  %677 = vmatprep.subr.bf16.mxu1 %v827_v17  ;;  %s767_s25 = sshll.u32 %s829_s24, 4  ;;  %s768_s25 = int_to_ptr.vmem [resolvable:$false] %s767_s25 }
  0x1a   : > { %v336_v2 = vsel %vm335_vm0, %v331_v0, 0.0  ;;  %v339_v3 = vsel %vm335_vm0, %v332_v1, 0.0  ;;  %s769_s27 = scalar_lea.vmem %s768_s25, 32  ;;  %p770_p0 = scmp.lt.s32.totalorder %s1081_s16, %s768_s25 }
  0x1b   : > { %337 = vadd.xlane.f32.xlu0 %v336_v2  ;;  %700 = vmatpush3.bf16.msra.mxu0 %v520_v35  ;;  %v449_v2 = vld [vmem:[%s1126_s5 + $0x10] sm:$0xff]  ;;  %p771_p1 = scmp.lt.s32.totalorder %s769_s27, %s763_s23 }
  0x1c   : > { %678 = vmatpush3.bf16.msra.mxu1 %v402_v26  ;;  %701 = vmatprep.subr.bf16.mxu0 %v827_v17  ;;  %v525_v26 = vpack.c.bf16 %v517_v25, %v516_v24 }
  0x1d   : > { %683 = vmatprep.subr.bf16.mxu1 %v827_v17  ;;  %p772_p2 = por %p771_p1, %p770_p0 }
  0x1f   : > { %340 = vadd.xlane.f32.xlu0 %v339_v3  ;;  %v450_v3 = vld [vmem:[%s1126_s5 + $0x18] sm:$0xff]  ;;  %p773_p3 = pnand %p772_p2, %p766_p13 }
  0xa8   : > { %v338_v4 = vpop.xlane.xlu0 %337 }
  0xa9   : > { %v343_v5 = vmul.f32 0.015625, %v338_v4  ;;  %v456_v4 = vpack.c.bf16 %v450_v3, %v449_v2 }
  0xab   : > { %v345_v6 = vsub.f32 %v331_v0, %v343_v5  ;;  %v455_v0 = vpack.c.bf16 %v448_v62, %v447_v61  ;;  %v451_v5 = vld [vmem:[%s1126_s5 + $0x20] sm:$0xff] }
  0xac   : > { %v341_v7 = vpop.xlane.xlu0 %340 }
  0xad   : > { %v344_v8 = vmul.f32 0.015625, %v341_v7  ;;  %v347_v9 = vmul.f32 %v345_v6, %v345_v6 }
  0xaf   : > { %v346_v10 = vsub.f32 %v332_v1, %v344_v8  ;;  %v349_v11 = vsel %vm335_vm0, %v347_v9, 0.0  ;;  %v453_v8 = vld [vmem:[%s1126_s5 + $0x30] sm:$0xff]  ;;  %v454_v9 = vld [vmem:[%s1126_s5 + $0x38] sm:$0xff] }
  0xb0   : > { %350 = vadd.xlane.f32.xlu1 %v349_v11  ;;  %v508_v11 = vld [vmem:[%s1128_s7 + $0x30] sm:$0xff] }
  0xb1   : > { %v348_v12 = vmul.f32 %v346_v10, %v346_v10 }
  0xb3   : > { %v352_v13 = vsel %vm335_vm0, %v348_v12, 0.0  ;;  %v509_v12 = vld [vmem:[%s1128_s7 + $0x38] sm:$0xff] }
  0xb4   : > { %353 = vadd.xlane.f32.xlu1 %v352_v13  ;;  %v521_v13 = vpack.c.bf16 %v509_v12, %v508_v11 }
  0xb6   : > { %702 = vmatpush3.bf16.msra.mxu0 %v521_v13 }
  0xb7   : > { %703 = vmatprep.subr.bf16.mxu0 %v827_v17 }
  0xba   : > { %704 = vmatpush3.bf16.msra.mxu0 %v522_v16 }
  0xbb   : > { %705 = vmatprep.subr.bf16.mxu0 %v827_v17 }
  0xbe   : > { %706 = vmatpush3.bf16.msra.mxu0 %v523_v20 }
  0xbf   : > { %707 = vmatprep.subr.bf16.mxu0 %v827_v17 }
  0xc2   : > { %708 = vmatpush3.bf16.msra.mxu0 %v524_v23 }
  0xc3   : > { %709 = vmatprep.subr.bf16.mxu0 %v827_v17 }
  0xc6   : > { %710 = vmatpush3.bf16.msra.mxu0 %v525_v26 }
 0x13d   : > { %v351_v36 = vpop.xlane.xlu1 %350 }
 0x13e   : > { %v355_v37 = vmul.f32 0.015625, %v351_v36 }
 0x140   : > { %v357_v38 = vadd.f32 1e-05, %v355_v37 }
 0x141   : > { %v354_v39 = vpop.xlane.xlu1 %353 }
 0x142   : > { %759 = vrsqrt.f32 %v357_v38  ;;  %v356_v40 = vmul.f32 0.015625, %v354_v39  ;;  %v403_v38 = vld [vmem:[%s1125_s4] sm:$0x1] }
 0x144   : > { %v358_v41 = vadd.f32 1e-05, %v356_v40  ;;  %v526_v40 = vld [vmem:[%s1129_s8] sm:$0x1] }
 0x146   : > { %761 = vrsqrt.f32 %v358_v41 }
 0x14c   : > { %v760_v42 = vpop.eup %759 }
 0x14d   : > { %v361_v44 = vmul.f32 %v760_v42, %v345_v6  ;;  %v452_v6 = vld [vmem:[%s1126_s5 + $0x28] sm:$0xff] }
 0x14e   : > { %v457_v7 = vpack.c.bf16 %v452_v6, %v451_v5 }
 0x14f   : > { %v369_v45 = vmul.f32 %v644_v43, %v361_v44 }
 0x150   : > { %v762_v46 = vpop.eup %761 }
 0x151   : > { %v362_v48 = vmul.f32 %v762_v46, %v346_v10  ;;  %v377_v49 = vadd.f32 %v645_v47, %v369_v45  ;;  %v458_v10 = vpack.c.bf16 %v454_v9, %v453_v8 }
 0x153   : > { %v370_v50 = vmul.f32 %v644_v43, %v362_v48  ;;  %v379_v52 = vsel %vm335_vm0, %v377_v49, 0.0 }
 0x155   : > { %v378_v51 = vadd.f32 %v645_v47, %v370_v50 }
 0x157   : > { %v380_v53 = vsel %vm335_vm0, %v378_v51, 0.0 }
 0x158   : > { %v381_v54 = vadd.f32 %v380_v53, %v379_v52 }
 0x15a   : > { %v382_v55 = vrot.slane %v381_v54, 4 }
 0x15c   : > { %v383_v56 = vadd.f32 %v382_v55, %v381_v54 }
 0x15e   : > { %v384_v57 = vrot.slane %v383_v56, 2 }
 0x160   : > { %v385_v58 = vadd.f32 %v384_v57, %v383_v56 }
 0x162   : > { %v386_v59 = vrot.slane %v385_v58, 1 }
 0x164   : > { %v387_v60 = vadd.f32 %v386_v59, %v385_v58 }
 0x166   : > { %v389_v63 = vmul.f32 0.0625, %v387_v60 }
 0x168   : > { %v390_v1 = vpack.c.bf16 %v389_v63, %v389_v63 }
 0x16a   : > { %680 = vmatmul.mubr.msk.bf16.vlgmr.msra.gmra.mrb[0].mxu1 %vm335_vm0, %v390_v1 }
 0x16b   : > { %684 = vmatpush3.bf16.msra.mxu1 %v455_v0  ;;  %691 = vmatprep.mubr.msk.bf16.mxu1 %vm828_vm1, %v827_v17 }
 0x16c   : > { %685 = vmatprep.subr.bf16.mxu1 %v827_v17 }
 0x16f   : > { %686 = vmatpush3.bf16.msra.mxu1 %v456_v4 }
 0x170   : > { %687 = vmatprep.subr.bf16.mxu1 %v827_v17 }
 0x173   : > { %688 = vmatpush3.bf16.msra.mxu1 %v457_v7 }
 0x174   : > { %689 = vmatprep.subr.bf16.mxu1 %v827_v17  ;;  %v459_v17 = vld [vmem:[%s1127_s6] sm:$0x1] }
 0x177   : > { %690 = vmatpush3.bf16.msra.mxu1 %v458_v10 }
 0x17a   : > { %692 = vmatmul.mubr.msk.bf16.vlgmr.msra.gmra.mrb[4].mxu1 %vm335_vm0, %v390_v1 }
 0x23d   : > { %v441_v27 = vpop.f32.mrb[0].mxu1 }
 0x23e   : > { %v681_v28 = vpop.f32.mrb[1].mxu1  ;;  %v442_v39 = vadd.f32 %v441_v27, %v403_v38 }
 0x23f   : > { %v444_v29 = vpop.f32.mrb[2].mxu1 }
 0x240   : > { %v682_v30 = vpop.f32.mrb[3].mxu1  ;;  %v716_v41 = vadd.f32 %v526_v40, %v442_v39 }
 0x24d   : > { %v494_v31 = vpop.f32.mrb[4].mxu1 }
 0x24e   : > { %v495_v32 = vadd.f32 %v494_v31, %v459_v17  ;;  %v693_v33 = vpop.f32.mrb[5].mxu1 }
 0x24f   : > { %v497_v34 = vpop.f32.mrb[6].mxu1 }
 0x250   : > { %v500_v35 = vmax.f32 %v495_v32, 0.0  ;;  %v694_v36 = vpop.f32.mrb[7].mxu1 }
 0x252   : > { %v501_v37 = vpack.c.bf16 %v500_v35, %v500_v35 }
 0x254   : > { %712 = vmatmul.mubr.bf16.vlgmr.msra.gmra.mrb[0].mxu0 %v501_v37 }
 0x327   : > { %v561_v42 = vpop.f32.mrb[0].mxu0 }
 0x328   : > { %v717_v43 = vadd.f32 %v716_v41, %v561_v42  ;;  %v713_v44 = vpop.f32.mrb[1].mxu0 }
 0x329   : > { %v564_v45 = vpop.f32.mrb[2].mxu0 }
 0x32a   : > { %v714_v46 = vpop.f32.mrb[3].mxu0  ;;  %569 = vst.msk [vmem:[%s324_s14] sm:$0x1] %vm568_vm2, %v717_v43 }
 0x32b   : > { %776 = shalt.err (!%p773_p3)
}
 0x32c   : > { %s777_s26 = scalar_lea.hbm %s1079_s22, 16  ;;  %s781_s14 = scalar_lea.hbm %s1130_s9, 32 }
 0x32d   : > { %p778_p4 = scmp.ne.s32.totalorder %s1079_s22, %s777_s26  ;;  %p782_p9 = scmp.lt.u32.totalorder %s1079_s22, %s1130_s9 }
 0x32e   : > { %p783_p10 = scmp.lt.u32.totalorder %s781_s14, %s777_s26  ;;  %p785_p12 = scmp.lt.u32.totalorder %s777_s26, %s1079_s22 }
 0x32f   : > { %p779_p7 = pnand %p778_p4, %p918_p5 }
 0x330   : > { %p784_p11 = por %p783_p10, %p782_p9 }
 0x331   : > { %p780_p8 = pneg %p779_p7 }
 0x332   : > { %p786_p13 = por %p785_p12, %p784_p11 }
 0x334   : > { %p787_p0 = pnand %p786_p13, %p780_p8 }
 0x336   : > { %790 = shalt.err (!%p787_p0)
}
 0x337   : > { %718 = dma.vmem_to_hbm [thread:$0]  (%p918_p5), %s1081_s16, 16, %s1079_s22, %s571_s13  }
 0x338 PF: > { %p724_p1 = scmp.ge.s32.totalorder %s825_s12, 2  ;;  %s595_s23 = sand.u32 1, %s813_s30  }
 0x339   : > { %s596_s24 = scalar_lea.sflag [#allocation3], %s595_s23 }
 0x33a   : > { %p721_p2 = pnand %p724_p1, %p922_p6 }
 0x33c   : > { %808 = dma.done.wait (!%p721_p2), %s596_s24, 16  }
 0x33d   : > { %810 = vsyncadd (!%p721_p2), %s596_s24, 4294967280  ;;  %p19_p3 = scmp.ge.s32.totalorder %s905_s15, 4   ;;  %s1133_s30 = smov %s817_s10 }
 0x33e   : > { %s1134_s10 = smov %s821_s11  ;;  %s1135_s11 = smov %s916_s18 }
 0x33f   : > { %s1136_s12 = smov %s905_s15  ;;  %21 = sbr.rel (!%p19_p3) target bundleno = 3 (0x3), region = 91 }
 0x346   :  { %600 = vsyncpa [#allocation3], 1 }
 0x347   :  { %602 = vsyncpa [#allocation3 + $0x1], 1 }

// kernel: _lambda_.11
= control target key start
LH: loop header
LB: loop body
LE: loop exit
PB: predicated region body
PF: predicated region fallthrough
CT: control target
= control target key end

     0   :  { %s1994_s29 = smov 0   ;;  %s2437_s0 = inlined_call_operand.vmem [shape: f32[32,64], index: 0, kind: input, shape index: {}]   ;;  %s2438_s1 = inlined_call_operand.vmem [shape: f32[1,64], index: 1, kind: input, shape index: {}, may-alias: {1,8}]   ;;  %s2439_s2 = inlined_call_operand.vmem [shape: f32[1,64], index: 2, kind: input, shape index: {}, may-alias: {2,6,9,13}]   ;;  %s2440_s3 = inlined_call_operand.vmem [shape: f32[64,192], index: 3, kind: input, shape index: {}]   ;;  %s2441_s4 = inlined_call_operand.vmem [shape: f32[1,192], index: 4, kind: input, shape index: {}]   ;;  %s2442_s5 = inlined_call_operand.vmem [shape: f32[64,64], index: 5, kind: input, shape index: {}]   ;;  %s2443_s6 = inlined_call_operand.vmem [shape: f32[1,64], index: 6, kind: input, shape index: {}, may-alias: {2,6,9,13}]   ;;  %s2444_s7 = inlined_call_operand.vmem [shape: bf16[4,1,16,16], index: 7, kind: input, shape index: {}]   ;;  %s2445_s8 = inlined_call_operand.vmem [shape: f32[1,64], index: 8, kind: input, shape index: {}, may-alias: {1,8}]   ;;  %s2446_s9 = inlined_call_operand.vmem [shape: f32[1,64], index: 9, kind: input, shape index: {}, may-alias: {2,6,9,13}]   ;;  %s2447_s10 = inlined_call_operand.vmem [shape: f32[64,256], index: 10, kind: input, shape index: {}]   ;;  %s2448_s11 = inlined_call_operand.vmem [shape: f32[1,256], index: 11, kind: input, shape index: {}]   ;;  %s2449_s12 = inlined_call_operand.vmem [shape: f32[256,64], index: 12, kind: input, shape index: {}]   ;;  %s2450_s13 = inlined_call_operand.vmem [shape: f32[1,64], index: 13, kind: input, shape index: {}, may-alias: {2,6,9,13}]   ;;  %s2451_s14 = inlined_call_operand.vmem [shape: f32[32,64], index: 14, kind: output, shape index: {}]  }
   0x1 LB: > { %s1639_s30 = sadd.s32 4294967295, %s1907_s29   ;;  %p1643_p0 = scmp.ge.s32.totalorder %s1907_s29, 1  ;;  %s1907_s29 = sphi %s1994_s29, %s24_s29  }
   0x2   : > { %p413_p1 = scmp.lt.s32.totalorder %s1907_s29, 3 }
   0x4   : > { %p414_p2 = pnand %p1643_p0, %p413_p1 }
   0x5   : > { %s1644_s15 = sshll.u32 (!%p414_p2), %s1639_s30, 1  ;;  %vm476_vm0 = vcmask (!%p414_p2), 523264   ;;  %v522_v14 = vld [vmem:[%s2440_s3 + $0x8] sm:$0xff] (!%p414_p2)  ;;  %v524_v15 = vld [vmem:[%s2440_s3 + $0x18] sm:$0xff] (!%p414_p2)  ;;  %v521_v17 = vld [vmem:[%s2440_s3] sm:$0xff] (!%p414_p2)  ;;  %v1909_v37 = vmov (!%p414_p2), 0   ;;  %v547_v56 = vlaneseq (!%p414_p2) }
   0x6   : > { %417 = sbr.rel (%p414_p2) target bundleno = 2588 (0xa1c), region = 76  ;;  %p460_p3 = scmp.lt.s32.totalorder (!%p414_p2), %s1644_s15, 3  ;;  %v538_v16 = vpack.c.bf16 (!%p414_p2), %v524_v15, %v522_v14  ;;  %v523_v18 = vld [vmem:[%s2440_s3 + $0x10] sm:$0xff] (!%p414_p2)  ;;  %v526_v20 = vld [vmem:[%s2440_s3 + $0x28] sm:$0xff] (!%p414_p2)  ;;  %v528_v21 = vld [vmem:[%s2440_s3 + $0x38] sm:$0xff] (!%p414_p2)  ;;  %592 = vmatprep.mubr.bf16.mxu1 (!%p414_p2), %v1909_v37  ;;  %v1910_v62 = vmov (!%p414_p2), 0.0  }
   0x7   : > { %v537_v19 = vpack.c.bf16 (!%p414_p2), %v523_v18, %v521_v17  ;;  %v540_v22 = vpack.c.bf16 (!%p414_p2), %v528_v21, %v526_v20  ;;  %v525_v23 = vld [vmem:[%s2440_s3 + $0x20] sm:$0xff] (!%p414_p2)  ;;  %v527_v24 = vld [vmem:[%s2440_s3 + $0x30] sm:$0xff] (!%p414_p2)  ;;  %v530_v26 = vld [vmem:[%s2440_s3 + $0x48] sm:$0xff] (!%p414_p2)  ;;  %v2078_v57 = vshrl.u32 (!%p414_p2), %v547_v56, 7  ;;  %1749 = vmatprep.subr.bf16.mxu0 (!%p414_p2), %v1910_v62  ;;  %s1912_s20 = smov (!%p414_p2), 112   ;;  %vm1913_vm1 = vmmov (!%p414_p2), 0  }
   0x8   : > { %560 = vmatprep.subr.bf16.mxu1 (!%p414_p2), %v538_v16  ;;  %v539_v25 = vpack.c.bf16 (!%p414_p2), %v527_v24, %v525_v23  ;;  %v532_v27 = vld [vmem:[%s2440_s3 + $0x58] sm:$0xff] (!%p414_p2)  ;;  %v529_v29 = vld [vmem:[%s2440_s3 + $0x40] sm:$0xff] (!%p414_p2)  ;;  %v531_v30 = vld [vmem:[%s2440_s3 + $0x50] sm:$0xff] (!%p414_p2)  ;;  %1751 = vmatprep.mubr.msk.bf16.mxu0 (!%p414_p2), %vm1913_vm1, %v1910_v62  ;;  %s1914_s21 = smov (!%p414_p2), 80   ;;  %s1915_s22 = smov (!%p414_p2), 64   ;;  %vm678_vm2 = vcmask (!%p414_p2), 130048  }
   0x9   : > { %561 = vmatpush1.bf16.msra.mxu1 (!%p414_p2), %v537_v19  ;;  %v542_v28 = vpack.c.bf16 (!%p414_p2), %v532_v27, %v530_v26  ;;  %v541_v31 = vpack.c.bf16 (!%p414_p2), %v531_v30, %v529_v29  ;;  %v534_v32 = vld [vmem:[%s2440_s3 + $0x68] sm:$0xff] (!%p414_p2)  ;;  %v536_v33 = vld [vmem:[%s2440_s3 + $0x78] sm:$0xff] (!%p414_p2)  ;;  %v533_v34 = vld [vmem:[%s2440_s3 + $0x60] sm:$0xff] (!%p414_p2)  ;;  %v549_v58 = vsub.s32 (!%p414_p2), 0, %v2078_v57  ;;  %v553_v60 = vsub.s32 (!%p414_p2), 1, %v2078_v57  ;;  %s1916_s17 = smov (!%p414_p2), 32  }
   0xa   : > { %562 = vmatprep.subr.bf16.mxu1 (!%p414_p2), %v540_v22  ;;  %v544_v35 = vpack.c.bf16 (!%p414_p2), %v536_v33, %v534_v32  ;;  %v535_v36 = vld [vmem:[%s2440_s3 + $0x70] sm:$0xff] (!%p414_p2)  ;;  %v1648_v47 = vld [vmem:[%s2438_s1] ss:$0 sm:$0xff] (!%p414_p2)  ;;  %s1917_s18 = smov (!%p414_p2), 16   ;;  %s1918_s23 = smov (!%p414_p2), 48   ;;  %vm1174_vm3 = vcmask (!%p414_p2), 261120  }
   0xb   : > { %v543_v38 = vpack.c.bf16 (!%p414_p2), %v535_v36, %v533_v34  ;;  %v1649_v51 = vld [vmem:[%s2439_s2] ss:$0 sm:$0xff] (!%p414_p2)  ;;  %v1692_v56 = vld [vmem:[%s2444_s7 + $0x10] sm:$0xff] (!%p414_p2)   ;;  %vm1177_vm4 = vcmask (!%p414_p2), 392192  }
   0xc   : > { %v545_v59 = vld [vmem:[%s2441_s4] sm:$0x3] (!%p414_p2) }
   0xd   : > { %s2453_s15 = smov (!%p460_p3, %s1644_s15), 3  ;;  %563 = vmatpush1.bf16.msra.mxu1 %v539_v25  ;;  %v550_v61 = vrot.slane %v545_v59, %v549_v58 }
   0xe   : > { %s1645_s16 = sshll.u32 %s2453_s15, 3  ;;  %564 = vmatprep.subr.bf16.mxu1 %v542_v28 }
   0xf   : > { %s463_s19 = scalar_lea.vmem %s2437_s0, %s1645_s16  ;;  %s469_s28 = scalar_lea.vmem %s2451_s14, %s1645_s16 }
  0x10   : > { %v2010_v0 = vld [vmem:[%s463_s19] sm:$0xff]  ;;  %v2012_v1 = vld [vmem:[%s463_s19 + $0x8] sm:$0xff]  ;;  %s1911_s19 = smov 96  }
  0x11   : > { %v477_v2 = vsel %vm476_vm0, %v2010_v0, 0.0  ;;  %v480_v3 = vsel %vm476_vm0, %v2012_v1, 0.0  ;;  %565 = vmatpush1.bf16.msra.mxu1 %v541_v31 }
  0x12   : > { %478 = vadd.xlane.f32.xlu0 %v477_v2  ;;  %566 = vmatprep.subr.bf16.mxu1 %v544_v35  ;;  %v554_v2 = vrot.slane %v545_v59, %v553_v60 }
  0x15   : > { %567 = vmatpush1.bf16.msra.mxu1 %v543_v38 }
  0x16   : > { %481 = vadd.xlane.f32.xlu0 %v480_v3  ;;  %1737 = vmatprep.subr.bf16.mxu1 %v1910_v62 }
  0x9f   : > { %v479_v4 = vpop.xlane.xlu0 %478 }
  0xa0   : > { %v484_v5 = vmul.f32 0.015625, %v479_v4 }
  0xa2   : > { %v486_v6 = vsub.f32 %v2010_v0, %v484_v5 }
  0xa3   : > { %v482_v7 = vpop.xlane.xlu0 %481 }
  0xa4   : > { %v485_v8 = vmul.f32 0.015625, %v482_v7  ;;  %v488_v9 = vmul.f32 %v486_v6, %v486_v6 }
  0xa6   : > { %v487_v10 = vsub.f32 %v2012_v1, %v485_v8  ;;  %v490_v11 = vsel %vm476_vm0, %v488_v9, 0.0 }
  0xa7   : > { %491 = vadd.xlane.f32.xlu1 %v490_v11 }
  0xa8   : > { %v489_v12 = vmul.f32 %v487_v10, %v487_v10 }
  0xaa   : > { %v493_v13 = vsel %vm476_vm0, %v489_v12, 0.0 }
  0xab   : > { %494 = vadd.xlane.f32.xlu1 %v493_v13 }
 0x134   : > { %v492_v39 = vpop.xlane.xlu1 %491 }
 0x135   : > { %v496_v40 = vmul.f32 0.015625, %v492_v39 }
 0x137   : > { %v498_v41 = vadd.f32 1e-05, %v496_v40 }
 0x138   : > { %v495_v42 = vpop.xlane.xlu1 %494 }
 0x139   : > { %1845 = vrsqrt.f32 %v498_v41  ;;  %v497_v43 = vmul.f32 0.015625, %v495_v42 }
 0x13b   : > { %v499_v44 = vadd.f32 1e-05, %v497_v43  ;;  %v1676_v43 = vld [vmem:[%s2444_s7] sm:$0xff]  }
 0x13d   : > { %1847 = vrsqrt.f32 %v499_v44  ;;  %v1677_v44 = vunpack.c.l.bf16 %v1676_v43 }
 0x143   : > { %v1846_v45 = vpop.eup %1845 }
 0x144   : > { %v502_v46 = vmul.f32 %v1846_v45, %v486_v6  ;;  %v1678_v45 = vunpack.c.h.bf16 %v1676_v43 }
 0x146   : > { %v510_v50 = vmul.f32 %v1648_v47, %v502_v46 }
 0x147   : > { %v1848_v48 = vpop.eup %1847 }
 0x148   : > { %v503_v49 = vmul.f32 %v1848_v48, %v487_v10  ;;  %v518_v53 = vadd.f32 %v1649_v51, %v510_v50 }
 0x14a   : > { %v511_v52 = vmul.f32 %v1648_v47, %v503_v49 }
 0x14c   : > { %v519_v54 = vadd.f32 %v1649_v51, %v511_v52 }
 0x14e   : > { %v520_v55 = vpack.c.bf16 %v519_v54, %v518_v53  ;;  %v1691_v54 = vld [vmem:[%s2444_s7 + $0x8] sm:$0xff]  }
 0x150   : > { %1650 = vmatmul.mubr.msk.bf16.vlgmr.msra.gmra.mrb[0].mxu1 %vm476_vm0, %v520_v55  ;;  %v1681_v55 = vunpack.c.l.bf16 %v1691_v54 }
 0x151   : > { %1739 = vmatprep.mubr.msk.bf16.mxu1 %vm1913_vm1, %v1910_v62 }
 0x223   : > { %v594_v63 = vpop.f32.mrb[0].mxu1 }
 0x224   : > { %v595_v3 = vadd.f32 %v594_v63, %v550_v61  ;;  %v596_v4 = vpop.f32.mrb[1].mxu1 }
 0x225   : > { %v598_v5 = vpop.f32.mrb[2].mxu1  ;;  %v597_v8 = vadd.f32 %v596_v4, %v554_v2  ;;  %v1682_v4 = vunpack.c.h.bf16 %v1691_v54 }
 0x226   : > { %v599_v6 = vadd.f32 %v598_v5, %v550_v61  ;;  %v600_v7 = vpop.f32.mrb[3].mxu1  ;;  %611 = vrot.lane.b32.xlu1 %v595_v3, %s1911_s19  ;;  %605 = vrot.lane.b32.xlu0 %v595_v3, %s1912_s20  ;;  %v623_v10 = vmul.f32 0.25, %v595_v3 }
 0x227   : > { %v601_v9 = vadd.f32 %v600_v7, %v554_v2  ;;  %v1685_v2 = vunpack.c.l.bf16 %v1692_v56  ;;  %v1686_v7 = vunpack.c.h.bf16 %v1692_v56 }
 0x228   : > { %v624_v11 = vmul.f32 0.25, %v599_v6  ;;  %v655_v12 = vpack.c.bf16 %v599_v6, %v595_v3 }
 0x229   : > { %v952_v13 = vpack.c.bf16 %v601_v9, %v597_v8  ;;  %v2097_v14 = vpack.i.bf16 %v601_v9, %v597_v8  ;;  %v1693_v9 = vld [vmem:[%s2444_s7 + $0x18] sm:$0xff]  }
 0x22a   : > { %607 = vrot.lane.b32.xlu1 %v599_v6, %s1912_s20  ;;  %617 = vrot.lane.b32.xlu0 %v595_v3, %s1914_s21  ;;  %v651_v15 = vpack.c.bf16 %v624_v11, %v623_v10 }
 0x22e   : > { %613 = vrot.lane.b32.xlu1 %v599_v6, %s1911_s19  ;;  %676 = vrot.lane.b32.xlu0 %v655_v12, %s1915_s22 }
 0x232   : > { %619 = vrot.lane.b32.xlu1 %v599_v6, %s1914_s21 }
 0x298   : > { %v612_v16 = vpop.permute.xlu1 %611  ;;  %v606_v17 = vpop.permute.xlu0 %605 }
 0x299   : > { %v625_v20 = vmul.f32 0.25, %v606_v17  ;;  %v627_v26 = vmul.f32 0.25, %v612_v16 }
 0x29c   : > { %v608_v18 = vpop.permute.xlu1 %607  ;;  %v618_v19 = vpop.permute.xlu0 %617 }
 0x29d   : > { %v626_v21 = vmul.f32 0.25, %v608_v18  ;;  %v656_v22 = vpack.c.bf16 %v608_v18, %v606_v17  ;;  %v629_v41 = vmul.f32 0.25, %v618_v19  ;;  %v1689_v18 = vunpack.c.l.bf16 %v1693_v9 }
 0x29f   : > { %v652_v23 = vpack.c.bf16 %v626_v21, %v625_v20  ;;  %727 = vrot.lane.b32.xlu1 %v656_v22, %s1915_s22 }
 0x2a0   : > { %v614_v24 = vpop.permute.xlu1 %613  ;;  %v677_v25 = vpop.permute.xlu0 %676 }
 0x2a1   : > { %v628_v27 = vmul.f32 0.25, %v614_v24  ;;  %v657_v28 = vpack.c.bf16 %v614_v24, %v612_v16  ;;  %v683_v29 = vsel %vm678_vm2, %v677_v25, 0 }
 0x2a2   : > { %1738 = vmatpush3.bf16.xpose.msra.mxu1 %v683_v29 }
 0x2a3   : > { %v653_v30 = vpack.c.bf16 %v628_v27, %v627_v26  ;;  %777 = vrot.lane.b32.xlu0 %v657_v28, %s1915_s22  ;;  %1743 = vmatprep.subr.bf16.mxu1 %v1910_v62 }
 0x2a4   : > { %v620_v31 = vpop.permute.xlu1 %619 }
 0x2a5   : > { %v658_v32 = vpack.c.bf16 %v620_v31, %v618_v19  ;;  %v630_v40 = vmul.f32 0.25, %v620_v31 }
 0x2a7   : > { %827 = vrot.lane.b32.xlu1 %v658_v32, %s1915_s22  ;;  %v654_v42 = vpack.c.bf16 %v630_v40, %v629_v41 }
 0x2a9   : > { %1740 = vmatmul.mubr.msk.bf16.vlgmr.msra.gmra.mrb[4].mxu1 %vm678_vm2, %v651_v15 }
 0x2aa   : > { %1745 = vmatprep.mubr.msk.bf16.mxu1 %vm1913_vm1, %v1910_v62 }
 0x311   : > { %v728_v33 = vpop.permute.xlu1 %727 }
 0x312   : > { %v733_v34 = vsel %vm678_vm2, %v728_v33, 0 }
 0x313   : > { %1744 = vmatpush3.bf16.xpose.msra.mxu1 %v733_v34 }
 0x314   : > { %1755 = vmatprep.subr.bf16.mxu1 %v1910_v62 }
 0x315   : > { %v778_v35 = vpop.permute.xlu0 %777 }
 0x316   : > { %v783_v36 = vsel %vm678_vm2, %v778_v35, 0 }
 0x317   : > { %1750 = vmatpush3.bf16.xpose.msra.mxu0 %v783_v36  ;;  %v1690_v36 = vunpack.c.h.bf16 %v1693_v9 }
 0x318   : > { %1761 = vmatprep.subr.bf16.mxu0 %v1910_v62 }
 0x319   : > { %v828_v38 = vpop.permute.xlu1 %827 }
 0x31a   : > { %v833_v39 = vsel %vm678_vm2, %v828_v38, 0  ;;  %1746 = vmatmul.mubr.msk.bf16.vlgmr.msra.gmra.mrb[8].mxu1 %vm678_vm2, %v652_v23 }
 0x31b   : > { %1756 = vmatpush3.bf16.xpose.msra.mxu1 %v833_v39  ;;  %1757 = vmatprep.mubr.msk.bf16.mxu1 %vm1913_vm1, %v1910_v62 }
 0x31c   : > { %1767 = vmatprep.subr.bf16.mxu1 %v1910_v62 }
 0x31e   : > { %1752 = vmatmul.mubr.msk.bf16.vlgmr.msra.gmra.mrb[0].mxu0 %vm678_vm2, %v653_v30 }
 0x31f   : > { %1762 = vmatpush3.bf16.msra.mxu0 %v952_v13  ;;  %1763 = vmatprep.mubr.msk.bf16.mxu0 %vm1913_vm1, %v1910_v62 }
 0x320   : > { %1773 = vmatprep.subr.bf16.mxu0 %v1910_v62 }
 0x322   : > { %1758 = vmatmul.mubr.msk.bf16.vlgmr.msra.gmra.mrb[12].mxu1 %vm678_vm2, %v654_v42 }
 0x323   : > { %1769 = vmatprep.mubr.msk.bf16.mxu1 %vm1913_vm1, %v1910_v62 }
 0x37c   : > { %v719_v46 = vpop.f32.mrb[4].mxu1 }
 0x37d   : > { %v720_v47 = vadd.f32 %v1677_v44, %v719_v46  ;;  %v1741_v48 = vpop.f32.mrb[5].mxu1 }
 0x37e   : > { %v722_v49 = vpop.f32.mrb[6].mxu1 }
 0x37f   : > { %v723_v50 = vadd.f32 %v1678_v45, %v722_v49  ;;  %v1742_v51 = vpop.f32.mrb[7].mxu1  ;;  %v876_v52 = vsel %vm678_vm2, %v720_v47, -inf }
 0x380   : > { %877 = vmax.xlane.f32.xlu0 %v876_v52 }
 0x381   : > { %v879_v53 = vsel %vm678_vm2, %v723_v50, -inf }
 0x382   : > { %880 = vmax.xlane.f32.xlu1 %v879_v53 }
 0x3ed   : > { %v769_v59 = vpop.f32.mrb[8].mxu1 }
 0x3ee   : > { %v770_v61 = vadd.f32 %v1681_v55, %v769_v59  ;;  %v1747_v63 = vpop.f32.mrb[9].mxu1 }
 0x3ef   : > { %v772_v3 = vpop.f32.mrb[10].mxu1 }
 0x3f0   : > { %v1748_v5 = vpop.f32.mrb[11].mxu1  ;;  %v882_v6 = vsel %vm678_vm2, %v770_v61, -inf  ;;  %v773_v13 = vadd.f32 %v1682_v4, %v772_v3 }
 0x3f1   : > { %v819_v8 = vpop.f32.mrb[0].mxu0  ;;  %883 = vmax.xlane.f32.xlu0 %v882_v6 }
 0x3f2   : > { %v820_v10 = vadd.f32 %v1685_v2, %v819_v8  ;;  %v1753_v11 = vpop.f32.mrb[1].mxu0  ;;  %v885_v25 = vsel %vm678_vm2, %v773_v13, -inf }
 0x3f3   : > { %v822_v12 = vpop.f32.mrb[2].mxu0 }
 0x3f4   : > { %v823_v15 = vadd.f32 %v1686_v7, %v822_v12  ;;  %v1754_v16 = vpop.f32.mrb[3].mxu0  ;;  %v888_v17 = vsel %vm678_vm2, %v820_v10, -inf }
 0x3f5   : > { %889 = vmax.xlane.f32.xlu0 %v888_v17  ;;  %v869_v19 = vpop.f32.mrb[12].mxu1 }
 0x3f6   : > { %v1759_v20 = vpop.f32.mrb[13].mxu1  ;;  %v891_v21 = vsel %vm678_vm2, %v823_v15, -inf  ;;  %v870_v23 = vadd.f32 %v1689_v18, %v869_v19 }
 0x3f7   : > { %892 = vmax.xlane.f32.xlu1 %v891_v21  ;;  %v872_v22 = vpop.f32.mrb[14].mxu1 }
 0x3f8   : > { %v1760_v24 = vpop.f32.mrb[15].mxu1  ;;  %v894_v26 = vsel %vm678_vm2, %v870_v23, -inf  ;;  %v873_v38 = vadd.f32 %v1690_v36, %v872_v22 }
 0x3f9   : > { %886 = vmax.xlane.f32.xlu0 %v885_v25 }
 0x3fa   : > { %v897_v39 = vsel %vm678_vm2, %v873_v38, -inf }
 0x3fd   : > { %895 = vmax.xlane.f32.xlu0 %v894_v26 }
 0x408   : > { %1821 = vrot.lane.b32.xlu1 %v2097_v14, %s1911_s19 }
 0x40d   : > { %v878_v27 = vpop.xlane.xlu0 %877 }
 0x40e   : > { %v900_v28 = vsub.f32 %v720_v47, %v878_v27 }
 0x40f   : > { %v881_v29 = vpop.xlane.xlu1 %880 }
 0x410   : > { %v908_v30 = vmul.f32 1.442695, %v900_v28  ;;  %v901_v31 = vsub.f32 %v723_v50, %v881_v29 }
 0x412   : > { %v910_v32 = vmul.f32 1.442695, %v901_v31  ;;  %1849 = vpow2.f32 %v908_v30 }
 0x413   : > { %1816 = vrot.lane.b32.xlu0 %v2097_v14, %s1912_s20 }
 0x414   : > { %1851 = vpow2.f32 %v910_v32 }
 0x41c   : > { %v2147_v33 = vpop.eup %1849 }
 0x41d   : > { %v924_v17 = vsel %vm678_vm2, %v2147_v33, 0.0 }
 0x41e   : > { %v2149_v34 = vpop.eup %1851 }
 0x41f   : > { %v948_v35 = vpack.c.bf16 %v2149_v34, %v2147_v33  ;;  %v927_v28 = vsel %vm678_vm2, %v2149_v34, 0.0  ;;  %v1182_v34 = vld [vmem:[%s2442_s5 + $0x8] sm:$0xff] }
 0x421   : > { %1764 = vmatmul.mubr.msk.bf16.vlgmr.msra.gmra.mrb[4].mxu0 %vm678_vm2, %v948_v35 }
 0x422   : > { %1775 = vmatprep.mubr.msk.bf16.mxu0 %vm1913_vm1, %v1910_v62 }
 0x42c   : > { %898 = vmax.xlane.f32.xlu1 %v897_v39  ;;  %v1183_v39 = vld [vmem:[%s2442_s5 + $0x10] sm:$0xff] }
 0x43d   : > { %1826 = vrot.lane.b32.xlu1 %v2097_v14, %s1914_s21 }
 0x47e   : > { %v884_v40 = vpop.xlane.xlu0 %883 }
 0x47f   : > { %v902_v41 = vsub.f32 %v770_v61, %v884_v40 }
 0x481   : > { %v912_v42 = vmul.f32 1.442695, %v902_v41  ;;  %v1184_v41 = vld [vmem:[%s2442_s5 + $0x18] sm:$0xff] }
 0x482   : > { %v890_v43 = vpop.xlane.xlu0 %889 }
 0x483   : > { %1853 = vpow2.f32 %v912_v42  ;;  %v904_v44 = vsub.f32 %v820_v10, %v890_v43 }
 0x484   : > { %v893_v45 = vpop.xlane.xlu1 %892 }
 0x485   : > { %v916_v46 = vmul.f32 1.442695, %v904_v44  ;;  %v905_v47 = vsub.f32 %v823_v15, %v893_v45  ;;  %v1190_v45 = vpack.c.bf16 %v1184_v41, %v1183_v39 }
 0x486   : > { %v887_v48 = vpop.xlane.xlu0 %886 }
 0x487   : > { %1855 = vpow2.f32 %v916_v46  ;;  %v918_v49 = vmul.f32 1.442695, %v905_v47  ;;  %v903_v50 = vsub.f32 %v773_v13, %v887_v48 }
 0x488   : > { %v1822_v51 = vpop.permute.xlu1 %1821 }
 0x489   : > { %1857 = vpow2.f32 %v918_v49  ;;  %v914_v52 = vmul.f32 1.442695, %v903_v50  ;;  %v1824_v53 = vunpack.i.h.bf16 %v1822_v51  ;;  %v1823_v54 = vunpack.i.l.bf16 %v1822_v51  ;;  %v1185_v49 = vld [vmem:[%s2442_s5 + $0x20] sm:$0xff]  ;;  %v1186_v50 = vld [vmem:[%s2442_s5 + $0x28] sm:$0xff] }
 0x48a   : > { %v896_v55 = vpop.xlane.xlu0 %895 }
 0x48b   : > { %1859 = vpow2.f32 %v914_v52  ;;  %v954_v14 = vpack.c.bf16 %v1824_v53, %v1823_v54  ;;  %v906_v56 = vsub.f32 %v870_v23, %v896_v55 }
 0x48d   : > { %v1854_v59 = vpop.eup %1853  ;;  %v920_v61 = vmul.f32 1.442695, %v906_v56  ;;  %1774 = vmatpush3.bf16.msra.mxu0 %v954_v14 }
 0x48e   : > { %v1817_v63 = vpop.permute.xlu0 %1816  ;;  %v930_v2 = vsel %vm678_vm2, %v1854_v59, 0.0  ;;  %1785 = vmatprep.subr.bf16.mxu0 %v1910_v62 }
 0x48f   : > { %1861 = vpow2.f32 %v920_v61  ;;  %v1819_v3 = vunpack.i.h.bf16 %v1817_v63  ;;  %v1818_v4 = vunpack.i.l.bf16 %v1817_v63  ;;  %931 = vadd.xlane.f32.xlu1 %v930_v2 }
 0x491   : > { %v1856_v5 = vpop.eup %1855  ;;  %v953_v6 = vpack.c.bf16 %v1819_v3, %v1818_v4  ;;  %v1191_v3 = vpack.c.bf16 %v1186_v50, %v1185_v49 }
 0x492   : > { %v936_v7 = vsel %vm678_vm2, %v1856_v5, 0.0 }
 0x493   : > { %v1858_v8 = vpop.eup %1857  ;;  %937 = vadd.xlane.f32.xlu0 %v936_v7  ;;  %1768 = vmatpush3.bf16.msra.mxu1 %v953_v6  ;;  %v1187_v7 = vld [vmem:[%s2442_s5 + $0x30] sm:$0xff] }
 0x494   : > { %v950_v9 = vpack.c.bf16 %v1858_v8, %v1856_v5  ;;  %1779 = vmatprep.subr.bf16.mxu1 %v1910_v62  ;;  %v939_v15 = vsel %vm678_vm2, %v1858_v8, 0.0  ;;  %v1188_v8 = vld [vmem:[%s2442_s5 + $0x38] sm:$0xff] }
 0x495   : > { %v1860_v10 = vpop.eup %1859 }
 0x496   : > { %1776 = vmatmul.mubr.msk.bf16.vlgmr.msra.gmra.mrb[8].mxu0 %vm678_vm2, %v950_v9  ;;  %v933_v11 = vsel %vm678_vm2, %v1860_v10, 0.0  ;;  %v949_v12 = vpack.c.bf16 %v1860_v10, %v1854_v59  ;;  %v1192_v9 = vpack.c.bf16 %v1188_v8, %v1187_v7  ;;  %v1296_v7 = vld [vmem:[%s2447_s10 + $0x28] sm:$0xff]  ;;  %v1298_v8 = vld [vmem:[%s2447_s10 + $0x38] sm:$0xff] }
 0x497   : > { %934 = vadd.xlane.f32.xlu0 %v933_v11  ;;  %1793 = vmatprep.mubr.msk.bf16.mxu0 %vm1913_vm1, %v1910_v62 }
 0x498   : > { %1770 = vmatmul.mubr.msk.bf16.vlgmr.msra.gmra.mrb[16].mxu1 %vm678_vm2, %v949_v12 }
 0x499   : > { %v1862_v13 = vpop.eup %1861  ;;  %1781 = vmatprep.mubr.msk.bf16.mxu1 %vm1913_vm1, %v1910_v62 }
 0x49a   : > { %v942_v16 = vsel %vm678_vm2, %v1862_v13, 0.0 }
 0x49b   : > { %940 = vadd.xlane.f32.xlu0 %v939_v15  ;;  %943 = vadd.xlane.f32.xlu1 %v942_v16 }
 0x49f   : > { %925 = vadd.xlane.f32.xlu1 %v924_v17 }
 0x4b9   : > { %v899_v18 = vpop.xlane.xlu1 %898 }
 0x4ba   : > { %v907_v19 = vsub.f32 %v873_v38, %v899_v18 }
 0x4bc   : > { %v922_v20 = vmul.f32 1.442695, %v907_v19 }
 0x4bd   : > { %v1827_v21 = vpop.permute.xlu1 %1826 }
 0x4be   : > { %1863 = vpow2.f32 %v922_v20  ;;  %v1829_v22 = vunpack.i.h.bf16 %v1827_v21  ;;  %v1828_v23 = vunpack.i.l.bf16 %v1827_v21 }
 0x4c0   : > { %v955_v24 = vpack.c.bf16 %v1829_v22, %v1828_v23 }
 0x4c2   : > { %1780 = vmatpush3.bf16.msra.mxu1 %v955_v24 }
 0x4c8   : > { %v1864_v25 = vpop.eup %1863 }
 0x4c9   : > { %v945_v26 = vsel %vm678_vm2, %v1864_v25, 0.0  ;;  %v951_v27 = vpack.c.bf16 %v1864_v25, %v1862_v13 }
 0x4ca   : > { %946 = vadd.xlane.f32.xlu0 %v945_v26 }
 0x4cb   : > { %1782 = vmatmul.mubr.msk.bf16.vlgmr.msra.gmra.mrb[20].mxu1 %vm678_vm2, %v951_v27 }
 0x4cc   : > { %1362 = vmatprep.mubr.bf16.mxu1 %v1909_v37  ;;  %v1181_v37 = vld [vmem:[%s2442_s5] sm:$0xff] }
 0x4cd   : > { %v1189_v40 = vpack.c.bf16 %v1182_v34, %v1181_v37 }
 0x4ce   : > { %928 = vadd.xlane.f32.xlu0 %v927_v28 }
 0x4cf   : > { %1786 = vmatpush3.bf16.msra.mxu0 %v1189_v40 }
 0x4d0   : > { %1787 = vmatprep.subr.bf16.mxu0 %v1910_v62 }
 0x4d3   : > { %1788 = vmatpush3.bf16.msra.mxu0 %v1190_v45 }
 0x4d4   : > { %1789 = vmatprep.subr.bf16.mxu0 %v1910_v62 }
 0x4d7   : > { %1790 = vmatpush3.bf16.msra.mxu0 %v1191_v3 }
 0x4d8   : > { %1791 = vmatprep.subr.bf16.mxu0 %v1910_v62 }
 0x4db   : > { %1792 = vmatpush3.bf16.msra.mxu0 %v1192_v9  ;;  %v1310_v9 = vpack.c.bf16 %v1298_v8, %v1296_v7  ;;  %v1507_v7 = vld [vmem:[%s2449_s12 + $0xc0] sm:$0xff]  ;;  %v1508_v8 = vld [vmem:[%s2449_s12 + $0xc8] sm:$0xff] }
 0x4f4   : > { %v2179_v29 = vpop.f32.mrb[4].mxu0 }
 0x4f5   : > { %v1765_v30 = vpop.f32.mrb[5].mxu0 }
 0x4f6   : > { %v2181_v31 = vpop.f32.mrb[6].mxu0 }
 0x4f7   : > { %v1766_v32 = vpop.f32.mrb[7].mxu0 }
 0x51c   : > { %v932_v38 = vpop.xlane.xlu1 %931 }
 0x520   : > { %v938_v33 = vpop.xlane.xlu0 %937 }
 0x521   : > { %1865 = vrcp.f32 %v938_v33 }
 0x524   : > { %v935_v35 = vpop.xlane.xlu0 %934 }
 0x528   : > { %v941_v36 = vpop.xlane.xlu0 %940  ;;  %v944_v5 = vpop.xlane.xlu1 %943 }
 0x529   : > { %1867 = vrcp.f32 %v941_v36 }
 0x52a   : > { %1869 = vrcp.f32 %v932_v38 }
 0x52b   : > { %1871 = vrcp.f32 %v935_v35  ;;  %v1866_v43 = vpop.eup %1865 }
 0x52c   : > { %1873 = vrcp.f32 %v944_v5  ;;  %v926_v19 = vpop.xlane.xlu1 %925  ;;  %v1293_v5 = vld [vmem:[%s2447_s10 + $0x10] sm:$0xff] }
 0x533   : > { %v1868_v46 = vpop.eup %1867 }
 0x534   : > { %v1870_v51 = vpop.eup %1869 }
 0x535   : > { %v1872_v14 = vpop.eup %1871 }
 0x536   : > { %v1874_v11 = vpop.eup %1873 }
 0x557   : > { %v947_v6 = vpop.xlane.xlu0 %946 }
 0x558   : > { %1875 = vrcp.f32 %v947_v6 }
 0x559   : > { %1877 = vrcp.f32 %v926_v19  ;;  %v1304_v19 = vld [vmem:[%s2447_s10 + $0x68] sm:$0xff] }
 0x55b   : > { %v929_v20 = vpop.xlane.xlu0 %928 }
 0x55c   : > { %1879 = vrcp.f32 %v929_v20  ;;  %v1306_v20 = vld [vmem:[%s2447_s10 + $0x78] sm:$0xff] }
 0x562   : > { %v1876_v13 = vpop.eup %1875 }
 0x563   : > { %v1878_v22 = vpop.eup %1877 }
 0x564   : > { %v1140_v27 = vmul.f32 %v1878_v22, %v2179_v29  ;;  %v1659_v29 = vld [vmem:[%s2443_s6] ss:$0 sm:$0xff]  ;;  %v1314_v22 = vpack.c.bf16 %v1306_v20, %v1304_v19  ;;  %v1512_v20 = vld [vmem:[%s2449_s12 + $0xe8] sm:$0xff] }
 0x565   : > { %v1511_v19 = vld [vmem:[%s2449_s12 + $0xe0] sm:$0xff] }
 0x566   : > { %v1880_v23 = vpop.eup %1879 }
 0x567   : > { %v1141_v28 = vmul.f32 %v1880_v23, %v2181_v31  ;;  %v1305_v23 = vld [vmem:[%s2447_s10 + $0x70] sm:$0xff] }
 0x569   : > { %v1081_v42 = vpop.f32.mrb[8].mxu0 }
 0x56a   : > { %v1777_v44 = vpop.f32.mrb[9].mxu0  ;;  %v1144_v52 = vmul.f32 %v1866_v43, %v1081_v42 }
 0x56b   : > { %v1037_v47 = vpop.f32.mrb[16].mxu1  ;;  %v1084_v48 = vpop.f32.mrb[10].mxu0 }
 0x56c   : > { %v1145_v53 = vmul.f32 %v1868_v46, %v1084_v48  ;;  %v1771_v54 = vpop.f32.mrb[17].mxu1  ;;  %v1778_v55 = vpop.f32.mrb[11].mxu0  ;;  %v1142_v59 = vmul.f32 %v1870_v51, %v1037_v47 }
 0x56d   : > { %v1040_v56 = vpop.f32.mrb[18].mxu1 }
 0x56e   : > { %v1835_v61 = vpack.i.bf16 %v1145_v53, %v1144_v52  ;;  %v1143_v63 = vmul.f32 %v1872_v14, %v1040_v56  ;;  %v1772_v2 = vpop.f32.mrb[19].mxu1 }
 0x56f   : > { %v1294_v2 = vld [vmem:[%s2447_s10 + $0x18] sm:$0xff] }
 0x570   : > { %v1830_v4 = vpack.i.bf16 %v1143_v63, %v1142_v59  ;;  %1836 = vrot.lane.b32.xlu0 %v1835_v61, %s1916_s17  ;;  %v1292_v63 = vld [vmem:[%s2447_s10 + $0x8] sm:$0xff] }
 0x571   : > { %v1308_v3 = vpack.c.bf16 %v1294_v2, %v1292_v63  ;;  %v1505_v63 = vld [vmem:[%s2449_s12 + $0xb0] sm:$0xff]  ;;  %v1506_v2 = vld [vmem:[%s2449_s12 + $0xb8] sm:$0xff] }
 0x572   : > { %1831 = vrot.lane.b32.xlu1 %v1830_v4, %s1917_s18  ;;  %v1291_v4 = vld [vmem:[%s2447_s10] sm:$0xff] }
 0x573   : > { %v1307_v6 = vpack.c.bf16 %v1293_v5, %v1291_v4  ;;  %1330 = vmatprep.subr.bf16.mxu1 %v1308_v3  ;;  %v1526_v3 = vpack.c.bf16 %v1506_v2, %v1505_v63  ;;  %v1489_v4 = vld [vmem:[%s2449_s12 + $0x30] sm:$0xff]  ;;  %v1490_v5 = vld [vmem:[%s2449_s12 + $0x38] sm:$0xff] }
 0x575   : > { %1331 = vmatpush1.bf16.msra.mxu1 %v1307_v6  ;;  %v1518_v6 = vpack.c.bf16 %v1490_v5, %v1489_v4 }
 0x576   : > { %1332 = vmatprep.subr.bf16.mxu1 %v1310_v9  ;;  %v1527_v9 = vpack.c.bf16 %v1508_v8, %v1507_v7 }
 0x59e   : > { %v1125_v10 = vpop.f32.mrb[20].mxu1 }
 0x59f   : > { %v1783_v12 = vpop.f32.mrb[21].mxu1  ;;  %v1146_v62 = vmul.f32 %v1874_v11, %v1125_v10  ;;  %v1295_v10 = vld [vmem:[%s2447_s10 + $0x20] sm:$0xff]  ;;  %v1297_v11 = vld [vmem:[%s2447_s10 + $0x30] sm:$0xff] }
 0x5a0   : > { %v1128_v15 = vpop.f32.mrb[22].mxu1  ;;  %v1309_v12 = vpack.c.bf16 %v1297_v11, %v1295_v10  ;;  %v1491_v10 = vld [vmem:[%s2449_s12 + $0x40] sm:$0xff]  ;;  %v1492_v11 = vld [vmem:[%s2449_s12 + $0x48] sm:$0xff] }
 0x5a1   : > { %v1147_v16 = vmul.f32 %v1876_v13, %v1128_v15  ;;  %v1784_v17 = vpop.f32.mrb[23].mxu1  ;;  %v1300_v13 = vld [vmem:[%s2447_s10 + $0x48] sm:$0xff]  ;;  %v1302_v15 = vld [vmem:[%s2447_s10 + $0x58] sm:$0xff] }
 0x5a2   : > { %1333 = vmatpush1.bf16.msra.mxu1 %v1309_v12  ;;  %v1301_v17 = vld [vmem:[%s2447_s10 + $0x50] sm:$0xff]  ;;  %v1519_v12 = vpack.c.bf16 %v1492_v11, %v1491_v10 }
 0x5a3   : > { %v1840_v18 = vpack.i.bf16 %v1147_v16, %v1146_v62  ;;  %v1312_v62 = vpack.c.bf16 %v1302_v15, %v1300_v13  ;;  %v1299_v16 = vld [vmem:[%s2447_s10 + $0x40] sm:$0xff]  ;;  %v1509_v13 = vld [vmem:[%s2449_s12 + $0xd0] sm:$0xff]  ;;  %v1510_v15 = vld [vmem:[%s2449_s12 + $0xd8] sm:$0xff] }
 0x5a5   : > { %1841 = vrot.lane.b32.xlu1 %v1840_v18, %s1918_s23  ;;  %v1311_v18 = vpack.c.bf16 %v1301_v17, %v1299_v16  ;;  %1334 = vmatprep.subr.bf16.mxu1 %v1312_v62  ;;  %v1528_v62 = vpack.c.bf16 %v1510_v15, %v1509_v13  ;;  %v1493_v16 = vld [vmem:[%s2449_s12 + $0x50] sm:$0xff]  ;;  %v1494_v17 = vld [vmem:[%s2449_s12 + $0x58] sm:$0xff] }
 0x5a7   : > { %1335 = vmatpush1.bf16.msra.mxu1 %v1311_v18  ;;  %v1520_v18 = vpack.c.bf16 %v1494_v17, %v1493_v16 }
 0x5a8   : > { %1336 = vmatprep.subr.bf16.mxu1 %v1314_v22  ;;  %v1495_v22 = vld [vmem:[%s2449_s12 + $0x60] sm:$0xff] }
 0x5e2   : > { %v1837_v26 = vpop.permute.xlu0 %1836 }
 0x5e3   : > { %v1839_v33 = vunpack.i.h.bf16 %v1837_v26  ;;  %v1838_v35 = vunpack.i.l.bf16 %v1837_v26 }
 0x5e4   : > { %v1832_v21 = vpop.permute.xlu1 %1831 }
 0x5e5   : > { %v1834_v24 = vunpack.i.h.bf16 %v1832_v21  ;;  %v1833_v25 = vunpack.i.l.bf16 %v1832_v21  ;;  %v1303_v21 = vld [vmem:[%s2447_s10 + $0x60] sm:$0xff] }
 0x5e7   : > { %v1173_v30 = vsel %vm678_vm2, %v1141_v28, %v1834_v24  ;;  %v1172_v32 = vsel %vm678_vm2, %v1140_v27, %v1833_v25  ;;  %v1313_v24 = vpack.c.bf16 %v1305_v23, %v1303_v21  ;;  %v1529_v21 = vpack.c.bf16 %v1512_v20, %v1511_v19  ;;  %v1496_v23 = vld [vmem:[%s2449_s12 + $0x68] sm:$0xff] }
 0x5e8   : > { %v1175_v34 = vsel %vm1174_vm3, %v1172_v32, %v1838_v35  ;;  %v1176_v39 = vsel %vm1174_vm3, %v1173_v30, %v1839_v33  ;;  %v1661_v35 = vld [vmem:[%s2445_s8] ss:$0 sm:$0xff] }
 0x5e9   : > { %1337 = vmatpush1.bf16.msra.mxu1 %v1313_v24  ;;  %v1521_v24 = vpack.c.bf16 %v1496_v23, %v1495_v22 }
 0x617   : > { %v1842_v36 = vpop.permute.xlu1 %1841 }
 0x618   : > { %v1844_v38 = vunpack.i.h.bf16 %v1842_v36  ;;  %v1843_v37 = vunpack.i.l.bf16 %v1842_v36 }
 0x61a   : > { %v1179_v40 = vsel %vm1177_vm4, %v1176_v39, %v1844_v38  ;;  %v1178_v41 = vsel %vm1177_vm4, %v1175_v34, %v1843_v37  ;;  %v1662_v39 = vld [vmem:[%s2446_s9] ss:$0 sm:$0xff] }
 0x61b   : > { %v1180_v42 = vpack.c.bf16 %v1179_v40, %v1178_v41 }
 0x61d   : > { %1794 = vmatmul.mubr.msk.bf16.vlgmr.msra.gmra.mrb[12].mxu0 %vm476_vm0, %v1180_v42 }
 0x6f0   : > { %v1237_v31 = vpop.f32.mrb[12].mxu0 }
 0x6f1   : > { %v1238_v43 = vadd.f32 %v1659_v29, %v1237_v31  ;;  %v1795_v44 = vpop.f32.mrb[13].mxu0  ;;  %v1499_v31 = vld [vmem:[%s2449_s12 + $0x80] sm:$0xff] }
 0x6f2   : > { %v1240_v45 = vpop.f32.mrb[14].mxu0 }
 0x6f3   : > { %v2219_v46 = vadd.f32 %v1238_v43, %v2010_v0  ;;  %v1241_v47 = vadd.f32 %v1659_v29, %v1240_v45  ;;  %v1796_v48 = vpop.f32.mrb[15].mxu0  ;;  %v1500_v43 = vld [vmem:[%s2449_s12 + $0x88] sm:$0xff]  ;;  %v1483_v45 = vld [vmem:[%s2449_s12] sm:$0xff] }
 0x6f4   : > { %v1523_v44 = vpack.c.bf16 %v1500_v43, %v1499_v31 }
 0x6f5   : > { %v2222_v49 = vadd.f32 %v1241_v47, %v2012_v1  ;;  %v1248_v50 = vsel %vm476_vm0, %v2219_v46, 0.0  ;;  %v1484_v47 = vld [vmem:[%s2449_s12 + $0x8] sm:$0xff] }
 0x6f6   : > { %1249 = vadd.xlane.f32.xlu1 %v1248_v50  ;;  %v1515_v48 = vpack.c.bf16 %v1484_v47, %v1483_v45  ;;  %1715 = vmatprep.subr.bf16.mxu0 %v1523_v44  ;;  %v1501_v50 = vld [vmem:[%s2449_s12 + $0x90] sm:$0xff] }
 0x6f7   : > { %v1251_v51 = vsel %vm476_vm0, %v2222_v49, 0.0 }
 0x6f8   : > { %1252 = vadd.xlane.f32.xlu0 %v1251_v51  ;;  %1716 = vmatpush3.bf16.msra.mxu0 %v1515_v48  ;;  %v1502_v51 = vld [vmem:[%s2449_s12 + $0x98] sm:$0xff] }
 0x783   : > { %v1250_v52 = vpop.xlane.xlu1 %1249 }
 0x784   : > { %v1254_v53 = vmul.f32 0.015625, %v1250_v52  ;;  %v1524_v52 = vpack.c.bf16 %v1502_v51, %v1501_v50 }
 0x785   : > { %v1253_v54 = vpop.xlane.xlu0 %1252 }
 0x786   : > { %v1256_v55 = vsub.f32 %v2219_v46, %v1254_v53  ;;  %v1255_v0 = vmul.f32 0.015625, %v1253_v54  ;;  %v1485_v53 = vld [vmem:[%s2449_s12 + $0x10] sm:$0xff]  ;;  %v1486_v54 = vld [vmem:[%s2449_s12 + $0x18] sm:$0xff]  ;;  %1717 = vmatprep.subr.bf16.mxu0 %v1524_v52 }
 0x788   : > { %v1257_v14 = vsub.f32 %v2222_v49, %v1255_v0  ;;  %v1258_v56 = vmul.f32 %v1256_v55, %v1256_v55  ;;  %v1503_v0 = vld [vmem:[%s2449_s12 + $0xa0] sm:$0xff] }
 0x78a   : > { %v1260_v1 = vsel %vm476_vm0, %v1258_v56, 0.0  ;;  %v1259_v59 = vmul.f32 %v1257_v14, %v1257_v14 }
 0x78b   : > { %1261 = vadd.xlane.f32.xlu0 %v1260_v1  ;;  %v1487_v1 = vld [vmem:[%s2449_s12 + $0x20] sm:$0xff] }
 0x78c   : > { %v1263_v61 = vsel %vm476_vm0, %v1259_v59, 0.0  ;;  %v1488_v59 = vld [vmem:[%s2449_s12 + $0x28] sm:$0xff] }
 0x78d   : > { %1264 = vadd.xlane.f32.xlu1 %v1263_v61  ;;  %v1517_v61 = vpack.c.bf16 %v1488_v59, %v1487_v1 }
 0x818   : > { %v1262_v25 = vpop.xlane.xlu0 %1261 }
 0x819   : > { %v1266_v26 = vmul.f32 0.015625, %v1262_v25  ;;  %v1513_v25 = vld [vmem:[%s2449_s12 + $0xf0] sm:$0xff] }
 0x81a   : > { %v1265_v27 = vpop.xlane.xlu1 %1264 }
 0x81b   : > { %v1268_v28 = vadd.f32 1e-05, %v1266_v26  ;;  %v1267_v30 = vmul.f32 0.015625, %v1265_v27  ;;  %v1514_v26 = vld [vmem:[%s2449_s12 + $0xf8] sm:$0xff] }
 0x81c   : > { %v1530_v27 = vpack.c.bf16 %v1514_v26, %v1513_v25 }
 0x81d   : > { %1881 = vrsqrt.f32 %v1268_v28  ;;  %v1269_v32 = vadd.f32 1e-05, %v1267_v30  ;;  %v1497_v28 = vld [vmem:[%s2449_s12 + $0x70] sm:$0xff]  ;;  %v1498_v30 = vld [vmem:[%s2449_s12 + $0x78] sm:$0xff] }
 0x81f   : > { %1883 = vrsqrt.f32 %v1269_v32  ;;  %v1522_v32 = vpack.c.bf16 %v1498_v30, %v1497_v28 }
 0x827   : > { %v1882_v33 = vpop.eup %1881 }
 0x828   : > { %v1272_v36 = vmul.f32 %v1882_v33, %v1256_v55  ;;  %v1516_v55 = vpack.c.bf16 %v1486_v54, %v1485_v53  ;;  %v1315_v33 = vld [vmem:[%s2448_s11] sm:$0x3] }
 0x829   : > { %v1884_v38 = vpop.eup %1883 }
 0x82a   : > { %v1280_v37 = vmul.f32 %v1661_v35, %v1272_v36  ;;  %v1273_v34 = vmul.f32 %v1884_v38, %v1257_v14  ;;  %1718 = vmatpush3.bf16.msra.mxu0 %v1516_v55  ;;  %v1504_v14 = vld [vmem:[%s2449_s12 + $0xa8] sm:$0xff]  ;;  %v1324_v36 = vrot.slane %v1315_v33, %v553_v60 }
 0x82b   : > { %v1525_v56 = vpack.c.bf16 %v1504_v14, %v1503_v0 }
 0x82c   : > { %v1281_v40 = vmul.f32 %v1661_v35, %v1273_v34  ;;  %v1288_v41 = vadd.f32 %v1662_v39, %v1280_v37  ;;  %v1320_v35 = vrot.slane %v1315_v33, %v549_v58 }
 0x82d   : > { %1719 = vmatprep.subr.bf16.mxu0 %v1525_v56 }
 0x82e   : > { %v1289_v42 = vadd.f32 %v1662_v39, %v1281_v40  ;;  %1720 = vmatpush3.bf16.msra.mxu0 %v1517_v61 }
 0x82f   : > { %1721 = vmatprep.subr.bf16.mxu0 %v1526_v3 }
 0x830   : > { %v1290_v29 = vpack.c.bf16 %v1289_v42, %v1288_v41 }
 0x832   : > { %1663 = vmatmul.mubr.msk.bf16.vlgmr.msra.gmra.mrb[24].mxu1 %vm476_vm0, %v1290_v29  ;;  %1722 = vmatpush3.bf16.msra.mxu0 %v1518_v6 }
 0x833   : > { %1723 = vmatprep.subr.bf16.mxu0 %v1527_v9 }
 0x836   : > { %1724 = vmatpush3.bf16.msra.mxu0 %v1519_v12 }
 0x837   : > { %1725 = vmatprep.subr.bf16.mxu0 %v1528_v62 }
 0x83a   : > { %1726 = vmatpush3.bf16.msra.mxu0 %v1520_v18 }
 0x83b   : > { %1727 = vmatprep.subr.bf16.mxu0 %v1529_v21 }
 0x83e   : > { %1728 = vmatpush3.bf16.msra.mxu0 %v1521_v24 }
 0x83f   : > { %1729 = vmatprep.subr.bf16.mxu0 %v1530_v27 }
 0x842   : > { %1730 = vmatpush3.bf16.msra.mxu0 %v1522_v32 }
 0x905   : > { %v1364_v38 = vpop.f32.mrb[24].mxu1 }
 0x906   : > { %v2390_v37 = vadd.f32 %v1364_v38, %v1320_v35  ;;  %v1366_v34 = vpop.f32.mrb[25].mxu1 }
 0x907   : > { %v2392_v39 = vadd.f32 %v1366_v34, %v1324_v36  ;;  %v1368_v40 = vpop.f32.mrb[26].mxu1 }
 0x908   : > { %v2395_v41 = vmul.f32 0.70710677, %v2390_v37  ;;  %v2397_v42 = vadd.f32 %v1368_v40, %v1320_v35  ;;  %v1370_v29 = vpop.f32.mrb[27].mxu1 }
 0x909   : > { %v2400_v31 = vmul.f32 0.70710677, %v2392_v39  ;;  %v2402_v58 = vadd.f32 %v1370_v29, %v1324_v36 }
 0x90a   : > { %v1377_v57 = vand.u32 2147483647, %v2395_v41  ;;  %v2406_v60 = vmul.f32 0.70710677, %v2397_v42  ;;  %vm1457_vm5 = vcmp.ge.f32.partialorder %v2395_v41, 0.0 }
 0x90b   : > { %v1378_v43 = vand.u32 2147483647, %v2400_v31  ;;  %v2410_v44 = vmul.f32 0.70710677, %v2402_v58  ;;  %vm1458_vm6 = vcmp.ge.f32.partialorder %v2400_v31, 0.0 }
 0x90c   : > { %v1381_v45 = vmul.f32 0.3275911, %v1377_v57  ;;  %v1379_v47 = vand.u32 2147483647, %v2406_v60  ;;  %v1433_v14 = vsub.f32 0.0, %v1377_v57  ;;  %vm1459_vm7 = vcmp.ge.f32.partialorder %v2406_v60, 0.0 }
 0x90d   : > { %v1382_v48 = vmul.f32 0.3275911, %v1378_v43  ;;  %v1380_v50 = vand.u32 2147483647, %v2410_v44  ;;  %v1434_v56 = vsub.f32 0.0, %v1378_v43  ;;  %vm1460_vm8 = vcmp.ge.f32.partialorder %v2410_v44, 0.0 }
 0x90e   : > { %v1385_v51 = vadd.f32 1.0, %v1381_v45  ;;  %v1383_v52 = vmul.f32 0.3275911, %v1379_v47  ;;  %v1437_v59 = vmul.f32 %v1433_v14, %v1377_v57  ;;  %v1435_v61 = vsub.f32 0.0, %v1379_v47 }
 0x90f   : > { %v1386_v53 = vadd.f32 1.0, %v1382_v48  ;;  %v1384_v54 = vmul.f32 0.3275911, %v1380_v50  ;;  %v1438_v3 = vmul.f32 %v1434_v56, %v1378_v43  ;;  %v1436_v5 = vsub.f32 0.0, %v1380_v50 }
 0x910   : > { %1885 = vrcp.f32 %v1385_v51  ;;  %v1387_v55 = vadd.f32 1.0, %v1383_v52  ;;  %v1441_v8 = vmul.f32 1.442695, %v1437_v59  ;;  %v1439_v10 = vmul.f32 %v1435_v61, %v1379_v47 }
 0x911   : > { %1887 = vrcp.f32 %v1386_v53  ;;  %v1388_v0 = vadd.f32 1.0, %v1384_v54  ;;  %v1443_v12 = vmul.f32 1.442695, %v1438_v3  ;;  %v1440_v16 = vmul.f32 %v1436_v5, %v1380_v50 }
 0x912   : > { %1889 = vrcp.f32 %v1387_v55  ;;  %v1445_v21 = vmul.f32 1.442695, %v1439_v10 }
 0x913   : > { %1891 = vrcp.f32 %v1388_v0  ;;  %v1447_v26 = vmul.f32 1.442695, %v1440_v16  ;;  %v1471_v16 = vmul.f32 0.5, %v2397_v42  ;;  %v1672_v42 = vld [vmem:[%s2450_s13] ss:$0 sm:$0xff] }
 0x914   : > { %1893 = vpow2.f32 %v1441_v8 }
 0x915   : > { %1895 = vpow2.f32 %v1443_v12 }
 0x916   : > { %1897 = vpow2.f32 %v1445_v21 }
 0x917   : > { %1899 = vpow2.f32 %v1447_v26 }
 0x91a   : > { %v1886_v1 = vpop.eup %1885 }
 0x91b   : > { %v1888_v63 = vpop.eup %1887  ;;  %v1397_v2 = vmul.f32 1.0614054, %v1886_v1 }
 0x91c   : > { %v1398_v4 = vmul.f32 1.0614054, %v1888_v63  ;;  %v1890_v7 = vpop.eup %1889 }
 0x91d   : > { %v1664_v6 = vadd.f32 -1.4531521, %v1397_v2  ;;  %v1399_v13 = vmul.f32 1.0614054, %v1890_v7  ;;  %v1892_v15 = vpop.eup %1891 }
 0x91e   : > { %v1665_v9 = vadd.f32 -1.4531521, %v1398_v4  ;;  %v1400_v19 = vmul.f32 1.0614054, %v1892_v15  ;;  %v1894_v48 = vpop.eup %1893 }
 0x91f   : > { %v1405_v11 = vmul.f32 %v1886_v1, %v1664_v6  ;;  %v1666_v18 = vadd.f32 -1.4531521, %v1399_v13  ;;  %v1896_v51 = vpop.eup %1895 }
 0x920   : > { %v1406_v62 = vmul.f32 %v1888_v63, %v1665_v9  ;;  %v1667_v24 = vadd.f32 -1.4531521, %v1400_v19  ;;  %v1898_v59 = vpop.eup %1897 }
 0x921   : > { %v1409_v17 = vadd.f32 1.4214138, %v1405_v11  ;;  %v1407_v23 = vmul.f32 %v1890_v7, %v1666_v18  ;;  %v1900_v5 = vpop.eup %1899 }
 0x922   : > { %v1410_v20 = vadd.f32 1.4214138, %v1406_v62  ;;  %v1408_v30 = vmul.f32 %v1892_v15, %v1667_v24 }
 0x923   : > { %v1413_v22 = vmul.f32 %v1886_v1, %v1409_v17  ;;  %v1411_v28 = vadd.f32 1.4214138, %v1407_v23  ;;  %v1470_v17 = vmul.f32 0.5, %v2392_v39 }
 0x924   : > { %v1414_v25 = vmul.f32 %v1888_v63, %v1410_v20  ;;  %v1412_v36 = vadd.f32 1.4214138, %v1408_v30  ;;  %v1472_v20 = vmul.f32 0.5, %v2402_v58 }
 0x925   : > { %v1668_v27 = vadd.f32 -0.28449672, %v1413_v22  ;;  %v1415_v35 = vmul.f32 %v1890_v7, %v1411_v28 }
 0x926   : > { %v1669_v32 = vadd.f32 -0.28449672, %v1414_v25  ;;  %v1416_v29 = vmul.f32 %v1892_v15, %v1412_v36 }
 0x927   : > { %v1421_v33 = vmul.f32 %v1886_v1, %v1668_v27  ;;  %v1670_v40 = vadd.f32 -0.28449672, %v1415_v35 }
 0x928   : > { %v1422_v38 = vmul.f32 %v1888_v63, %v1669_v32  ;;  %v1671_v47 = vadd.f32 -0.28449672, %v1416_v29 }
 0x929   : > { %v1425_v34 = vadd.f32 0.2548296, %v1421_v33  ;;  %v1423_v45 = vmul.f32 %v1890_v7, %v1670_v40 }
 0x92a   : > { %v1426_v57 = vadd.f32 0.2548296, %v1422_v38  ;;  %v1424_v54 = vmul.f32 %v1892_v15, %v1671_v47 }
 0x92b   : > { %v1429_v43 = vmul.f32 %v1886_v1, %v1425_v34  ;;  %v1427_v53 = vadd.f32 0.2548296, %v1423_v45 }
 0x92c   : > { %v1430_v50 = vmul.f32 %v1888_v63, %v1426_v57  ;;  %v1428_v56 = vadd.f32 0.2548296, %v1424_v54 }
 0x92d   : > { %v1449_v52 = vmul.f32 %v1894_v48, %v1429_v43  ;;  %v1431_v14 = vmul.f32 %v1890_v7, %v1427_v53  ;;  %v1469_v7 = vmul.f32 0.5, %v2390_v37 }
 0x92e   : > { %v1450_v55 = vmul.f32 %v1896_v51, %v1430_v50  ;;  %v1432_v4 = vmul.f32 %v1892_v15, %v1428_v56 }
 0x92f   : > { %v1453_v0 = vsub.f32 1.0, %v1449_v52  ;;  %v1451_v3 = vmul.f32 %v1898_v59, %v1431_v14 }
 0x930   : > { %v1454_v61 = vsub.f32 1.0, %v1450_v55  ;;  %v1452_v63 = vmul.f32 %v1900_v5, %v1432_v4 }
 0x931   : > { %v1461_v2 = vsub.f32 0.0, %v1453_v0  ;;  %v1455_v8 = vsub.f32 1.0, %v1451_v3 }
 0x932   : > { %v1462_v1 = vsub.f32 0.0, %v1454_v61  ;;  %v1456_v11 = vsub.f32 1.0, %v1452_v63 }
 0x933   : > { %v1465_v6 = vsel %vm1457_vm5, %v1453_v0, %v1461_v2  ;;  %v1463_v10 = vsub.f32 0.0, %v1455_v8 }
 0x934   : > { %v1466_v9 = vsel %vm1458_vm6, %v1454_v61, %v1462_v1  ;;  %v1473_v12 = vadd.f32 1.0, %v1465_v6  ;;  %v1464_v62 = vsub.f32 0.0, %v1456_v11 }
 0x935   : > { %v1467_v13 = vsel %vm1459_vm7, %v1455_v8, %v1463_v10  ;;  %v1474_v15 = vadd.f32 1.0, %v1466_v9 }
 0x936   : > { %v1475_v41 = vadd.f32 1.0, %v1467_v13  ;;  %v1468_v18 = vsel %vm1460_vm8, %v1456_v11, %v1464_v62  ;;  %v1477_v31 = vmul.f32 %v1473_v12, %v1469_v7 }
 0x937   : > { %v1476_v21 = vadd.f32 1.0, %v1468_v18  ;;  %v1478_v60 = vmul.f32 %v1474_v15, %v1470_v17 }
 0x938   : > { %v1479_v19 = vmul.f32 %v1475_v41, %v1471_v16 }
 0x939   : > { %v1480_v37 = vmul.f32 %v1476_v21, %v1472_v20 }
 0x93a   : > { %v1481_v22 = vpack.c.bf16 %v1479_v19, %v1477_v31 }
 0x93b   : > { %v1482_v23 = vpack.c.bf16 %v1480_v37, %v1478_v60 }
 0x93d   : > { %1570 = vmatprep.mubr.bf16.mxu0 %v1482_v23 }
 0x93e   : > { %1571 = vmatmul.mubr.bf16.vlgmr.msra.gmra.mrb[16].mxu0 %v1481_v22 }
 0xa11   : > { %v1731_v24 = vpop.f32.mrb[16].mxu0 }
 0xa12   : > { %v1732_v44 = vpop.f32.mrb[17].mxu0 }
 0xa13   : > { %v1733_v39 = vadd.f32 %v1732_v44, %v1731_v24  ;;  %v1734_v25 = vpop.f32.mrb[18].mxu0 }
 0xa14   : > { %v1735_v26 = vpop.f32.mrb[19].mxu0 }
 0xa15   : > { %v1573_v27 = vadd.f32 %v1733_v39, %v1672_v42  ;;  %v1736_v28 = vadd.f32 %v1735_v26, %v1734_v25 }
 0xa17   : > { %v1579_v58 = vadd.f32 %v1573_v27, %v2219_v46  ;;  %v1576_v30 = vadd.f32 %v1736_v28, %v1672_v42 }
 0xa19   : > { %1581 = vst.msk [vmem:[%s469_s28] sm:$0xff] %vm476_vm0, %v1579_v58  ;;  %v1580_v32 = vadd.f32 %v1576_v30, %v2222_v49 }
 0xa1b   : > { %1582 = vst.msk [vmem:[%s469_s28 + $0x8] sm:$0xff] %vm476_vm0, %v1580_v32 }
 0xa1c PF: > { %s24_s29 = sadd.s32 1, %s1907_s29  }
 0xa1d   : > { %p21_p4 = scmp.ge.s32.totalorder %s24_s29, 4  }
 0xa1f   :  { %23 = sbr.rel (!%p21_p4) target bundleno = 1 (0x1), region = 106 }

</bundles_post_ra>
